<compile_context>
chip_gen: v7x
topology: tpu7x:2x2x1
jax: 0.10.0
libtpu: 0.0.40
codegen_flags: <defaults>
</compile_context>

<pallas_src>
import functools

import jax
import jax.numpy as jnp
from jax.experimental import pallas as pl
from jax.experimental.pallas import tpu as pltpu

K = 7          # kernel size
PAD = 3        # reflect padding (k=7, p=3 -> 'same' output size)
_TAIL = 8      # lane tail so the largest (kh, kw)-shifted window stays in-bounds
_VMEM_BUDGET = 40 * 1024 * 1024   # per-step working-set target (fits v7x's 64 MiB)


def _round_up(v, m):
    return -(-v // m) * m


def _conv7x7_kernel(xb_ref, w_ref, b_ref, o_ref, stage_ref, *, wr):
    """One (batch, H-band) tile per grid step.

    xb_ref   : (1, 1, C_in_pad, (Hb+6)*Wr + _TAIL) reflect-padded band (incl. halo),
               spatial flattened over (rows, padded width) -> lane-dense input.
    w_ref    : (K, C_out, K*C_in_pad)   w[kh, co, kw*C_in_pad + ci].
    b_ref    : (C_out, 1)               bias (f32).
    o_ref    : (1, C_out, Hb*Wr)        output band, flat -> lane-dense stores.
    stage_ref: (K*C_in_pad, (Hb+6)*Wr)  the K kw-shifted copies of the band.
    """
    c_in_pad = xb_ref.shape[2]
    lstage = stage_ref.shape[1]
    lb = o_ref.shape[2]

    # Stage the K kw-shifted copies of the band ONCE (7 stores instead of the 49
    # per-tap im2col stores).  Sublane start kw*C_in_pad is 8-aligned and the row
    # count is a multiple of 8 -> unmasked full-sublane-group stores.
    for kw in range(K):
        stage_ref[pl.ds(kw * c_in_pad, c_in_pad), :] = (
            xb_ref[0, 0, :, pl.ds(kw, lstage)])

    # K accumulating MXU matmuls, one per kh.  Each RHS is a lane-offset sub-view of
    # the staging buffer (offset kh*wr; lane-aligned when wr % 128 == 0), contraction
    # = K*C_in_pad.  On v7x the partial products accumulate in-place in the MRB.
    acc = jnp.dot(w_ref[0], stage_ref[:, pl.ds(0, lb)],
                  preferred_element_type=jnp.float32)
    for kh in range(1, K):
        acc = acc + jnp.dot(w_ref[kh], stage_ref[:, pl.ds(kh * wr, lb)],
                            preferred_element_type=jnp.float32)

    # Fused epilogue: bias add + dtype cast, lane-dense store.
    o_ref[0, :, :] = (acc + b_ref[...]).astype(o_ref.dtype)


def _vmem_bytes(hb, wr, c_in_pad, c_out, in_bytes, out_bytes):
    """Working-set estimate for one grid step (incl. BlockSpec double-buffering)."""
    lb = hb * wr
    lin = (hb + 2 * PAD) * wr + _TAIL
    lst = (hb + 2 * PAD) * wr
    return (2 * c_in_pad * lin * in_bytes              # input band (double-buffered)
            + K * c_in_pad * lst * in_bytes            # kw-shift staging scratch
            + 2 * c_out * lb * out_bytes               # output band (double-buffered)
            + c_out * lb * 4                           # f32 accumulator
            + 2 * K * c_out * K * c_in_pad * in_bytes  # weights
            + 2 * c_out * 4)                           # bias


def _pick_band_rows(h, wr, c_in_pad, c_out, in_bytes, out_bytes, prefer_multiband):
    """Largest divisor of H with a 128-aligned flat band (or Hb == H) that fits the
    VMEM budget.  Bigger bands amortize the 6-row halo re-DMA and per-step overhead."""
    cands = [hb for hb in range(1, h + 1)
             if h % hb == 0 and ((hb * wr) % 128 == 0 or hb == h)]
    est = lambda hb: _vmem_bytes(hb, wr, c_in_pad, c_out, in_bytes, out_bytes)
    fits = [hb for hb in cands if est(hb) <= _VMEM_BUDGET]
    if prefer_multiband:              # keep >=2 grid steps so v7x's two TCs both work
        multi = [hb for hb in fits if h // hb >= 2]
        if multi:
            fits = multi
    if fits:
        return max(fits)
    return min(cands, key=est)        # nothing fits the budget: smallest footprint


def feature_map_block(x, weight, bias, *, band_rows=None, compute_dtype=None):
    """x: (N, C_in, H, W); weight: (C_out, C_in, 7, 7); bias: (C_out,).

    Returns (N, C_out, H, W), matching
    nn.Conv2d(kernel_size=7, padding=3, padding_mode='reflect').
    compute_dtype: pass jnp.bfloat16 to halve DMA/staging traffic (f32 accumulation).
    """
    n, c_in, h, w = x.shape
    c_out = weight.shape[0]
    if h <= PAD or w <= PAD:
        raise ValueError("reflect padding requires H, W > 3")

    cdt = jnp.dtype(compute_dtype) if compute_dtype is not None else jnp.dtype(x.dtype)
    odt = jnp.dtype(x.dtype)
    in_bytes = cdt.itemsize
    out_bytes = odt.itemsize

    c_in_pad = _round_up(c_in, 8)       # sublane-aligned channel groups in staging
    hp = h + 2 * PAD
    wp = w + 2 * PAD
    wr8 = _round_up(wp, 8)
    wr128 = _round_up(wp, 128)
    # Lane-align the row pitch when it costs <~15% extra width: then every kh*wr
    # matmul sub-view is lane-aligned (no cross-lane rotates); only the 7 kw-shifted
    # staging reads rotate.
    wr = wr128 if wr128 <= int(wr8 * 1.15) else wr8
    # Over-read lanes (kw/kh shifts past the band) must only feed cropped columns.
    assert wr >= wp and _TAIL >= 2 * PAD

    hb = band_rows if band_rows is not None else _pick_band_rows(
        h, wr, c_in_pad, c_out, in_bytes, out_bytes, prefer_multiband=(n == 1))
    assert h % hb == 0
    nb = h // hb                        # number of H bands
    lb = hb * wr                        # flat length of one output band
    lband = (hb + 2 * PAD) * wr         # flat length of one input band (incl. halo)
    kc = K * c_in_pad                   # contraction per kh-matmul

    # ---- XLA-side glue (pad + halo-band gather; cheap relative to the conv) --------
    xp = jnp.pad(x, ((0, 0), (0, 0), (PAD, PAD), (PAD, PAD)), mode="reflect")
    xp = jnp.pad(xp, ((0, 0), (0, c_in_pad - c_in), (0, 0), (0, wr - wp)))
    rows = jnp.arange(nb)[:, None] * hb + jnp.arange(hb + 2 * PAD)[None, :]
    xb = xp[:, :, rows, :]                                     # (N, Cp, nb, hb+6, Wr)
    xb = jnp.transpose(xb, (0, 2, 1, 3, 4)).reshape(n, nb, c_in_pad, lband)
    xb = jnp.pad(xb, ((0, 0), (0, 0), (0, 0), (0, _TAIL))).astype(cdt)

    wpad = jnp.pad(weight, ((0, 0), (0, c_in_pad - c_in), (0, 0), (0, 0)))
    w3 = jnp.transpose(wpad, (2, 0, 3, 1)).reshape(K, c_out, kc).astype(cdt)
    b2 = bias.astype(jnp.float32).reshape(c_out, 1)

    kernel = functools.partial(_conv7x7_kernel, wr=wr)
    est = _vmem_bytes(hb, wr, c_in_pad, c_out, in_bytes, out_bytes)
    vmem_limit = int(min(max(est * 1.4 + (4 << 20), 32 << 20), 60 << 20))

    out_flat = pl.pallas_call(
        kernel,
        out_shape=jax.ShapeDtypeStruct((n, c_out, h * wr), odt),
        grid_spec=pltpu.PrefetchScalarGridSpec(
            num_scalar_prefetch=0,
            grid=(n, nb),
            in_specs=[
                pl.BlockSpec((1, 1, c_in_pad, lband + _TAIL),
                             lambda ni, hi: (ni, hi, 0, 0)),
                pl.BlockSpec((K, c_out, kc), lambda ni, hi: (0, 0, 0)),
                pl.BlockSpec((c_out, 1), lambda ni, hi: (0, 0)),
            ],
            out_specs=pl.BlockSpec((1, c_out, lb), lambda ni, hi: (ni, 0, hi)),
            scratch_shapes=[pltpu.VMEM((kc, lband), cdt)],
        ),
        compiler_params=pltpu.CompilerParams(
            dimension_semantics=("parallel", "parallel"),
            vmem_limit_bytes=vmem_limit,
        ),
        cost_estimate=pl.CostEstimate(
            flops=2 * n * h * w * c_out * K * K * c_in,
            transcendentals=0,
            bytes_accessed=int(xb.size * in_bytes + w3.size * in_bytes
                               + b2.size * 4 + n * c_out * h * wr * out_bytes),
        ),
    )(xb, w3, b2)

    # (N, C_out, H*Wr) -> (N, C_out, H, Wr) -> crop the width-pitch padding.
    return out_flat.reshape(n, c_out, h, wr)[:, :, :, :w]


if __name__ == "__main__":
    N, C_IN, C_OUT, H, W = 2, 4, 8, 32, 32
    key = jax.random.PRNGKey(0)
    kx, kw_, kb = jax.random.split(key, 3)

    x = jax.random.normal(kx, (N, C_IN, H, W), dtype=jnp.float32)
    fan_in = C_IN * K * K
    bound = 1.0 / (fan_in ** 0.5)
    weight = jax.random.uniform(kw_, (C_OUT, C_IN, K, K),
                                minval=-bound, maxval=bound, dtype=jnp.float32)
    bias = jax.random.uniform(kb, (C_OUT,), minval=-bound, maxval=bound,
                              dtype=jnp.float32)

    out = feature_map_block(x, weight, bias)
    jax.block_until_ready(out)

    # Reference: f32 XLA conv on the reflect-padded input (== nn.Conv2d semantics).
    xp_ref = jnp.pad(x, ((0, 0), (0, 0), (PAD, PAD), (PAD, PAD)), mode="reflect")
    ref = jax.lax.conv_general_dilated(
        xp_ref, weight, window_strides=(1, 1), padding="VALID",
        dimension_numbers=("NCHW", "OIHW", "NCHW"),
        precision=jax.lax.Precision.HIGHEST) + bias[None, :, None, None]

    assert out.shape == (N, C_OUT, H, W)
    err = float(jnp.max(jnp.abs(out - ref)))
    assert err < 2e-4, f"max abs error {err}"

    print("KERNEL_OK")
</pallas_src>

<mosaic_0001>
module attributes {stable_mosaic.version = 11 : i64} {
  func.func @_conv7x7_kernel(%arg0: i32, %arg1: i32, %arg2: memref<1x1x8x1528xf32, #tpu.memory_space<vmem>>, %arg3: memref<7x8x56xf32, #tpu.memory_space<vmem>>, %arg4: memref<8x1xf32, #tpu.memory_space<vmem>>, %arg5: memref<1x8x1280xf32, #tpu.memory_space<vmem>>, %arg6: memref<56x1520xf32, #tpu.memory_space<vmem>>) attributes {dimension_semantics = [#tpu.dimension_semantics<parallel>, #tpu.dimension_semantics<parallel>], iteration_bounds = array<i64: 2, 1>, scalar_prefetch = 0 : i64, scratch_operands = 1 : i64, tpu.core_type = #tpu.core_type<tc>, window_params = [{transform_indices = @transform_0, window_bounds = array<i64: 1, 1, 8, 1528>}, {pipeline_mode = #tpu.pipeline_mode<synchronous>, transform_indices = @transform_1, window_bounds = array<i64: 7, 8, 56>}, {pipeline_mode = #tpu.pipeline_mode<synchronous>, transform_indices = @transform_2, window_bounds = array<i64: 8, 1>}, {transform_indices = @transform_3, window_bounds = array<i64: 1, 8, 1280>}]} {
    %c0 = arith.constant 0 : index
    %c0_0 = arith.constant 0 : index
    %c0_1 = arith.constant 0 : index
    %c0_2 = arith.constant 0 : index
    %0 = vector.load %arg2[%c0, %c0_0, %c0_1, %c0_2] : memref<1x1x8x1528xf32, #tpu.memory_space<vmem>>, vector<1x1x8x1520xf32>
    %1 = vector.shape_cast %0 : vector<1x1x8x1520xf32> to vector<8x1520xf32>
    %c0_3 = arith.constant 0 : index
    %c0_4 = arith.constant 0 : index
    %2 = vector.load %arg6[%c0_3, %c0_4] : memref<56x1520xf32, #tpu.memory_space<vmem>>, vector<8x1520xf32>
    tpu.vector_store %arg6[%c0_3, %c0_4], %1 {strides = array<i32>} : memref<56x1520xf32, #tpu.memory_space<vmem>>, vector<8x1520xf32>,
    %c0_5 = arith.constant 0 : index
    %c0_6 = arith.constant 0 : index
    %c0_7 = arith.constant 0 : index
    %c1 = arith.constant 1 : index
    %3 = vector.load %arg2[%c0_5, %c0_6, %c0_7, %c1] : memref<1x1x8x1528xf32, #tpu.memory_space<vmem>>, vector<1x1x8x1520xf32>
    %4 = vector.shape_cast %3 : vector<1x1x8x1520xf32> to vector<8x1520xf32>
    %c8 = arith.constant 8 : index
    %c0_8 = arith.constant 0 : index
    %5 = vector.load %arg6[%c8, %c0_8] : memref<56x1520xf32, #tpu.memory_space<vmem>>, vector<8x1520xf32>
    tpu.vector_store %arg6[%c8, %c0_8], %4 {strides = array<i32>} : memref<56x1520xf32, #tpu.memory_space<vmem>>, vector<8x1520xf32>,
    %c0_9 = arith.constant 0 : index
    %c0_10 = arith.constant 0 : index
    %c0_11 = arith.constant 0 : index
    %c2 = arith.constant 2 : index
    %6 = vector.load %arg2[%c0_9, %c0_10, %c0_11, %c2] : memref<1x1x8x1528xf32, #tpu.memory_space<vmem>>, vector<1x1x8x1520xf32>
    %7 = vector.shape_cast %6 : vector<1x1x8x1520xf32> to vector<8x1520xf32>
    %c16 = arith.constant 16 : index
    %c0_12 = arith.constant 0 : index
    %8 = vector.load %arg6[%c16, %c0_12] : memref<56x1520xf32, #tpu.memory_space<vmem>>, vector<8x1520xf32>
    tpu.vector_store %arg6[%c16, %c0_12], %7 {strides = array<i32>} : memref<56x1520xf32, #tpu.memory_space<vmem>>, vector<8x1520xf32>,
    %c0_13 = arith.constant 0 : index
    %c0_14 = arith.constant 0 : index
    %c0_15 = arith.constant 0 : index
    %c3 = arith.constant 3 : index
    %9 = vector.load %arg2[%c0_13, %c0_14, %c0_15, %c3] : memref<1x1x8x1528xf32, #tpu.memory_space<vmem>>, vector<1x1x8x1520xf32>
    %10 = vector.shape_cast %9 : vector<1x1x8x1520xf32> to vector<8x1520xf32>
    %c24 = arith.constant 24 : index
    %c0_16 = arith.constant 0 : index
    %11 = vector.load %arg6[%c24, %c0_16] : memref<56x1520xf32, #tpu.memory_space<vmem>>, vector<8x1520xf32>
    tpu.vector_store %arg6[%c24, %c0_16], %10 {strides = array<i32>} : memref<56x1520xf32, #tpu.memory_space<vmem>>, vector<8x1520xf32>,
    %c0_17 = arith.constant 0 : index
    %c0_18 = arith.constant 0 : index
    %c0_19 = arith.constant 0 : index
    %c4 = arith.constant 4 : index
    %12 = vector.load %arg2[%c0_17, %c0_18, %c0_19, %c4] : memref<1x1x8x1528xf32, #tpu.memory_space<vmem>>, vector<1x1x8x1520xf32>
    %13 = vector.shape_cast %12 : vector<1x1x8x1520xf32> to vector<8x1520xf32>
    %c32 = arith.constant 32 : index
    %c0_20 = arith.constant 0 : index
    %14 = vector.load %arg6[%c32, %c0_20] : memref<56x1520xf32, #tpu.memory_space<vmem>>, vector<8x1520xf32>
    tpu.vector_store %arg6[%c32, %c0_20], %13 {strides = array<i32>} : memref<56x1520xf32, #tpu.memory_space<vmem>>, vector<8x1520xf32>,
    %c0_21 = arith.constant 0 : index
    %c0_22 = arith.constant 0 : index
    %c0_23 = arith.constant 0 : index
    %c5 = arith.constant 5 : index
    %15 = vector.load %arg2[%c0_21, %c0_22, %c0_23, %c5] : memref<1x1x8x1528xf32, #tpu.memory_space<vmem>>, vector<1x1x8x1520xf32>
    %16 = vector.shape_cast %15 : vector<1x1x8x1520xf32> to vector<8x1520xf32>
    %c40 = arith.constant 40 : index
    %c0_24 = arith.constant 0 : index
    %17 = vector.load %arg6[%c40, %c0_24] : memref<56x1520xf32, #tpu.memory_space<vmem>>, vector<8x1520xf32>
    tpu.vector_store %arg6[%c40, %c0_24], %16 {strides = array<i32>} : memref<56x1520xf32, #tpu.memory_space<vmem>>, vector<8x1520xf32>,
    %c0_25 = arith.constant 0 : index
    %c0_26 = arith.constant 0 : index
    %c0_27 = arith.constant 0 : index
    %c6 = arith.constant 6 : index
    %18 = vector.load %arg2[%c0_25, %c0_26, %c0_27, %c6] : memref<1x1x8x1528xf32, #tpu.memory_space<vmem>>, vector<1x1x8x1520xf32>
    %19 = vector.shape_cast %18 : vector<1x1x8x1520xf32> to vector<8x1520xf32>
    %c48 = arith.constant 48 : index
    %c0_28 = arith.constant 0 : index
    %20 = vector.load %arg6[%c48, %c0_28] : memref<56x1520xf32, #tpu.memory_space<vmem>>, vector<8x1520xf32>
    tpu.vector_store %arg6[%c48, %c0_28], %19 {strides = array<i32>} : memref<56x1520xf32, #tpu.memory_space<vmem>>, vector<8x1520xf32>,
    %c0_29 = arith.constant 0 : index
    %c0_30 = arith.constant 0 : index
    %c0_31 = arith.constant 0 : index
    %21 = vector.load %arg3[%c0_29, %c0_30, %c0_31] : memref<7x8x56xf32, #tpu.memory_space<vmem>>, vector<1x8x56xf32>
    %22 = vector.shape_cast %21 : vector<1x8x56xf32> to vector<8x56xf32>
    %c0_32 = arith.constant 0 : index
    %c0_33 = arith.constant 0 : index
    %23 = vector.load %arg6[%c0_32, %c0_33] : memref<56x1520xf32, #tpu.memory_space<vmem>>, vector<56x1280xf32>
    %cst = arith.constant dense<0.000000e+00> : vector<8x1280xf32>
    %24 = tpu.matmul %22, %23, %cst {dimension_numbers = #tpu.dot_dimension_numbers<[1], [0], [0], [1], [0, 0, 1, 1], [], []>} : vector<8x56xf32>, vector<56x1280xf32>, vector<8x1280xf32> -> vector<8x1280xf32>
    %c1_34 = arith.constant 1 : index
    %c0_35 = arith.constant 0 : index
    %c0_36 = arith.constant 0 : index
    %25 = vector.load %arg3[%c1_34, %c0_35, %c0_36] : memref<7x8x56xf32, #tpu.memory_space<vmem>>, vector<1x8x56xf32>
    %26 = vector.shape_cast %25 : vector<1x8x56xf32> to vector<8x56xf32>
    %c0_37 = arith.constant 0 : index
    %c40_38 = arith.constant 40 : index
    %27 = vector.load %arg6[%c0_37, %c40_38] : memref<56x1520xf32, #tpu.memory_space<vmem>>, vector<56x1280xf32>
    %cst_39 = arith.constant dense<0.000000e+00> : vector<8x1280xf32>
    %28 = tpu.matmul %26, %27, %cst_39 {dimension_numbers = #tpu.dot_dimension_numbers<[1], [0], [0], [1], [0, 0, 1, 1], [], []>} : vector<8x56xf32>, vector<56x1280xf32>, vector<8x1280xf32> -> vector<8x1280xf32>
    %29 = arith.addf %24, %28 : vector<8x1280xf32>
    %c2_40 = arith.constant 2 : index
    %c0_41 = arith.constant 0 : index
    %c0_42 = arith.constant 0 : index
    %30 = vector.load %arg3[%c2_40, %c0_41, %c0_42] : memref<7x8x56xf32, #tpu.memory_space<vmem>>, vector<1x8x56xf32>
    %31 = vector.shape_cast %30 : vector<1x8x56xf32> to vector<8x56xf32>
    %c0_43 = arith.constant 0 : index
    %c80 = arith.constant 80 : index
    %32 = vector.load %arg6[%c0_43, %c80] : memref<56x1520xf32, #tpu.memory_space<vmem>>, vector<56x1280xf32>
    %cst_44 = arith.constant dense<0.000000e+00> : vector<8x1280xf32>
    %33 = tpu.matmul %31, %32, %cst_44 {dimension_numbers = #tpu.dot_dimension_numbers<[1], [0], [0], [1], [0, 0, 1, 1], [], []>} : vector<8x56xf32>, vector<56x1280xf32>, vector<8x1280xf32> -> vector<8x1280xf32>
    %34 = arith.addf %29, %33 : vector<8x1280xf32>
    %c3_45 = arith.constant 3 : index
    %c0_46 = arith.constant 0 : index
    %c0_47 = arith.constant 0 : index
    %35 = vector.load %arg3[%c3_45, %c0_46, %c0_47] : memref<7x8x56xf32, #tpu.memory_space<vmem>>, vector<1x8x56xf32>
    %36 = vector.shape_cast %35 : vector<1x8x56xf32> to vector<8x56xf32>
    %c0_48 = arith.constant 0 : index
    %c120 = arith.constant 120 : index
    %37 = vector.load %arg6[%c0_48, %c120] : memref<56x1520xf32, #tpu.memory_space<vmem>>, vector<56x1280xf32>
    %cst_49 = arith.constant dense<0.000000e+00> : vector<8x1280xf32>
    %38 = tpu.matmul %36, %37, %cst_49 {dimension_numbers = #tpu.dot_dimension_numbers<[1], [0], [0], [1], [0, 0, 1, 1], [], []>} : vector<8x56xf32>, vector<56x1280xf32>, vector<8x1280xf32> -> vector<8x1280xf32>
    %39 = arith.addf %34, %38 : vector<8x1280xf32>
    %c4_50 = arith.constant 4 : index
    %c0_51 = arith.constant 0 : index
    %c0_52 = arith.constant 0 : index
    %40 = vector.load %arg3[%c4_50, %c0_51, %c0_52] : memref<7x8x56xf32, #tpu.memory_space<vmem>>, vector<1x8x56xf32>
    %41 = vector.shape_cast %40 : vector<1x8x56xf32> to vector<8x56xf32>
    %c0_53 = arith.constant 0 : index
    %c160 = arith.constant 160 : index
    %42 = vector.load %arg6[%c0_53, %c160] : memref<56x1520xf32, #tpu.memory_space<vmem>>, vector<56x1280xf32>
    %cst_54 = arith.constant dense<0.000000e+00> : vector<8x1280xf32>
    %43 = tpu.matmul %41, %42, %cst_54 {dimension_numbers = #tpu.dot_dimension_numbers<[1], [0], [0], [1], [0, 0, 1, 1], [], []>} : vector<8x56xf32>, vector<56x1280xf32>, vector<8x1280xf32> -> vector<8x1280xf32>
    %44 = arith.addf %39, %43 : vector<8x1280xf32>
    %c5_55 = arith.constant 5 : index
    %c0_56 = arith.constant 0 : index
    %c0_57 = arith.constant 0 : index
    %45 = vector.load %arg3[%c5_55, %c0_56, %c0_57] : memref<7x8x56xf32, #tpu.memory_space<vmem>>, vector<1x8x56xf32>
    %46 = vector.shape_cast %45 : vector<1x8x56xf32> to vector<8x56xf32>
    %c0_58 = arith.constant 0 : index
    %c200 = arith.constant 200 : index
    %47 = vector.load %arg6[%c0_58, %c200] : memref<56x1520xf32, #tpu.memory_space<vmem>>, vector<56x1280xf32>
    %cst_59 = arith.constant dense<0.000000e+00> : vector<8x1280xf32>
    %48 = tpu.matmul %46, %47, %cst_59 {dimension_numbers = #tpu.dot_dimension_numbers<[1], [0], [0], [1], [0, 0, 1, 1], [], []>} : vector<8x56xf32>, vector<56x1280xf32>, vector<8x1280xf32> -> vector<8x1280xf32>
    %49 = arith.addf %44, %48 : vector<8x1280xf32>
    %c6_60 = arith.constant 6 : index
    %c0_61 = arith.constant 0 : index
    %c0_62 = arith.constant 0 : index
    %50 = vector.load %arg3[%c6_60, %c0_61, %c0_62] : memref<7x8x56xf32, #tpu.memory_space<vmem>>, vector<1x8x56xf32>
    %51 = vector.shape_cast %50 : vector<1x8x56xf32> to vector<8x56xf32>
    %c0_63 = arith.constant 0 : index
    %c240 = arith.constant 240 : index
    %52 = vector.load %arg6[%c0_63, %c240] : memref<56x1520xf32, #tpu.memory_space<vmem>>, vector<56x1280xf32>
    %cst_64 = arith.constant dense<0.000000e+00> : vector<8x1280xf32>
    %53 = tpu.matmul %51, %52, %cst_64 {dimension_numbers = #tpu.dot_dimension_numbers<[1], [0], [0], [1], [0, 0, 1, 1], [], []>} : vector<8x56xf32>, vector<56x1280xf32>, vector<8x1280xf32> -> vector<8x1280xf32>
    %54 = arith.addf %49, %53 : vector<8x1280xf32>
    %c0_65 = arith.constant 0 : index
    %c0_66 = arith.constant 0 : index
    %55 = vector.load %arg4[%c0_65, %c0_66] : memref<8x1xf32, #tpu.memory_space<vmem>>, vector<8x1xf32>
    %56 = vector.broadcast %55 : vector<8x1xf32> to vector<8x1280xf32>
    %57 = arith.addf %54, %56 : vector<8x1280xf32>
    %c0_67 = arith.constant 0 : index
    %c0_68 = arith.constant 0 : index
    %c0_69 = arith.constant 0 : index
    %58 = vector.load %arg5[%c0_67, %c0_68, %c0_69] : memref<1x8x1280xf32, #tpu.memory_space<vmem>>, vector<1x8x1280xf32>
    %59 = vector.shape_cast %58 : vector<1x8x1280xf32> to vector<8x1280xf32>
    %60 = vector.shape_cast %57 : vector<8x1280xf32> to vector<1x8x1280xf32>
    tpu.vector_store %arg5[%c0_67, %c0_68, %c0_69], %60 {strides = array<i32>} : memref<1x8x1280xf32, #tpu.memory_space<vmem>>, vector<1x8x1280xf32>,
    return
  }
  func.func @transform_0(%arg0: i32, %arg1: i32) -> (i32, i32, i32, i32) {
    %c0_i32 = arith.constant 0 : i32
    %c0_i32_0 = arith.constant 0 : i32
    %c0_i32_1 = arith.constant 0 : i32
    return %arg0, %arg1, %c0_i32, %c0_i32_0 : i32, i32, i32, i32
  }
  func.func @transform_1(%arg0: i32, %arg1: i32) -> (i32, i32, i32) {
    %c0_i32 = arith.constant 0 : i32
    %c0_i32_0 = arith.constant 0 : i32
    %c0_i32_1 = arith.constant 0 : i32
    %c0_i32_2 = arith.constant 0 : i32
    return %c0_i32, %c0_i32_0, %c0_i32_1 : i32, i32, i32
  }
  func.func @transform_2(%arg0: i32, %arg1: i32) -> (i32, i32) {
    %c0_i32 = arith.constant 0 : i32
    %c0_i32_0 = arith.constant 0 : i32
    %c0_i32_1 = arith.constant 0 : i32
    return %c0_i32, %c0_i32_0 : i32, i32
  }
  func.func @transform_3(%arg0: i32, %arg1: i32) -> (i32, i32, i32) {
    %c0_i32 = arith.constant 0 : i32
    %c0_i32_0 = arith.constant 0 : i32
    return %arg0, %c0_i32, %arg1 : i32, i32, i32
  }
}

</mosaic_0001>

<bundles_post_ra>
// kernel: tpu_custom_call.1
= control target key start
LH: loop header
LB: loop body
LE: loop exit
PB: predicated region body
PF: predicated region fallthrough
CT: control target
= control target key end

     0   :  { %8 = vsyncpa [#allocation4], 0  ;;  %s10757_s0 = inlined_call_operand.hbm [shape: f32[2,1,8,1528], index: 0, kind: input, shape index: {}]   ;;  %s10758_s1 = inlined_call_operand.hbm [shape: f32[7,8,56], index: 1, kind: input, shape index: {}]   ;;  %s10759_s2 = inlined_call_operand.vmem [shape: f32[8,1], index: 2, kind: input, shape index: {}]   ;;  %s10760_s3 = inlined_call_operand.hbm [shape: f32[2,8,1280], index: 3, kind: output, shape index: {}]  }
   0x1   :  { %10 = vsyncpa [#allocation4 + $0x1], 0 }
   0x2   :  { %11 = vsyncpa [#allocation7], 0 }
   0x3   :  { %12 = vsyncpa [#allocation5], 0 }
   0x4   :  { %14 = vsyncpa [#allocation5 + $0x1], 0  ;;  %s7425_s12 = smov 0   ;;  %s7427_s13 = smov 0  }
   0x5   :  { %s7429_s14 = smov 0   ;;  %s7431_s15 = smov 0  }
   0x6   :  { %s7433_s16 = smov 0   ;;  %s7435_s17 = smov 0  }
   0x7 LB: > { %s5534_s18 = sadd.s32 4294967295, %s7384_s17   ;;  %s5535_s19 = sadd.s32 4294967294, %s7384_s17   ;;  %s7384_s17 = sphi %s7435_s17, %s20_s17   ;;  %s7380_s16 = sphi %s7433_s16, %s11227_s16   ;;  %s7376_s15 = sphi %s7431_s15, %s11226_s15   ;;  %s7372_s14 = sphi %s7429_s14, %s11225_s14   ;;  %s7368_s13 = sphi %s7427_s13, %s11224_s13   ;;  %s7364_s12 = sphi %s7425_s12, %s11223_s12  }
   0x8   : > { %p54_p0 = scmp.ne.s32.totalorder %s7368_s13, %s7364_s12  ;;  %p7459_p1 = scmp.eq.s32.totalorder %s5534_s18, 0 }
   0x9   : > { %p7463_p2 = scmp.eq.s32.totalorder %s5534_s18, 1  ;;  %p128_p3 = scmp.eq.s32.totalorder %s5535_s19, 1 }
   0xa   : > { %s10911_s20 = scalar_select %p7459_p1, 1, 0 }
   0xb   : > { %s10912_s21 = scalar_select %p7463_p2, 1, 0 }
   0xc   : > { %p7469_p4 = por %p7459_p1, %p54_p0  ;;  %p5536_p5 = scmp.ge.s32.totalorder %s7384_s17, 1 }
   0xd   : > { %p7474_p6 = por %p128_p3, %p54_p0  ;;  %p135_p7 = scmp.lt.s32.totalorder %s7384_s17, 3 }
   0xe   : > { %s10913_s22 = scalar_select %p7469_p4, 1, 0 }
   0xf   : > { %s10914_s23 = scalar_select %p7474_p6, 1, 0 }
  0x10   : > { %p7479_p8 = pnand %p5536_p5, %p135_p7  ;;  %s7386_s25 = smov [#allocation6]  }
  0x11   : > { %s147_s26 = sshll.u32 %s7386_s25, 4  ;;  %s32_s28 = sadd.s32 1, %s7380_s16  ;;  %s148_s26 = int_to_ptr.vmem [resolvable:$true] %s147_s26 }
  0x12   : > { %s10915_s24 = scalar_select %p7479_p8, 1, 0 }
  0x13   : > { %p6073_p9 = pneg %p7479_p8  ;;  %s7240_s4 = scalar_lea.hbm %s10758_s1, 896 }
  0x14   : > { %p7241_p12 = scmp.ne.s32.totalorder %s10758_s1, %s7240_s4  ;;  %p7247_p5 = scmp.lt.u32.totalorder %s7240_s4, %s10758_s1 }
  0x15   : > { %p7488_p11 = pnand %p6073_p9, %p7459_p1 }
  0x17   : > { %p7242_p13 = pneg %p7488_p11 }
  0x19   : > { %p7243_p0 = pnand %p7242_p13, %p7241_p12 }
  0x1b   : > { %p7244_p3 = pneg %p7243_p0 }
  0x1d   : > { %p7249_p7 = pnand %p7247_p5, %p7244_p3 }
  0x1f   : > { %7252 = shalt.err (!%p7249_p7)
}
  0x20   : > { %s7253_s9 = scalar_lea.vmem %s148_s26, 896  ;;  %p7261_p1 = scmp.lt.s32.totalorder %s148_s26, %s148_s26 }
  0x21   : > { %p7254_p9 = scmp.ne.s32.totalorder %s148_s26, %s7253_s9  ;;  %p7262_p4 = scmp.lt.s32.totalorder %s7253_s9, %s7253_s9 }
  0x23   : > { %p7256_p10 = pnand %p7254_p9, %p7242_p13  ;;  %p7263_p8 = por %p7262_p4, %p7261_p1 }
  0x25   : > { %p7257_p6 = pneg %p7256_p10 }
  0x27   : > { %p7264_p2 = pnand %p7263_p8, %p7257_p6 }
  0x29   : > { %7267 = shalt.err (!%p7264_p2)
}
  0x2a   : > { %s7387_s10 = smov 128   ;;  %s7388_s11 = smov 8  }
  0x2b   : > { %6076 = dma.hbm_to_vmem [thread:$0]  (!%p7488_p11), %s10758_s1, 896, %s148_s26, [#allocation7], %s7387_s10, %s7387_s10, %s7388_s11  }
  0x2c   : > { %p34_p1 = scmp.ge.s32.totalorder %s32_s28, 2  ;;  %s41_s25 = sadd.s32 1, %s7372_s14 }
  0x2d   : > { %p48_p2 = scmp.ne.s32.totalorder %s7372_s14, %s7368_s13  ;;  %p49_p4 = scmp.eq.s32.totalorder %s7384_s17, 0 }
  0x2e   : > { %s11229_s28 = smov (%p34_p1, %s32_s28), 0  ;;  %p10917_p8 = scmp.ne.s32.totalorder %s10912_s21, 0 }
  0x2f   : > { %p50_p6 = por %p49_p4, %p48_p2  ;;  %s36_s30 = ssub.s32 %s7380_s16, %s11229_s28 }
  0x30   : > { %p7517_p10 = por %p10917_p8, %p48_p2  ;;  %p6086_p12 = scmp.lt.s32.totalorder %s7384_s17, 2 }
  0x31   : > { %p39_p13 = scmp.eq.s32.totalorder %s36_s30, 0  ;;  %s164_s27 = sand.u32 1, %s7372_s14  }
  0x32   : > { %s6060_s4 = smul.u32 96, %s164_s27  ;;  %p7529_p11 = pnand %p6086_p12, %p50_p6 }
  0x33   : > { %s7526_s5 = scalar_select %p39_p13, %s7372_s14, %s41_s25  }
  0x34   : > { %s6061_s26 = smul.u32 1536, %s7380_s16  ;;  %s168_s6 = scalar_lea.vmem [#allocation3], %s6060_s4 }
  0x35   : > { %s178_s7 = sshll.u32 %s168_s6, 4  ;;  %s165_s11 = scalar_lea.sflag [#allocation4], %s164_s27  ;;  %s7538_s7 = int_to_ptr.vmem [resolvable:$true] %s178_s7 }
  0x36   : > { %s7536_s10 = scalar_lea.hbm %s10757_s0, %s6061_s26  ;;  %p7270_p3 = pneg %p7529_p11 }
  0x37   : > { %s7268_s18 = scalar_lea.hbm %s7536_s10, 1536  ;;  %s7273_s30 = scalar_lea.hbm %s10757_s0, 3072 }
  0x38   : > { %p7269_p0 = scmp.ne.s32.totalorder %s7536_s10, %s7268_s18  ;;  %p7274_p9 = scmp.lt.u32.totalorder %s7536_s10, %s10757_s0 }
  0x39   : > { %p7275_p1 = scmp.lt.u32.totalorder %s7273_s30, %s7268_s18  ;;  %p7277_p4 = scmp.lt.u32.totalorder %s7268_s18, %s7536_s10 }
  0x3a   : > { %p7271_p5 = pnand %p7270_p3, %p7269_p0 }
  0x3b   : > { %p7276_p2 = por %p7275_p1, %p7274_p9 }
  0x3c   : > { %p7272_p7 = pneg %p7271_p5 }
  0x3d   : > { %p7278_p6 = por %p7277_p4, %p7276_p2 }
  0x3f   : > { %p7279_p8 = pnand %p7278_p6, %p7272_p7 }
  0x41   : > { %7282 = shalt.err (!%p7279_p8)
}
  0x42   : > { %s7283_s27 = scalar_lea.vmem %s7538_s7, 1536  ;;  %s7389_s6 = smov [#allocation3]  }
  0x43   : > { %p7284_p12 = scmp.ne.s32.totalorder %s7538_s7, %s7283_s27  ;;  %s7288_s9 = sshll.u32 %s7389_s6, 4  ;;  %s7289_s9 = int_to_ptr.vmem [resolvable:$false] %s7288_s9 }
  0x44   : > { %s7290_s21 = scalar_lea.vmem %s7289_s9, 3072  ;;  %p7291_p5 = scmp.lt.s32.totalorder %s7538_s7, %s7289_s9 }
  0x45   : > { %p7286_p13 = pnand %p7284_p12, %p7270_p3  ;;  %p7292_p9 = scmp.lt.s32.totalorder %s7290_s21, %s7283_s27 }
  0x47   : > { %p7287_p0 = pneg %p7286_p13  ;;  %p7293_p1 = por %p7292_p9, %p7291_p5 }
  0x49   : > { %p7294_p2 = pnand %p7293_p1, %p7287_p0 }
  0x4b   : > { %7297 = shalt.err (!%p7294_p2)
}
  0x4c   : > { %6080 = dma.hbm_to_vmem [thread:$0]  (!%p7529_p11), %s7536_s10, 1536, %s7538_s7, %s165_s11  }
  0x4d   : > { %p10920_p7 = scmp.ne.s32.totalorder %s10915_s24, 0 }
  0x4f   : > { %187 = sbr.rel (%p10920_p7) target bundleno = 1150 (0x47e), region = 32 }
  0x56   : > { %s7568_s18 = sand.u32 1, %s7368_s13   ;;  %p10921_p3 = scmp.ne.s32.totalorder %s10913_s22, 0 }
  0x57   : > { %s6062_s19 = smul.u32 96, %s7568_s18  ;;  %s190_s25 = scalar_lea.sflag [#allocation4], %s7568_s18 }
  0x59   : > { %s193_s30 = scalar_lea.vmem [#allocation3], %s6062_s19 }
  0x5a   : > { %7351 = dma.done.wait (%p10921_p3), %s190_s25, 1536  }
  0x5b   : > { %7353 = vsyncadd (%p10921_p3), %s190_s25, 4294965760  ;;  %p10922_p4 = scmp.ne.s32.totalorder %s10911_s20, 0 }
  0x5d   : > { %7355 = dma.done.wait (%p10922_p4), [#allocation7], 896  }
  0x5e   : > { %7357 = vsyncadd (%p10922_p4), [#allocation7], 4294966400  ;;  %v7580_v0 = vld [vmem:[%s193_s30 + $0x10] sm:$0xff]  ;;  %v7582_v1 = vld [vmem:[%s193_s30] sm:$0xff]  ;;  %s7390_s24 = smov 127   ;;  %vm244_vm0 = vcmask 916480  }
  0x5f   : > { %v7584_v2 = vld [vmem:[%s193_s30 + $0x18] sm:$0xff]  ;;  %274 = vrot.lane.b32.xlu1 %v7580_v0, %s7390_s24  ;;  %270 = vrot.lane.b32.xlu0 %v7582_v1, %s7390_s24  ;;  %v7590_v3 = vld [vmem:[%s193_s30 + $0x8] sm:$0xff]  ;;  %233 = vst [vmem:[#allocation2] sm:$0xff] %v7582_v1  ;;  %235 = vst [vmem:[#allocation2 + $0x10] sm:$0xff] %v7580_v0  ;;  %s7391_s20 = smov 126   ;;  %s7392_s22 = smov 125  }
  0x60   : > { %v7592_v4 = vld [vmem:[%s193_s30 + $0x28] sm:$0xff]  ;;  %236 = vst [vmem:[#allocation2 + $0x18] sm:$0xff] %v7584_v2  ;;  %v7597_v5 = vld [vmem:[%s193_s30 + $0x20] sm:$0xff]  ;;  %v7599_v6 = vld [vmem:[%s193_s30 + $0x38] sm:$0xff]  ;;  %s7393_s7 = smov 124   ;;  %s7394_s8 = smov 123   ;;  %v7766_v51 = vpack.i.bf16 %v7584_v2, %v7580_v0  ;;  %v7770_v52 = vpack.i.bf16 %v7590_v3, %v7582_v1 }
  0x61   : > { %v7601_v7 = vld [vmem:[%s193_s30 + $0x30] sm:$0xff]  ;;  %234 = vst [vmem:[#allocation2 + $0x8] sm:$0xff] %v7590_v3  ;;  %238 = vst [vmem:[#allocation2 + $0x28] sm:$0xff] %v7592_v4  ;;  %v7605_v8 = vld [vmem:[%s193_s30 + $0x48] sm:$0xff]  ;;  %v10765_v14 = vmov 0.0   ;;  %vm294_vm1 = vcmask 1039360   ;;  %v7792_v61 = vpack.i.bf16 %v7592_v4, %v7597_v5 }
  0x62   : > { %v7607_v9 = vld [vmem:[%s193_s30 + $0x40] sm:$0xff]  ;;  %v7609_v10 = vld [vmem:[%s193_s30 + $0x58] sm:$0xff]  ;;  %239 = vst [vmem:[#allocation2 + $0x30] sm:$0xff] %v7601_v7  ;;  %240 = vst [vmem:[#allocation2 + $0x38] sm:$0xff] %v7599_v6  ;;  %1628 = vmatprep.mubr.f32.mxu0 %v10765_v14  ;;  %1270 = vmatprep.mubr.f32.mxu1 %v10765_v14  ;;  %s7396_s10 = smov 122   ;;  %vm378_vm2 = vcmask 1031168   ;;  %v7788_v60 = vpack.i.bf16 %v7599_v6, %v7601_v7 }
  0x63   : > { %237 = vst [vmem:[#allocation2 + $0x20] sm:$0xff] %v7597_v5  ;;  %v7614_v11 = vld [vmem:[%s193_s30 + $0x50] sm:$0xff]  ;;  %245 = vst.msk [vmem:[#allocation2 + $0x58] sm:$0xff] %vm244_vm0, %v7609_v10  ;;  %276 = vrot.lane.b32.xlu1 %v7584_v2, %s7390_s24  ;;  %272 = vrot.lane.b32.xlu0 %v7590_v3, %s7390_s24  ;;  %s7397_s11 = smov 88   ;;  %vm462_vm3 = vcmask 1022976   ;;  %vm546_vm4 = vcmask 1014784  }
  0x64   : > { %241 = vst [vmem:[#allocation2 + $0x40] sm:$0xff] %v7607_v9  ;;  %242 = vst [vmem:[#allocation2 + $0x48] sm:$0xff] %v7605_v8  ;;  %vm630_vm5 = vcmask 1006592   ;;  %vm714_vm6 = vcmask 998400   ;;  %vm1202_vm7 = vcmask 457728   ;;  %s7398_s4 = smov 48  }
  0x65   : > { %243 = vst [vmem:[#allocation2 + $0x50] sm:$0xff] %v7614_v11  ;;  %vm1061_vm8 = vcmask 719872   ;;  %s7399_s26 = smov 8   ;;  %vm2075_vm9 = vcmask 392192   ;;  %s7400_s27 = smov 96   ;;  %vm2740_vm10 = vcmask 64512  }
  0x66   : > { %s7401_s6 = smov 56   ;;  %vm3559_vm11 = vcmask 785408   ;;  %s7402_s9 = smov 16   ;;  %vm4888_vm12 = vcmask 130048  }
  0x67   : > { %280 = vrot.lane.b32.xlu1 %v7592_v4, %s7390_s24  ;;  %278 = vrot.lane.b32.xlu0 %v7597_v5, %s7390_s24  ;;  %s6063_s25 = smul.u32 80, %s7568_s18 }
  0x69   : > { %s10687_s30 = scalar_lea.vmem [#allocation8], %s6063_s25 }
  0x6b   : > { %284 = vrot.lane.b32.xlu1 %v7599_v6, %s7390_s24  ;;  %282 = vrot.lane.b32.xlu0 %v7601_v7, %s7390_s24 }
  0x6f   : > { %288 = vrot.lane.b32.xlu1 %v7605_v8, %s7390_s24  ;;  %286 = vrot.lane.b32.xlu0 %v7607_v9, %s7390_s24 }
  0x73   : > { %292 = vrot.lane.b32.xlu1 %v7609_v10, %s7390_s24  ;;  %290 = vrot.lane.b32.xlu0 %v7614_v11, %s7390_s24  ;;  %s6064_s24 = smul.u32 1280, %s7376_s15  ;;  %s5424_s15 = scalar_lea.sflag [#allocation5], %s7568_s18 }
  0x77   : > { %356 = vrot.lane.b32.xlu1 %v7590_v3, %s7391_s20  ;;  %354 = vrot.lane.b32.xlu0 %v7582_v1, %s7391_s20 }
  0x7b   : > { %360 = vrot.lane.b32.xlu1 %v7584_v2, %s7391_s20  ;;  %358 = vrot.lane.b32.xlu0 %v7580_v0, %s7391_s20 }
  0x7f   : > { %364 = vrot.lane.b32.xlu1 %v7592_v4, %s7391_s20  ;;  %362 = vrot.lane.b32.xlu0 %v7597_v5, %s7391_s20 }
  0x83   : > { %368 = vrot.lane.b32.xlu1 %v7599_v6, %s7391_s20  ;;  %366 = vrot.lane.b32.xlu0 %v7601_v7, %s7391_s20 }
  0x87   : > { %372 = vrot.lane.b32.xlu1 %v7605_v8, %s7391_s20  ;;  %370 = vrot.lane.b32.xlu0 %v7607_v9, %s7391_s20 }
  0x8b   : > { %376 = vrot.lane.b32.xlu1 %v7609_v10, %s7391_s20  ;;  %374 = vrot.lane.b32.xlu0 %v7614_v11, %s7391_s20  ;;  %s5440_s20 = sshll.u32 %s10687_s30, 4  ;;  %s10706_s20 = int_to_ptr.vmem [resolvable:$true] %s5440_s20 }
  0x8f   : > { %440 = vrot.lane.b32.xlu1 %v7590_v3, %s7392_s22  ;;  %438 = vrot.lane.b32.xlu0 %v7582_v1, %s7392_s22 }
  0x93   : > { %444 = vrot.lane.b32.xlu1 %v7584_v2, %s7392_s22  ;;  %442 = vrot.lane.b32.xlu0 %v7580_v0, %s7392_s22 }
  0x97   : > { %448 = vrot.lane.b32.xlu1 %v7592_v4, %s7392_s22  ;;  %446 = vrot.lane.b32.xlu0 %v7597_v5, %s7392_s22 }
  0x9b   : > { %452 = vrot.lane.b32.xlu1 %v7599_v6, %s7392_s22  ;;  %450 = vrot.lane.b32.xlu0 %v7601_v7, %s7392_s22 }
  0x9f   : > { %456 = vrot.lane.b32.xlu1 %v7605_v8, %s7392_s22  ;;  %454 = vrot.lane.b32.xlu0 %v7607_v9, %s7392_s22 }
  0xa3   : > { %460 = vrot.lane.b32.xlu1 %v7609_v10, %s7392_s22  ;;  %458 = vrot.lane.b32.xlu0 %v7614_v11, %s7392_s22 }
  0xa7   : > { %524 = vrot.lane.b32.xlu1 %v7590_v3, %s7393_s7  ;;  %522 = vrot.lane.b32.xlu0 %v7582_v1, %s7393_s7 }
  0xab   : > { %528 = vrot.lane.b32.xlu1 %v7584_v2, %s7393_s7  ;;  %526 = vrot.lane.b32.xlu0 %v7580_v0, %s7393_s7 }
  0xaf   : > { %532 = vrot.lane.b32.xlu1 %v7592_v4, %s7393_s7  ;;  %530 = vrot.lane.b32.xlu0 %v7597_v5, %s7393_s7 }
  0xb3   : > { %536 = vrot.lane.b32.xlu1 %v7599_v6, %s7393_s7  ;;  %534 = vrot.lane.b32.xlu0 %v7601_v7, %s7393_s7 }
  0xb7   : > { %540 = vrot.lane.b32.xlu1 %v7605_v8, %s7393_s7  ;;  %538 = vrot.lane.b32.xlu0 %v7607_v9, %s7393_s7 }
  0xbb   : > { %544 = vrot.lane.b32.xlu1 %v7609_v10, %s7393_s7  ;;  %542 = vrot.lane.b32.xlu0 %v7614_v11, %s7393_s7 }
  0xbf   : > { %608 = vrot.lane.b32.xlu1 %v7590_v3, %s7394_s8  ;;  %606 = vrot.lane.b32.xlu0 %v7582_v1, %s7394_s8 }
  0xc3   : > { %612 = vrot.lane.b32.xlu1 %v7584_v2, %s7394_s8  ;;  %610 = vrot.lane.b32.xlu0 %v7580_v0, %s7394_s8 }
  0xc7   : > { %616 = vrot.lane.b32.xlu1 %v7592_v4, %s7394_s8  ;;  %614 = vrot.lane.b32.xlu0 %v7597_v5, %s7394_s8 }
  0xcb   : > { %620 = vrot.lane.b32.xlu1 %v7599_v6, %s7394_s8  ;;  %618 = vrot.lane.b32.xlu0 %v7601_v7, %s7394_s8 }
  0xcf   : > { %624 = vrot.lane.b32.xlu1 %v7605_v8, %s7394_s8  ;;  %622 = vrot.lane.b32.xlu0 %v7607_v9, %s7394_s8 }
  0xd1   : > { %v275_v12 = vpop.permute.xlu1 %274  ;;  %v271_v13 = vpop.permute.xlu0 %270 }
  0xd3   : > { %628 = vrot.lane.b32.xlu1 %v7609_v10, %s7394_s8  ;;  %626 = vrot.lane.b32.xlu0 %v7614_v11, %s7394_s8  ;;  %s10704_s8 = scalar_lea.hbm %s10760_s3, %s6064_s24 }
  0xd5   : > { %v277_v15 = vpop.permute.xlu1 %276  ;;  %v273_v16 = vpop.permute.xlu0 %272 }
  0xd6   : > { %v297_v17 = vsel %vm294_vm1, %v275_v12, %v277_v15  ;;  %v7693_v18 = vsel %vm294_vm1, %v271_v13, %v273_v16  ;;  %v296_v19 = vsel %vm294_vm1, %v273_v16, %v275_v12 }
  0xd7   : > { %320 = vst [vmem:[#allocation2 + $0x70] sm:$0xff] %v297_v17  ;;  %318 = vst [vmem:[#allocation2 + $0x60] sm:$0xff] %v7693_v18  ;;  %692 = vrot.lane.b32.xlu1 %v7590_v3, %s7396_s10  ;;  %690 = vrot.lane.b32.xlu0 %v7582_v1, %s7396_s10  ;;  %v5640_v20 = vpack.c.bf16 %v296_v19, %v7590_v3  ;;  %v5642_v21 = vpack.c.bf16 %v7693_v18, %v7582_v1 }
  0xd8   : > { %319 = vst [vmem:[#allocation2 + $0x68] sm:$0xff] %v296_v19  ;;  %v7704_v22 = vpack.i.bf16 %v297_v17, %v296_v19  ;;  %v7822_v13 = vpack.i.bf16 %v7693_v18, %v7614_v11 }
  0xd9   : > { %v281_v23 = vpop.permute.xlu1 %280  ;;  %v279_v24 = vpop.permute.xlu0 %278  ;;  %5641 = vmatprep.subr.bf16.mxu0 %v5640_v20 }
  0xda   : > { %v298_v25 = vsel %vm294_vm1, %v277_v15, %v279_v24  ;;  %v7708_v26 = vsel %vm294_vm1, %v279_v24, %v281_v23  ;;  %5643 = vmatpush1.bf16.msra.mxu0 %v5642_v21 }
  0xdb   : > { %321 = vst [vmem:[#allocation2 + $0x78] sm:$0xff] %v298_v25  ;;  %322 = vst [vmem:[#allocation2 + $0x80] sm:$0xff] %v7708_v26  ;;  %696 = vrot.lane.b32.xlu1 %v7584_v2, %s7396_s10  ;;  %694 = vrot.lane.b32.xlu0 %v7580_v0, %s7396_s10  ;;  %v7716_v27 = vpack.i.bf16 %v7708_v26, %v298_v25 }
  0xdd   : > { %v285_v28 = vpop.permute.xlu1 %284  ;;  %v283_v29 = vpop.permute.xlu0 %282 }
  0xde   : > { %v7719_v30 = vsel %vm294_vm1, %v281_v23, %v283_v29  ;;  %v301_v31 = vsel %vm294_vm1, %v283_v29, %v285_v28  ;;  %v3263_v39 = vld [vmem:[#allocation2 + $0x70] sm:$0xff] }
  0xdf   : > { %323 = vst [vmem:[#allocation2 + $0x88] sm:$0xff] %v7719_v30  ;;  %324 = vst [vmem:[#allocation2 + $0x90] sm:$0xff] %v301_v31  ;;  %700 = vrot.lane.b32.xlu1 %v7592_v4, %s7396_s10  ;;  %698 = vrot.lane.b32.xlu0 %v7597_v5, %s7396_s10  ;;  %v7728_v32 = vpack.i.bf16 %v301_v31, %v7719_v30 }
  0xe1   : > { %v289_v33 = vpop.permute.xlu1 %288  ;;  %v287_v34 = vpop.permute.xlu0 %286 }
  0xe2   : > { %v302_v35 = vsel %vm294_vm1, %v285_v28, %v287_v34  ;;  %v7732_v36 = vsel %vm294_vm1, %v287_v34, %v289_v33  ;;  %v3264_v37 = vld [vmem:[#allocation2 + $0x78] sm:$0xff] }
  0xe3   : > { %325 = vst [vmem:[#allocation2 + $0x98] sm:$0xff] %v302_v35  ;;  %326 = vst [vmem:[#allocation2 + $0xa0] sm:$0xff] %v7732_v36  ;;  %704 = vrot.lane.b32.xlu1 %v7599_v6, %s7396_s10  ;;  %702 = vrot.lane.b32.xlu0 %v7601_v7, %s7396_s10  ;;  %v7740_v38 = vpack.i.bf16 %v7732_v36, %v302_v35  ;;  %v7742_v40 = vpack.i.bf16 %v3264_v37, %v3263_v39 }
  0xe4   : > { %v7814_v6 = vpack.i.bf16 %v7605_v8, %v7607_v9 }
  0xe5   : > { %10923 = vst [vmem:[#allocation12_spill] sm:$0xff] %v7742_v40  ;;  %v293_v41 = vpop.permute.xlu1 %292  ;;  %v291_v42 = vpop.permute.xlu0 %290 }
  0xe6   : > { %329 = vst.msk [vmem:[#allocation2 + $0xb8] sm:$0xff] %vm244_vm0, %v293_v41  ;;  %v7746_v43 = vsel %vm294_vm1, %v289_v33, %v291_v42  ;;  %v305_v44 = vsel %vm294_vm1, %v291_v42, %v293_v41  ;;  %v3267_v49 = vld [vmem:[#allocation2 + $0x90] sm:$0xff] }
  0xe7   : > { %327 = vst [vmem:[#allocation2 + $0xa8] sm:$0xff] %v7746_v43  ;;  %328 = vst [vmem:[#allocation2 + $0xb0] sm:$0xff] %v305_v44  ;;  %708 = vrot.lane.b32.xlu1 %v7605_v8, %s7396_s10  ;;  %706 = vrot.lane.b32.xlu0 %v7607_v9, %s7396_s10  ;;  %v7755_v45 = vpack.i.bf16 %v305_v44, %v7746_v43 }
  0xe9   : > { %v357_v46 = vpop.permute.xlu1 %356  ;;  %v355_v47 = vpop.permute.xlu0 %354 }
  0xea   : > { %v7758_v48 = vsel %vm378_vm2, %v355_v47, %v357_v46  ;;  %v3268_v50 = vld [vmem:[#allocation2 + $0x98] sm:$0xff] }
  0xeb   : > { %712 = vrot.lane.b32.xlu1 %v7609_v10, %s7396_s10  ;;  %710 = vrot.lane.b32.xlu0 %v7614_v11, %s7396_s10  ;;  %v7772_v53 = vpack.i.bf16 %v3268_v50, %v3267_v49  ;;  %s7298_s10 = scalar_lea.vmem %s10706_s20, 1280 }
  0xec   : > { %p7299_p11 = scmp.ne.s32.totalorder %s10706_s20, %s7298_s10 }
  0xed   : > { %10924 = vst [vmem:[#allocation13_spill] sm:$0xff] %v7772_v53  ;;  %v361_v54 = vpop.permute.xlu1 %360  ;;  %v359_v55 = vpop.permute.xlu0 %358  ;;  %v3272_v56 = vld [vmem:[#allocation2 + $0xb8] sm:$0xff] }
  0xee   : > { %v7775_v57 = vsel %vm378_vm2, %v357_v46, %v359_v55  ;;  %v7778_v58 = vsel %vm378_vm2, %v359_v55, %v361_v54  ;;  %v3271_v59 = vld [vmem:[#allocation2 + $0xb0] sm:$0xff]  ;;  %p7300_p6 = pnand %p7299_p11, %p7517_p10 }
  0xef   : > { %10925 = vst [vmem:[#allocation14_spill] sm:$0xff] %v7778_v58  ;;  %403 = vst [vmem:[#allocation2 + $0xc8] sm:$0xff] %v7775_v57  ;;  %6160 = vrot.lane.b32.xlu1 %v7766_v51, %s7397_s11  ;;  %6155 = vrot.lane.b32.xlu0 %v7770_v52, %s7397_s11  ;;  %v7796_v62 = vpack.i.bf16 %v7775_v57, %v7758_v48  ;;  %v7798_v63 = vpack.i.bf16 %v3272_v56, %v3271_v59 }
  0xf0   : > { %404 = vst [vmem:[#allocation2 + $0xd0] sm:$0xff] %v7778_v58  ;;  %p7301_p8 = pneg %p7300_p6 }
  0xf1   : > { %10926 = vst [vmem:[#allocation15_spill] sm:$0xff] %v7798_v63  ;;  %v365_v0 = vpop.permute.xlu1 %364  ;;  %v363_v1 = vpop.permute.xlu0 %362 }
  0xf2   : > { %v7801_v2 = vsel %vm378_vm2, %v361_v54, %v363_v1  ;;  %v7804_v3 = vsel %vm378_vm2, %v363_v1, %v365_v0 }
  0xf3   : > { %10927 = vst [vmem:[#allocation16_spill] sm:$0xff] %v7801_v2  ;;  %405 = vst [vmem:[#allocation2 + $0xd8] sm:$0xff] %v7801_v2  ;;  %6170 = vrot.lane.b32.xlu1 %v7788_v60, %s7397_s11  ;;  %6165 = vrot.lane.b32.xlu0 %v7792_v61, %s7397_s11  ;;  %v7818_v7 = vpack.i.bf16 %v7801_v2, %v7778_v58 }
  0xf4   : > { %406 = vst [vmem:[#allocation2 + $0xe0] sm:$0xff] %v7804_v3 }
  0xf5   : > { %v369_v10 = vpop.permute.xlu1 %368  ;;  %v367_v12 = vpop.permute.xlu0 %366 }
  0xf6   : > { %v7825_v15 = vsel %vm378_vm2, %v365_v0, %v367_v12  ;;  %v7828_v16 = vsel %vm378_vm2, %v367_v12, %v369_v10 }
  0xf7   : > { %10928 = vst [vmem:[#allocation17_spill] sm:$0xff] %v7828_v16  ;;  %407 = vst [vmem:[#allocation2 + $0xe8] sm:$0xff] %v7825_v15  ;;  %6180 = vrot.lane.b32.xlu1 %v7822_v13, %s7397_s11  ;;  %6175 = vrot.lane.b32.xlu0 %v7814_v6, %s7397_s11  ;;  %v7838_v8 = vpack.i.bf16 %v7825_v15, %v7804_v3  ;;  %v7858_v21 = vld [vmem:[#allocation2 + $0xd0] sm:$0xff] }
  0xf8   : > { %408 = vst [vmem:[#allocation2 + $0xf0] sm:$0xff] %v7828_v16  ;;  %10931 = vst [vmem:[#allocation20_spill] sm:$0xff] %v7858_v21 }
  0xf9   : > { %v373_v9 = vpop.permute.xlu1 %372  ;;  %v371_v11 = vpop.permute.xlu0 %370 }
  0xfa   : > { %v7841_v17 = vsel %vm378_vm2, %v369_v10, %v371_v11  ;;  %v7844_v18 = vsel %vm378_vm2, %v371_v11, %v373_v9  ;;  %v7846_v19 = vld [vmem:[#allocation2 + $0xd8] sm:$0xff] }
  0xfb   : > { %10929 = vst [vmem:[#allocation18_spill] sm:$0xff] %v7841_v17  ;;  %10930 = vst [vmem:[#allocation19_spill] sm:$0xff] %v7846_v19  ;;  %6190 = vrot.lane.b32.xlu1 %v7716_v27, %s7397_s11  ;;  %6185 = vrot.lane.b32.xlu0 %v7704_v22, %s7397_s11  ;;  %v7856_v20 = vpack.i.bf16 %v7841_v17, %v7828_v16 }
  0xfc   : > { %409 = vst [vmem:[#allocation2 + $0xf8] sm:$0xff] %v7841_v17  ;;  %410 = vst [vmem:[#allocation2 + $0x100] sm:$0xff] %v7844_v18 }
  0xfd   : > { %v377_v24 = vpop.permute.xlu1 %376  ;;  %v375_v25 = vpop.permute.xlu0 %374 }
  0xfe   : > { %413 = vst.msk [vmem:[#allocation2 + $0x118] sm:$0xff] %vm244_vm0, %v377_v24  ;;  %v7864_v28 = vsel %vm378_vm2, %v373_v9, %v375_v25  ;;  %v389_v29 = vsel %vm378_vm2, %v375_v25, %v377_v24 }
  0xff   : > { %411 = vst [vmem:[#allocation2 + $0x108] sm:$0xff] %v7864_v28  ;;  %412 = vst [vmem:[#allocation2 + $0x110] sm:$0xff] %v389_v29  ;;  %6200 = vrot.lane.b32.xlu1 %v7740_v38, %s7397_s11  ;;  %6195 = vrot.lane.b32.xlu0 %v7728_v32, %s7397_s11  ;;  %v7874_v31 = vpack.i.bf16 %v7864_v28, %v7844_v18  ;;  %v3278_v41 = vld [vmem:[#allocation2 + $0xf0] sm:$0xff] }
 0x101   : > { %v441_v33 = vpop.permute.xlu1 %440  ;;  %v439_v34 = vpop.permute.xlu0 %438 }
 0x102   : > { %v463_v35 = vsel %vm462_vm3, %v439_v34, %v441_v33 }
 0x103   : > { %v3279_v37 = vld [vmem:[#allocation2 + $0xf8] sm:$0xff]  ;;  %6210 = vrot.lane.b32.xlu1 %v7796_v62, %s7397_s11  ;;  %6205 = vrot.lane.b32.xlu0 %v7755_v45, %s7397_s11  ;;  %v7881_v39 = vpack.i.bf16 %v463_v35, %v389_v29  ;;  %v5646_v59 = vpack.c.bf16 %v463_v35, %v7758_v48 }
 0x104   : > { %v7883_v42 = vpack.i.bf16 %v3279_v37, %v3278_v41 }
 0x105   : > { %v445_v44 = vpop.permute.xlu1 %444  ;;  %v443_v46 = vpop.permute.xlu0 %442  ;;  %v3283_v47 = vld [vmem:[#allocation2 + $0x118] sm:$0xff] }
 0x106   : > { %10932 = vst [vmem:[#allocation21_spill] sm:$0xff] %v7883_v42  ;;  %v464_v49 = vsel %vm462_vm3, %v441_v33, %v443_v46  ;;  %v7887_v50 = vsel %vm462_vm3, %v443_v46, %v445_v44  ;;  %v3282_v54 = vld [vmem:[#allocation2 + $0x110] sm:$0xff] }
 0x107   : > { %10933 = vst [vmem:[#allocation22_spill] sm:$0xff] %v7887_v50  ;;  %487 = vst [vmem:[#allocation2 + $0x128] sm:$0xff] %v464_v49  ;;  %6220 = vrot.lane.b32.xlu1 %v7838_v8, %s7397_s11  ;;  %6215 = vrot.lane.b32.xlu0 %v7818_v7, %s7397_s11  ;;  %v5644_v55 = vpack.c.bf16 %v464_v49, %v7775_v57  ;;  %v7896_v56 = vpack.i.bf16 %v7887_v50, %v464_v49 }
 0x108   : > { %488 = vst [vmem:[#allocation2 + $0x130] sm:$0xff] %v7887_v50  ;;  %v7901_v1 = vpack.i.bf16 %v3283_v47, %v3282_v54  ;;  %v7973_v47 = vld [vmem:[#allocation2 + $0xe0] sm:$0xff] }
 0x109   : > { %v449_v10 = vpop.permute.xlu1 %448  ;;  %v447_v12 = vpop.permute.xlu0 %446  ;;  %5645 = vmatprep.subr.bf16.mxu0 %v5644_v55  ;;  %10942 = vst [vmem:[#allocation31_spill] sm:$0xff] %v7973_v47 }
 0x10a   : > { %10934 = vst [vmem:[#allocation23_spill] sm:$0xff] %v7901_v1  ;;  %v7904_v9 = vsel %vm462_vm3, %v445_v44, %v447_v12  ;;  %v7907_v11 = vsel %vm462_vm3, %v447_v12, %v449_v10  ;;  %5647 = vmatpush1.bf16.msra.mxu0 %v5646_v59  ;;  %v7943_v44 = vld [vmem:[#allocation2 + $0xc8] sm:$0xff] }
 0x10b   : > { %10935 = vst [vmem:[#allocation24_spill] sm:$0xff] %v7904_v9  ;;  %489 = vst [vmem:[#allocation2 + $0x138] sm:$0xff] %v7904_v9  ;;  %6230 = vrot.lane.b32.xlu1 %v7874_v31, %s7397_s11  ;;  %6225 = vrot.lane.b32.xlu0 %v7856_v20, %s7397_s11  ;;  %v7919_v57 = vpack.i.bf16 %v7907_v11, %v7904_v9 }
 0x10c   : > { %490 = vst [vmem:[#allocation2 + $0x140] sm:$0xff] %v7907_v11  ;;  %10938 = vst [vmem:[#allocation27_spill] sm:$0xff] %v7943_v44 }
 0x10d   : > { %v453_v25 = vpop.permute.xlu1 %452  ;;  %v451_v29 = vpop.permute.xlu0 %450 }
 0x10e   : > { %v7924_v33 = vsel %vm462_vm3, %v449_v10, %v451_v29  ;;  %v7927_v34 = vsel %vm462_vm3, %v451_v29, %v453_v25  ;;  %v7929_v35 = vld [vmem:[#allocation2 + $0x128] sm:$0xff] }
 0x10f   : > { %10936 = vst [vmem:[#allocation25_spill] sm:$0xff] %v7927_v34  ;;  %10937 = vst [vmem:[#allocation26_spill] sm:$0xff] %v7929_v35  ;;  %6235 = vrot.lane.b32.xlu0 %v7881_v39, %s7397_s11  ;;  %6240 = vrot.lane.b32.xlu1 %v7896_v56, %s7397_s11  ;;  %v7941_v41 = vpack.i.bf16 %v7927_v34, %v7924_v33  ;;  %v7975_v23 = vld [vmem:[#allocation2 + $0x130] sm:$0xff] }
 0x110   : > { %491 = vst [vmem:[#allocation2 + $0x148] sm:$0xff] %v7924_v33  ;;  %492 = vst [vmem:[#allocation2 + $0x150] sm:$0xff] %v7927_v34 }
 0x111   : > { %v457_v49 = vpop.permute.xlu1 %456  ;;  %v455_v54 = vpop.permute.xlu0 %454  ;;  %10943 = vst [vmem:[#allocation32_spill] sm:$0xff] %v7975_v23 }
 0x112   : > { %v7950_v55 = vsel %vm462_vm3, %v453_v25, %v455_v54  ;;  %v7953_v59 = vsel %vm462_vm3, %v455_v54, %v457_v49  ;;  %v7955_v10 = vld [vmem:[#allocation2 + $0x138] sm:$0xff]  ;;  %v3277_v54 = vld [vmem:[#allocation2 + $0xe8] sm:$0xff] }
 0x113   : > { %10939 = vst [vmem:[#allocation28_spill] sm:$0xff] %v7950_v55  ;;  %10940 = vst [vmem:[#allocation29_spill] sm:$0xff] %v7955_v10  ;;  %v7957_v12 = vld [vmem:[#allocation2 + $0x140] sm:$0xff]  ;;  %6245 = vrot.lane.b32.xlu0 %v7919_v57, %s7397_s11  ;;  %6250 = vrot.lane.b32.xlu1 %v7941_v41, %s7397_s11  ;;  %v7969_v29 = vpack.i.bf16 %v7953_v59, %v7950_v55 }
 0x114   : > { %10941 = vst [vmem:[#allocation30_spill] sm:$0xff] %v7957_v12  ;;  %493 = vst [vmem:[#allocation2 + $0x158] sm:$0xff] %v7950_v55 }
 0x115   : > { %494 = vst [vmem:[#allocation2 + $0x160] sm:$0xff] %v7953_v59  ;;  %v461_v46 = vpop.permute.xlu1 %460  ;;  %v459_v0 = vpop.permute.xlu0 %458 }
 0x116   : > { %497 = vst.msk [vmem:[#allocation2 + $0x178] sm:$0xff] %vm244_vm0, %v461_v46  ;;  %v7983_v25 = vsel %vm462_vm3, %v457_v49, %v459_v0  ;;  %v473_v14 = vsel %vm462_vm3, %v459_v0, %v461_v46  ;;  %v3280_v0 = vld [vmem:[#allocation2 + $0x100] sm:$0xff] }
 0x117   : > { %v3288_v37 = vld [vmem:[#allocation2 + $0x148] sm:$0xff]  ;;  %495 = vst [vmem:[#allocation2 + $0x168] sm:$0xff] %v7983_v25  ;;  %496 = vst [vmem:[#allocation2 + $0x170] sm:$0xff] %v473_v14  ;;  %6255 = vrot.lane.b32.xlu0 %v7969_v29, %s7397_s11  ;;  %v7990_v24 = vpack.i.bf16 %v473_v14, %v7983_v25  ;;  %v3289_v44 = vld [vmem:[#allocation2 + $0x150] sm:$0xff] }
 0x118   : > { %v7994_v47 = vpack.i.bf16 %v3288_v37, %v3277_v54 }
 0x119   : > { %v525_v49 = vpop.permute.xlu1 %524  ;;  %v523_v12 = vpop.permute.xlu0 %522  ;;  %6260 = vrot.lane.b32.xlu1 %v7990_v24, %s7397_s11 }
 0x11a   : > { %10944 = vst [vmem:[#allocation33_spill] sm:$0xff] %v7994_v47  ;;  %v7999_v46 = vsel %vm546_vm4, %v523_v12, %v525_v49 }
 0x11b   : > { %v3290_v35 = vld [vmem:[#allocation2 + $0x158] sm:$0xff] }
 0x11c   : > { %v3291_v21 = vld [vmem:[#allocation2 + $0x160] sm:$0xff]  ;;  %v8001_v19 = vpack.i.bf16 %v3290_v35, %v3289_v44 }
 0x11d   : > { %v8003_v14 = vpack.i.bf16 %v3291_v21, %v3280_v0  ;;  %v529_v23 = vpop.permute.xlu1 %528  ;;  %v527_v48 = vpop.permute.xlu0 %526  ;;  %v3294_v37 = vld [vmem:[#allocation2 + $0x178] sm:$0xff]  ;;  %v3281_v21 = vld [vmem:[#allocation2 + $0x108] sm:$0xff] }
 0x11e   : > { %10945 = vst [vmem:[#allocation34_spill] sm:$0xff] %v8001_v19  ;;  %v8006_v54 = vsel %vm546_vm4, %v525_v49, %v527_v48  ;;  %v8009_v10 = vsel %vm546_vm4, %v527_v48, %v529_v23  ;;  %v3293_v1 = vld [vmem:[#allocation2 + $0x170] sm:$0xff]  ;;  %v3292_v63 = vld [vmem:[#allocation2 + $0x168] sm:$0xff] }
 0x11f   : > { %10946 = vst [vmem:[#allocation35_spill] sm:$0xff] %v8003_v14  ;;  %10947 = vst [vmem:[#allocation36_spill] sm:$0xff] %v8009_v10  ;;  %v8015_v35 = vpack.i.bf16 %v8006_v54, %v7999_v46  ;;  %v8017_v44 = vpack.i.bf16 %v3294_v37, %v3293_v1  ;;  %v8019_v12 = vpack.i.bf16 %v3292_v63, %v3281_v21 }
 0x120   : > { %571 = vst [vmem:[#allocation2 + $0x188] sm:$0xff] %v8006_v54  ;;  %572 = vst [vmem:[#allocation2 + $0x190] sm:$0xff] %v8009_v10 }
 0x121   : > { %10948 = vst [vmem:[#allocation37_spill] sm:$0xff] %v8017_v44  ;;  %10949 = vst [vmem:[#allocation38_spill] sm:$0xff] %v8019_v12  ;;  %v533_v49 = vpop.permute.xlu1 %532  ;;  %v531_v0 = vpop.permute.xlu0 %530  ;;  %6265 = vrot.lane.b32.xlu0 %v8015_v35, %s7397_s11 }
 0x122   : > { %v8024_v48 = vsel %vm546_vm4, %v529_v23, %v531_v0  ;;  %v8027_v14 = vsel %vm546_vm4, %v531_v0, %v533_v49 }
 0x123   : > { %10950 = vst [vmem:[#allocation39_spill] sm:$0xff] %v8024_v48  ;;  %573 = vst [vmem:[#allocation2 + $0x198] sm:$0xff] %v8024_v48  ;;  %v8033_v1 = vpack.i.bf16 %v8024_v48, %v8009_v10 }
 0x124   : > { %574 = vst [vmem:[#allocation2 + $0x1a0] sm:$0xff] %v8027_v14 }
 0x125   : > { %v537_v63 = vpop.permute.xlu1 %536  ;;  %v535_v37 = vpop.permute.xlu0 %534  ;;  %6270 = vrot.lane.b32.xlu1 %v8033_v1, %s7397_s11 }
 0x126   : > { %v8038_v21 = vsel %vm546_vm4, %v533_v49, %v535_v37  ;;  %v8041_v23 = vsel %vm546_vm4, %v535_v37, %v537_v63 }
 0x127   : > { %10951 = vst [vmem:[#allocation40_spill] sm:$0xff] %v8041_v23  ;;  %575 = vst [vmem:[#allocation2 + $0x1a8] sm:$0xff] %v8038_v21  ;;  %v8047_v0 = vpack.i.bf16 %v8038_v21, %v8027_v14  ;;  %v8065_v42 = vld [vmem:[#allocation2 + $0x190] sm:$0xff] }
 0x128   : > { %576 = vst [vmem:[#allocation2 + $0x1b0] sm:$0xff] %v8041_v23  ;;  %10956 = vst [vmem:[#allocation45_spill] sm:$0xff] %v8065_v42 }
 0x129   : > { %10952 = vst [vmem:[#allocation41_spill] sm:$0xff] %v8047_v0  ;;  %v541_v12 = vpop.permute.xlu1 %540  ;;  %v539_v44 = vpop.permute.xlu0 %538  ;;  %6275 = vrot.lane.b32.xlu0 %v8047_v0, %s7397_s11 }
 0x12a   : > { %v8052_v19 = vsel %vm546_vm4, %v537_v63, %v539_v44  ;;  %v8055_v49 = vsel %vm546_vm4, %v539_v44, %v541_v12  ;;  %v8057_v37 = vld [vmem:[#allocation2 + $0x198] sm:$0xff] }
 0x12b   : > { %10953 = vst [vmem:[#allocation42_spill] sm:$0xff] %v8052_v19  ;;  %10954 = vst [vmem:[#allocation43_spill] sm:$0xff] %v8057_v37  ;;  %v8063_v47 = vpack.i.bf16 %v8052_v19, %v8041_v23 }
 0x12c   : > { %577 = vst [vmem:[#allocation2 + $0x1b8] sm:$0xff] %v8052_v19  ;;  %578 = vst [vmem:[#allocation2 + $0x1c0] sm:$0xff] %v8055_v49 }
 0x12d   : > { %10955 = vst [vmem:[#allocation44_spill] sm:$0xff] %v8063_v47  ;;  %v545_v63 = vpop.permute.xlu1 %544  ;;  %v543_v40 = vpop.permute.xlu0 %542  ;;  %6280 = vrot.lane.b32.xlu1 %v8063_v47, %s7397_s11 }
 0x12e   : > { %581 = vst.msk [vmem:[#allocation2 + $0x1d8] sm:$0xff] %vm244_vm0, %v545_v63  ;;  %v8073_v44 = vsel %vm546_vm4, %v541_v12, %v543_v40  ;;  %v557_v16 = vsel %vm546_vm4, %v543_v40, %v545_v63 }
 0x12f   : > { %579 = vst [vmem:[#allocation2 + $0x1c8] sm:$0xff] %v8073_v44  ;;  %580 = vst [vmem:[#allocation2 + $0x1d0] sm:$0xff] %v557_v16  ;;  %v8079_v34 = vpack.i.bf16 %v8073_v44, %v8055_v49  ;;  %v3300_v17 = vld [vmem:[#allocation2 + $0x1b0] sm:$0xff] }
 0x131   : > { %10957 = vst [vmem:[#allocation46_spill] sm:$0xff] %v8079_v34  ;;  %v609_v53 = vpop.permute.xlu1 %608  ;;  %v607_v42 = vpop.permute.xlu0 %606  ;;  %6285 = vrot.lane.b32.xlu0 %v8079_v34, %s7397_s11 }
 0x132   : > { %v631_v37 = vsel %vm630_vm5, %v607_v42, %v609_v53 }
 0x133   : > { %v3301_v12 = vld [vmem:[#allocation2 + $0x1b8] sm:$0xff]  ;;  %v8084_v55 = vpack.i.bf16 %v631_v37, %v557_v16 }
 0x134   : > { %v8086_v40 = vpack.i.bf16 %v3301_v12, %v3300_v17  ;;  %v5650_v12 = vpack.c.bf16 %v631_v37, %v7999_v46 }
 0x135   : > { %10958 = vst [vmem:[#allocation47_spill] sm:$0xff] %v8084_v55  ;;  %v613_v63 = vpop.permute.xlu1 %612  ;;  %v611_v58 = vpop.permute.xlu0 %610  ;;  %6290 = vrot.lane.b32.xlu1 %v8084_v55, %s7397_s11  ;;  %v3305_v50 = vld [vmem:[#allocation2 + $0x1d8] sm:$0xff] }
 0x136   : > { %10959 = vst [vmem:[#allocation48_spill] sm:$0xff] %v8086_v40  ;;  %v632_v2 = vsel %vm630_vm5, %v609_v53, %v611_v58  ;;  %v8092_v9 = vsel %vm630_vm5, %v611_v58, %v613_v63  ;;  %v3304_v34 = vld [vmem:[#allocation2 + $0x1d0] sm:$0xff] }
 0x137   : > { %10960 = vst [vmem:[#allocation49_spill] sm:$0xff] %v8092_v9  ;;  %655 = vst [vmem:[#allocation2 + $0x1e8] sm:$0xff] %v632_v2  ;;  %v8096_v16 = vpack.i.bf16 %v8092_v9, %v632_v2  ;;  %v5648_v17 = vpack.c.bf16 %v632_v2, %v8006_v54  ;;  %v8102_v40 = vpack.i.bf16 %v3305_v50, %v3304_v34 }
 0x138   : > { %656 = vst [vmem:[#allocation2 + $0x1f0] sm:$0xff] %v8092_v9 }
 0x139   : > { %10961 = vst [vmem:[#allocation50_spill] sm:$0xff] %v8096_v16  ;;  %10962 = vst [vmem:[#allocation51_spill] sm:$0xff] %v8102_v40  ;;  %v617_v53 = vpop.permute.xlu1 %616  ;;  %v615_v55 = vpop.permute.xlu0 %614  ;;  %6295 = vrot.lane.b32.xlu0 %v8096_v16, %s7397_s11  ;;  %5649 = vmatprep.subr.bf16.mxu0 %v5648_v17  ;;  %v8136_v17 = vld [vmem:[#allocation2 + $0x188] sm:$0xff] }
 0x13a   : > { %v8107_v58 = vsel %vm630_vm5, %v613_v63, %v615_v55  ;;  %v8110_v0 = vsel %vm630_vm5, %v615_v55, %v617_v53  ;;  %5651 = vmatpush1.bf16.msra.mxu0 %v5650_v12  ;;  %10968 = vst [vmem:[#allocation57_spill] sm:$0xff] %v8136_v17  ;;  %v8164_v17 = vld [vmem:[#allocation2 + $0x1a0] sm:$0xff] }
 0x13b   : > { %10963 = vst [vmem:[#allocation52_spill] sm:$0xff] %v8107_v58  ;;  %657 = vst [vmem:[#allocation2 + $0x1f8] sm:$0xff] %v8107_v58  ;;  %v8116_v2 = vpack.i.bf16 %v8110_v0, %v8107_v58  ;;  %v3299_v58 = vld [vmem:[#allocation2 + $0x1a8] sm:$0xff] }
 0x13c   : > { %658 = vst [vmem:[#allocation2 + $0x200] sm:$0xff] %v8110_v0  ;;  %10974 = vst [vmem:[#allocation63_spill] sm:$0xff] %v8164_v17 }
 0x13d   : > { %10964 = vst [vmem:[#allocation53_spill] sm:$0xff] %v8116_v2  ;;  %v621_v34 = vpop.permute.xlu1 %620  ;;  %v619_v46 = vpop.permute.xlu0 %618  ;;  %6300 = vrot.lane.b32.xlu1 %v8116_v2, %s7397_s11 }
 0x13e   : > { %v8123_v55 = vsel %vm630_vm5, %v617_v53, %v619_v46  ;;  %v8126_v54 = vsel %vm630_vm5, %v619_v46, %v621_v34  ;;  %v8128_v37 = vld [vmem:[#allocation2 + $0x1e8] sm:$0xff] }
 0x13f   : > { %10965 = vst [vmem:[#allocation54_spill] sm:$0xff] %v8126_v54  ;;  %10966 = vst [vmem:[#allocation55_spill] sm:$0xff] %v8128_v37  ;;  %v8134_v63 = vpack.i.bf16 %v8126_v54, %v8123_v55 }
 0x140   : > { %659 = vst [vmem:[#allocation2 + $0x208] sm:$0xff] %v8123_v55  ;;  %660 = vst [vmem:[#allocation2 + $0x210] sm:$0xff] %v8126_v54 }
 0x141   : > { %10967 = vst [vmem:[#allocation56_spill] sm:$0xff] %v8134_v63  ;;  %v625_v46 = vpop.permute.xlu1 %624  ;;  %v623_v42 = vpop.permute.xlu0 %622  ;;  %6305 = vrot.lane.b32.xlu0 %v8134_v63, %s7397_s11 }
 0x142   : > { %v8145_v50 = vsel %vm630_vm5, %v621_v34, %v623_v42  ;;  %v8148_v40 = vsel %vm630_vm5, %v623_v42, %v625_v46  ;;  %v8150_v10 = vld [vmem:[#allocation2 + $0x1f8] sm:$0xff]  ;;  %v8162_v34 = vld [vmem:[#allocation2 + $0x1f0] sm:$0xff] }
 0x143   : > { %10969 = vst [vmem:[#allocation58_spill] sm:$0xff] %v8145_v50  ;;  %10970 = vst [vmem:[#allocation59_spill] sm:$0xff] %v8150_v10  ;;  %v8152_v9 = vld [vmem:[#allocation2 + $0x200] sm:$0xff]  ;;  %v8158_v53 = vpack.i.bf16 %v8148_v40, %v8145_v50 }
 0x144   : > { %10971 = vst [vmem:[#allocation60_spill] sm:$0xff] %v8152_v9  ;;  %661 = vst [vmem:[#allocation2 + $0x218] sm:$0xff] %v8145_v50 }
 0x145   : > { %662 = vst [vmem:[#allocation2 + $0x220] sm:$0xff] %v8148_v40  ;;  %10972 = vst [vmem:[#allocation61_spill] sm:$0xff] %v8158_v53  ;;  %v629_v42 = vpop.permute.xlu1 %628  ;;  %v627_v37 = vpop.permute.xlu0 %626  ;;  %6310 = vrot.lane.b32.xlu1 %v8158_v53, %s7397_s11 }
 0x146   : > { %10973 = vst [vmem:[#allocation62_spill] sm:$0xff] %v8162_v34  ;;  %665 = vst.msk [vmem:[#allocation2 + $0x238] sm:$0xff] %vm244_vm0, %v629_v42  ;;  %v8174_v48 = vsel %vm630_vm5, %v625_v46, %v627_v37  ;;  %v641_v12 = vsel %vm630_vm5, %v627_v37, %v629_v42  ;;  %v3302_v46 = vld [vmem:[#allocation2 + $0x1c0] sm:$0xff] }
 0x147   : > { %v3310_v19 = vld [vmem:[#allocation2 + $0x208] sm:$0xff]  ;;  %663 = vst [vmem:[#allocation2 + $0x228] sm:$0xff] %v8174_v48  ;;  %664 = vst [vmem:[#allocation2 + $0x230] sm:$0xff] %v641_v12  ;;  %v8179_v50 = vpack.i.bf16 %v641_v12, %v8174_v48  ;;  %v3311_v42 = vld [vmem:[#allocation2 + $0x210] sm:$0xff] }
 0x148   : > { %v8181_v23 = vpack.i.bf16 %v3310_v19, %v3299_v58 }
 0x149   : > { %10975 = vst [vmem:[#allocation64_spill] sm:$0xff] %v8179_v50  ;;  %v693_v34 = vpop.permute.xlu1 %692  ;;  %v691_v54 = vpop.permute.xlu0 %690  ;;  %6315 = vrot.lane.b32.xlu0 %v8179_v50, %s7397_s11 }
 0x14a   : > { %10976 = vst [vmem:[#allocation65_spill] sm:$0xff] %v8181_v23  ;;  %v8186_v17 = vsel %vm714_vm6, %v691_v54, %v693_v34 }
 0x14b   : > { %10977 = vst [vmem:[#allocation66_spill] sm:$0xff] %v8186_v17  ;;  %v3312_v37 = vld [vmem:[#allocation2 + $0x218] sm:$0xff]  ;;  %1039 = vrot.lane.b32.xlu1 %v8186_v17, %s7397_s11 }
 0x14c   : > { %v3313_v9 = vld [vmem:[#allocation2 + $0x220] sm:$0xff]  ;;  %v8190_v12 = vpack.i.bf16 %v3312_v37, %v3311_v42  ;;  %v5664_v37 = vpack.c.bf16 %v7719_v30, %v7592_v4  ;;  %v10986_v4 = vpack.c.bf16 %v7924_v33, %v7825_v15  ;;  %v10987_v30 = vmov 0.0  }
 0x14d   : > { %v8192_v10 = vpack.i.bf16 %v3313_v9, %v3302_v46  ;;  %v697_v19 = vpop.permute.xlu1 %696  ;;  %v695_v58 = vpop.permute.xlu0 %694  ;;  %v3316_v23 = vld [vmem:[#allocation2 + $0x238] sm:$0xff]  ;;  %v8206_v9 = vld [vmem:[#allocation6] sm:$0xff]  ;;  %v10990_v15 = vpack.c.bf16 %v7907_v11, %v7804_v3 }
 0x14e   : > { %10978 = vst [vmem:[#allocation67_spill] sm:$0xff] %v8190_v12  ;;  %v8195_v63 = vsel %vm714_vm6, %v693_v34, %v695_v58  ;;  %v8198_v50 = vsel %vm714_vm6, %v695_v58, %v697_v19  ;;  %v3314_v54 = vld [vmem:[#allocation2 + $0x228] sm:$0xff]  ;;  %v3315_v53 = vld [vmem:[#allocation2 + $0x230] sm:$0xff]  ;;  %v5666_v12 = vpack.c.bf16 %v7708_v26, %v7597_v5 }
 0x14f   : > { %10979 = vst [vmem:[#allocation68_spill] sm:$0xff] %v8192_v10  ;;  %10980 = vst [vmem:[#allocation69_spill] sm:$0xff] %v8195_v63  ;;  %1043 = vrot.lane.b32.xlu1 %v8198_v50, %s7397_s11  ;;  %1041 = vrot.lane.b32.xlu0 %v8195_v63, %s7397_s11  ;;  %v3303_v34 = vld [vmem:[#allocation2 + $0x1c8] sm:$0xff]  ;;  %v8208_v46 = vpack.i.bf16 %v3316_v23, %v3315_v53 }
 0x150   : > { %10981 = vst [vmem:[#allocation70_spill] sm:$0xff] %v8198_v50  ;;  %739 = vst [vmem:[#allocation2 + $0x248] sm:$0xff] %v8195_v63  ;;  %1576 = vmatprep.subr.mxu0 %v8195_v63  ;;  %v8213_v42 = vpack.i.bf16 %v3314_v54, %v3303_v34  ;;  %v8275_v34 = vld [vmem:[#allocation2 + $0x48] sm:$0xff] }
 0x151   : > { %740 = vst [vmem:[#allocation2 + $0x250] sm:$0xff] %v8198_v50  ;;  %10982 = vst [vmem:[#allocation71_spill] sm:$0xff] %v8208_v46  ;;  %v701_v58 = vpop.permute.xlu1 %700  ;;  %v699_v10 = vpop.permute.xlu0 %698  ;;  %1577 = vmatpush1.msra.mxu0 %v8186_v17 }
 0x152   : > { %10983 = vst [vmem:[#allocation72_spill] sm:$0xff] %v8213_v42  ;;  %v8219_v50 = vsel %vm714_vm6, %v697_v19, %v699_v10  ;;  %v8222_v23 = vsel %vm714_vm6, %v699_v10, %v701_v58  ;;  %5665 = vmatprep.subr.bf16.mxu0 %v5664_v37  ;;  %5547 = vmatmul.mubr.msk.f32.vlgmr.msra.gmra.mrb[0].mxu0 %vm1202_vm7, %v8206_v9 }
 0x153   : > { %10984 = vst [vmem:[#allocation73_spill] sm:$0xff] %v8219_v50  ;;  %10985 = vst [vmem:[#allocation74_spill] sm:$0xff] %v8222_v23  ;;  %5667 = vmatpush1.bf16.msra.mxu0 %v5666_v12  ;;  %1047 = vrot.lane.b32.xlu1 %v8222_v23, %s7397_s11  ;;  %v5672_v12 = vpack.c.bf16 %v8123_v55, %v8038_v21  ;;  %v5674_v21 = vpack.c.bf16 %v8110_v0, %v8027_v14 }
 0x154   : > { %741 = vst [vmem:[#allocation2 + $0x258] sm:$0xff] %v8219_v50  ;;  %742 = vst [vmem:[#allocation2 + $0x260] sm:$0xff] %v8222_v23  ;;  %1045 = vrot.lane.b32.xlu0 %v8219_v50, %s7397_s11  ;;  %5669 = vmatprep.subr.bf16.mxu0 %v10986_v4  ;;  %v5688_v37 = vpack.c.bf16 %v7746_v43, %v8275_v34 }
 0x155   : > { %v705_v5 = vpop.permute.xlu1 %704  ;;  %v703_v26 = vpop.permute.xlu0 %702  ;;  %1770 = vmatprep.mubr.f32.mxu0 %v10987_v30 }
 0x156   : > { %v8237_v10 = vsel %vm714_vm6, %v701_v58, %v703_v26  ;;  %v8240_v53 = vsel %vm714_vm6, %v703_v26, %v705_v5  ;;  %v8286_v58 = vld [vmem:[#allocation2 + $0x40] sm:$0xff]  ;;  %v10995_v26 = vpack.c.bf16 %v7983_v25, %v7864_v28 }
 0x157   : > { %10988 = vst [vmem:[#allocation75_spill] sm:$0xff] %v8237_v10  ;;  %10989 = vst [vmem:[#allocation76_spill] sm:$0xff] %v8240_v53  ;;  %5671 = vmatpush1.bf16.msra.mxu0 %v10990_v15  ;;  %1051 = vrot.lane.b32.xlu1 %v8240_v53, %s7397_s11  ;;  %v5690_v4 = vpack.c.bf16 %v7732_v36, %v8286_v58  ;;  %v5696_v15 = vpack.c.bf16 %v8174_v48, %v8073_v44 }
 0x158   : > { %743 = vst [vmem:[#allocation2 + $0x268] sm:$0xff] %v8237_v10  ;;  %744 = vst [vmem:[#allocation2 + $0x270] sm:$0xff] %v8240_v53  ;;  %1049 = vrot.lane.b32.xlu0 %v8237_v10, %s7397_s11  ;;  %5673 = vmatprep.subr.bf16.mxu0 %v5672_v12 }
 0x159   : > { %v709_v33 = vpop.permute.xlu1 %708  ;;  %v707_v19 = vpop.permute.xlu0 %706 }
 0x15a   : > { %v8256_v55 = vsel %vm714_vm6, %v705_v5, %v707_v19  ;;  %v8259_v54 = vsel %vm714_vm6, %v707_v19, %v709_v33 }
 0x15b   : > { %10991 = vst [vmem:[#allocation77_spill] sm:$0xff] %v8256_v55  ;;  %10992 = vst [vmem:[#allocation78_spill] sm:$0xff] %v8259_v54  ;;  %5675 = vmatpush1.bf16.msra.mxu0 %v5674_v21  ;;  %1055 = vrot.lane.b32.xlu1 %v8259_v54, %s7397_s11 }
 0x15c   : > { %745 = vst [vmem:[#allocation2 + $0x278] sm:$0xff] %v8256_v55  ;;  %746 = vst [vmem:[#allocation2 + $0x280] sm:$0xff] %v8259_v54  ;;  %1053 = vrot.lane.b32.xlu0 %v8256_v55, %s7397_s11  ;;  %1718 = vmatprep.subr.mxu0 %v8237_v10 }
 0x15d   : > { %v713_v3 = vpop.permute.xlu1 %712  ;;  %v711_v11 = vpop.permute.xlu0 %710 }
 0x15e   : > { %749 = vst.msk [vmem:[#allocation2 + $0x298] sm:$0xff] %vm244_vm0, %v713_v3  ;;  %v8270_v14 = vsel %vm714_vm6, %v709_v33, %v711_v11  ;;  %v8273_v0 = vsel %vm714_vm6, %v711_v11, %v713_v3  ;;  %v10996_v33 = vpack.c.bf16 %v7953_v59, %v7844_v18 }
 0x15f   : > { %10993 = vst [vmem:[#allocation79_spill] sm:$0xff] %v8270_v14  ;;  %10994 = vst [vmem:[#allocation80_spill] sm:$0xff] %v8273_v0  ;;  %1719 = vmatpush1.msra.mxu0 %v8222_v23  ;;  %1059 = vrot.lane.b32.xlu1 %v8273_v0, %s7397_s11 }
 0x160   : > { %747 = vst [vmem:[#allocation2 + $0x288] sm:$0xff] %v8270_v14  ;;  %748 = vst [vmem:[#allocation2 + $0x290] sm:$0xff] %v8273_v0  ;;  %1057 = vrot.lane.b32.xlu0 %v8270_v14, %s7397_s11  ;;  %5689 = vmatprep.subr.bf16.mxu0 %v5688_v37  ;;  %s7404_s11 = smov [#allocation8]  }
 0x161   : > { %v8290_v5 = vpop.permute.xlu1 %6160  ;;  %v6156_v43 = vpop.permute.xlu0 %6155  ;;  %5549 = vmatmul.mubr.msk.f32.vlgmr.msra.gmra.mrb[2].mxu0 %vm1202_vm7, %v8206_v9 }
 0x162   : > { %5691 = vmatpush1.bf16.msra.mxu0 %v5690_v4  ;;  %1912 = vmatprep.mubr.f32.mxu0 %v10987_v30  ;;  %v6162_v28 = vunpack.i.l.bf16 %v8290_v5  ;;  %v6158_v25 = vunpack.i.h.bf16 %v6156_v43  ;;  %v6157_v48 = vunpack.i.l.bf16 %v6156_v43 }
 0x163   : > { %5693 = vmatprep.subr.bf16.mxu0 %v10995_v26  ;;  %6325 = vrot.lane.b32.xlu1 %v7766_v51, %s7398_s4  ;;  %v5698_v51 = vpack.c.bf16 %v8148_v40, %v8055_v49 }
 0x164   : > { %6320 = vrot.lane.b32.xlu0 %v7770_v52, %s7398_s4  ;;  %v10829_v52 = vunpack.i.h.bf16 %v8290_v5  ;;  %v1063_v49 = vsel %vm1061_vm8, %v6158_v25, %v6162_v28  ;;  %v1062_v40 = vsel %vm1061_vm8, %v6157_v48, %v6158_v25 }
 0x165   : > { %v8302_v36 = vpop.permute.xlu1 %6170  ;;  %v8304_v12 = vpop.permute.xlu0 %6165 }
 0x166   : > { %5695 = vmatpush1.bf16.msra.mxu0 %v10996_v33 }
 0x167   : > { %5697 = vmatprep.subr.bf16.mxu0 %v5696_v15  ;;  %6335 = vrot.lane.b32.xlu1 %v7788_v60, %s7398_s4  ;;  %v8331_v60 = vsel %vm1061_vm8, %v6162_v28, %v10829_v52 }
 0x168   : > { %6330 = vrot.lane.b32.xlu0 %v7792_v61, %s7398_s4 }
 0x169   : > { %v8319_v44 = vpop.permute.xlu1 %6180  ;;  %v8321_v18 = vpop.permute.xlu0 %6175 }
 0x16a   : > { %5699 = vmatpush1.bf16.msra.mxu0 %v5698_v51  ;;  %v6183_v19 = vunpack.i.h.bf16 %v8319_v44 }
 0x16b   : > { %1860 = vmatprep.subr.mxu0 %v8270_v14  ;;  %6345 = vrot.lane.b32.xlu1 %v7822_v13, %s7398_s4 }
 0x16c   : > { %6340 = vrot.lane.b32.xlu0 %v7814_v6, %s7398_s4 }
 0x16d   : > { %v8333_v61 = vpop.permute.xlu1 %6190  ;;  %v6186_v59 = vpop.permute.xlu0 %6185 }
 0x16e   : > { %v10828_v13 = vunpack.i.l.bf16 %v8333_v61  ;;  %v6188_v21 = vunpack.i.h.bf16 %v6186_v59  ;;  %v6187_v3 = vunpack.i.l.bf16 %v6186_v59  ;;  %1861 = vmatpush1.msra.mxu0 %v8259_v54 }
 0x16f   : > { %6355 = vrot.lane.b32.xlu1 %v7716_v27, %s7398_s4  ;;  %5551 = vmatmul.mubr.msk.f32.vlgmr.msra.gmra.mrb[4].mxu0 %vm1202_vm7, %v8206_v9 }
 0x170   : > { %v8347_v6 = vsel %vm1061_vm8, %v6188_v21, %v10828_v13  ;;  %v1073_v11 = vsel %vm1061_vm8, %v6187_v3, %v6188_v21  ;;  %v1072_v37 = vsel %vm1061_vm8, %v6183_v19, %v6187_v3  ;;  %6350 = vrot.lane.b32.xlu0 %v7704_v22, %s7398_s4  ;;  %2283 = vmatprep.mubr.f32.mxu0 %v10987_v30 }
 0x171   : > { %v8353_v4 = vpop.permute.xlu1 %6200  ;;  %v8355_v43 = vpop.permute.xlu0 %6195  ;;  %v5580_v26 = vpack.c.bf16 %v1073_v11, %v1063_v49  ;;  %v5582_v15 = vpack.c.bf16 %v1072_v37, %v1062_v40 }
 0x173   : > { %5581 = vmatprep.subr.bf16.mxu1 %v5580_v26  ;;  %6365 = vrot.lane.b32.xlu1 %v7740_v38, %s7398_s4 }
 0x174   : > { %5583 = vmatpush1.bf16.msra.mxu1 %v5582_v15  ;;  %6360 = vrot.lane.b32.xlu0 %v7728_v32, %s7398_s4 }
 0x175   : > { %v6211_v33 = vpop.permute.xlu1 %6210  ;;  %v8364_v51 = vpop.permute.xlu0 %6205 }
 0x176   : > { %v6213_v49 = vunpack.i.h.bf16 %v6211_v33  ;;  %v6212_v40 = vunpack.i.l.bf16 %v6211_v33 }
 0x177   : > { %6375 = vrot.lane.b32.xlu1 %v7796_v62, %s7398_s4 }
 0x178   : > { %6370 = vrot.lane.b32.xlu0 %v7755_v45, %s7398_s4  ;;  %v1082_v15 = vsel %vm1061_vm8, %v6212_v40, %v6213_v49 }
 0x179   : > { %v8370_v28 = vpop.permute.xlu1 %6220  ;;  %v8372_v25 = vpop.permute.xlu0 %6215 }
 0x17a   : > { %v6217_v19 = vunpack.i.l.bf16 %v8372_v25  ;;  %v10832_v33 = vunpack.i.h.bf16 %v8372_v25 }
 0x17b   : > { %6385 = vrot.lane.b32.xlu1 %v7838_v8, %s7398_s4 }
 0x17c   : > { %6380 = vrot.lane.b32.xlu0 %v7818_v7, %s7398_s4  ;;  %v1083_v9 = vsel %vm1061_vm8, %v6213_v49, %v6217_v19  ;;  %v8407_v49 = vsel %vm1061_vm8, %v6217_v19, %v10832_v33 }
 0x17d   : > { %v8378_v48 = vpop.permute.xlu1 %6230  ;;  %v8380_v59 = vpop.permute.xlu0 %6225 }
 0x17f   : > { %6395 = vrot.lane.b32.xlu1 %v7874_v31, %s7398_s4 }
 0x180   : > { %6390 = vrot.lane.b32.xlu0 %v7856_v20, %s7398_s4 }
 0x181   : > { %v8387_v21 = vpop.permute.xlu0 %6235  ;;  %v6241_v3 = vpop.permute.xlu1 %6240 }
 0x182   : > { %10997 = vst [vmem:[#allocation81_spill] sm:$0xff] %v8387_v21  ;;  %v6238_v11 = vunpack.i.h.bf16 %v8387_v21  ;;  %v6243_v37 = vunpack.i.h.bf16 %v6241_v3  ;;  %v6242_v26 = vunpack.i.l.bf16 %v6241_v3 }
 0x183   : > { %6405 = vrot.lane.b32.xlu1 %v7896_v56, %s7398_s4 }
 0x184   : > { %v1093_v13 = vsel %vm1061_vm8, %v6242_v26, %v6243_v37  ;;  %v1092_v52 = vsel %vm1061_vm8, %v6238_v11, %v6242_v26  ;;  %6400 = vrot.lane.b32.xlu0 %v7881_v39, %s7398_s4 }
 0x185   : > { %v8399_v42 = vpop.permute.xlu0 %6245  ;;  %v5584_v46 = vpack.c.bf16 %v1093_v13, %v1083_v9  ;;  %v5586_v3 = vpack.c.bf16 %v1092_v52, %v1082_v15  ;;  %v10998_v52 = vld [vmem:[#allocation41_spill] sm:$0xff]  ;;  %v10999_v13 = vld [vmem:[#allocation47_spill] sm:$0xff]  ;;  %v11000_v9 = vld [vmem:[#allocation46_spill] sm:$0xff]  ;;  %v8434_v19 = vpop.permute.xlu1 %6250 }
 0x186   : > { %v10833_v40 = vunpack.i.l.bf16 %v8399_v42 }
 0x187   : > { %5585 = vmatprep.subr.bf16.mxu1 %v5584_v46  ;;  %6415 = vrot.lane.b32.xlu1 %v7941_v41, %s7398_s4  ;;  %v11003_v46 = vld [vmem:[#allocation56_spill] sm:$0xff] }
 0x188   : > { %v8412_v11 = vsel %vm1061_vm8, %v6243_v37, %v10833_v40  ;;  %5587 = vmatpush1.bf16.msra.mxu1 %v5586_v3  ;;  %6410 = vrot.lane.b32.xlu0 %v7919_v57, %s7398_s4  ;;  %v11002_v3 = vld [vmem:[#allocation61_spill] sm:$0xff] }
 0x189   : > { %v8436_v37 = vpop.permute.xlu0 %6255 }
 0x18b   : > { %6425 = vrot.lane.b32.xlu1 %v7990_v24, %s7398_s4  ;;  %v8442_v26 = vpop.permute.xlu1 %6260 }
 0x18c   : > { %6420 = vrot.lane.b32.xlu0 %v7969_v29, %s7398_s4  ;;  %11001 = vst [vmem:[#allocation82_spill] sm:$0xff] %v8442_v26 }
 0x18f   : > { %6435 = vrot.lane.b32.xlu1 %v8033_v1, %s7398_s4 }
 0x190   : > { %6430 = vrot.lane.b32.xlu0 %v8015_v35, %s7398_s4 }
 0x193   : > { %6445 = vrot.lane.b32.xlu1 %v8063_v47, %s7398_s4  ;;  %v6266_v15 = vpop.permute.xlu0 %6265 }
 0x194   : > { %6440 = vrot.lane.b32.xlu0 %v10998_v52, %s7398_s4  ;;  %v6267_v52 = vunpack.i.l.bf16 %v6266_v15 }
 0x197   : > { %6455 = vrot.lane.b32.xlu1 %v10999_v13, %s7398_s4  ;;  %v8448_v33 = vpop.permute.xlu1 %6270  ;;  %v11005_v13 = vld [vmem:[#allocation70_spill] sm:$0xff] }
 0x198   : > { %6450 = vrot.lane.b32.xlu0 %v11000_v9, %s7398_s4  ;;  %v10845_v21 = vunpack.i.l.bf16 %v8448_v33 }
 0x19b   : > { %6465 = vrot.lane.b32.xlu1 %v8116_v2, %s7398_s4  ;;  %v8450_v40 = vpop.permute.xlu0 %6275  ;;  %v11004_v2 = vld [vmem:[#allocation64_spill] sm:$0xff] }
 0x19c   : > { %6460 = vrot.lane.b32.xlu0 %v8096_v16, %s7398_s4 }
 0x19f   : > { %6475 = vrot.lane.b32.xlu1 %v11002_v3, %s7398_s4  ;;  %v8456_v16 = vpop.permute.xlu1 %6280  ;;  %v6268_v3 = vunpack.i.h.bf16 %v6266_v15 }
 0x1a0   : > { %6470 = vrot.lane.b32.xlu0 %v11003_v46, %s7398_s4 }
 0x1a1   : > { %v1103_v15 = vsel %vm1061_vm8, %v6268_v3, %v10845_v21 }
 0x1a3   : > { %2053 = vrot.lane.b32.xlu1 %v8186_v17, %s7398_s4  ;;  %v8458_v9 = vpop.permute.xlu0 %6285 }
 0x1a4   : > { %6480 = vrot.lane.b32.xlu0 %v11004_v2, %s7398_s4 }
 0x1a7   : > { %2057 = vrot.lane.b32.xlu1 %v11005_v13, %s7398_s4  ;;  %v8464_v46 = vpop.permute.xlu1 %6290 }
 0x1a8   : > { %2055 = vrot.lane.b32.xlu0 %v8195_v63, %s7398_s4  ;;  %11006 = vst [vmem:[#allocation83_spill] sm:$0xff] %v8464_v46  ;;  %v6293_v17 = vunpack.i.h.bf16 %v8464_v46 }
 0x1ab   : > { %2061 = vrot.lane.b32.xlu1 %v8222_v23, %s7398_s4  ;;  %v8469_v2 = vpop.permute.xlu0 %6295  ;;  %v1102_v23 = vsel %vm1061_vm8, %v6267_v52, %v6268_v3  ;;  %v8509_v3 = vld [vmem:[#allocation2 + $0x30] sm:$0xff] }
 0x1ac   : > { %2059 = vrot.lane.b32.xlu0 %v8219_v50, %s7398_s4  ;;  %v10846_v13 = vunpack.i.h.bf16 %v8469_v2  ;;  %v6297_v63 = vunpack.i.l.bf16 %v8469_v2  ;;  %11009 = vst [vmem:[#allocation86_spill] sm:$0xff] %v8509_v3 }
 0x1ae   : > { %v1113_v47 = vsel %vm1061_vm8, %v6297_v63, %v10846_v13  ;;  %v1112_v26 = vsel %vm1061_vm8, %v6293_v17, %v6297_v63  ;;  %v8496_v63 = vld [vmem:[#allocation2 + $0x10] sm:$0xff] }
 0x1af   : > { %2065 = vrot.lane.b32.xlu1 %v8240_v53, %s7398_s4  ;;  %v5588_v50 = vpack.c.bf16 %v1113_v47, %v1103_v15  ;;  %v5590_v46 = vpack.c.bf16 %v1112_v26, %v1102_v23  ;;  %v8492_v21 = vpop.permute.xlu1 %6300  ;;  %11007 = vst [vmem:[#allocation84_spill] sm:$0xff] %v8496_v63  ;;  %v8498_v47 = vld [vmem:[#allocation2 + $0x18] sm:$0xff]  ;;  %v7150_v23 = vld [vmem:[#allocation2 + $0x8] sm:$0xff] }
 0x1b0   : > { %2063 = vrot.lane.b32.xlu0 %v8237_v10, %s7398_s4  ;;  %11008 = vst [vmem:[#allocation85_spill] sm:$0xff] %v8498_v47  ;;  %v6489_v17 = vpack.i.bf16 %v8498_v47, %v8496_v63  ;;  %v8511_v15 = vld [vmem:[#allocation2 + $0x38] sm:$0xff] }
 0x1b1   : > { %5589 = vmatprep.subr.bf16.mxu1 %v5588_v50  ;;  %v7149_v50 = vld [vmem:[#allocation2] sm:$0xff]  ;;  %11010 = vst [vmem:[#allocation87_spill] sm:$0xff] %v8511_v15  ;;  %v6499_v13 = vpack.i.bf16 %v8511_v15, %v8509_v3  ;;  %v7155_v15 = vld [vmem:[#allocation2 + $0x50] sm:$0xff] }
 0x1b2   : > { %5591 = vmatpush1.bf16.msra.mxu1 %v5590_v46  ;;  %v6484_v46 = vpack.i.bf16 %v7150_v23, %v7149_v50  ;;  %v7153_v50 = vld [vmem:[#allocation2 + $0x28] sm:$0xff]  ;;  %v7154_v23 = vld [vmem:[#allocation2 + $0x20] sm:$0xff] }
 0x1b3   : > { %2069 = vrot.lane.b32.xlu1 %v8259_v54, %s7398_s4  ;;  %v8504_v52 = vpop.permute.xlu0 %6305  ;;  %v11015_v54 = vunpack.i.l.bf16 %v8333_v61 }
 0x1b4   : > { %2067 = vrot.lane.b32.xlu0 %v8256_v55, %s7398_s4  ;;  %v6494_v55 = vpack.i.bf16 %v7153_v50, %v7154_v23  ;;  %v11014_v23 = vunpack.i.h.bf16 %v8333_v61 }
 0x1b6   : > { %v1075_v3 = vsel %vm1061_vm8, %v11015_v54, %v11014_v23  ;;  %v8548_v23 = vld [vmem:[#allocation6 + $0x8] sm:$0xff] }
 0x1b7   : > { %2073 = vrot.lane.b32.xlu1 %v8273_v0, %s7398_s4  ;;  %v8506_v26 = vpop.permute.xlu1 %6310  ;;  %v6504_v0 = vpack.i.bf16 %v8275_v34, %v8286_v58  ;;  %v11016_v34 = vunpack.i.h.bf16 %v8399_v42  ;;  %v11017_v58 = vunpack.i.l.bf16 %v8399_v42 }
 0x1b8   : > { %2071 = vrot.lane.b32.xlu0 %v8270_v14, %s7398_s4  ;;  %v11012_v14 = vunpack.i.l.bf16 %v8304_v12  ;;  %s7302_s4 = sshll.u32 %s7404_s11, 4  ;;  %s7303_s4 = int_to_ptr.vmem [resolvable:$false] %s7302_s4 }
 0x1b9   : > { %p7305_p12 = scmp.lt.s32.totalorder %s10706_s20, %s7303_s4 }
 0x1bb   : > { %6490 = vrot.lane.b32.xlu1 %v6489_v17, %s7399_s26  ;;  %v8519_v10 = vpop.permute.xlu0 %6315 }
 0x1bc   : > { %6485 = vrot.lane.b32.xlu0 %v6484_v46, %s7399_s26  ;;  %11011 = vst [vmem:[#allocation88_spill] sm:$0xff] %v8519_v10  ;;  %v11013_v46 = vunpack.i.h.bf16 %v8290_v5  ;;  %v1095_v5 = vsel %vm1061_vm8, %v11017_v58, %v11016_v34  ;;  %v11018_v34 = vunpack.i.l.bf16 %v8370_v28  ;;  %v11019_v58 = vunpack.i.h.bf16 %v8372_v25 }
 0x1bd   : > { %v1040_v17 = vpop.permute.xlu1 %1039 }
 0x1be   : > { %v1065_v50 = vsel %vm1061_vm8, %v11013_v46, %v11012_v14  ;;  %v6302_v46 = vunpack.i.l.bf16 %v8492_v21  ;;  %v1085_v14 = vsel %vm1061_vm8, %v11019_v58, %v11018_v34  ;;  %v11024_v58 = vunpack.i.l.bf16 %v8448_v33 }
 0x1bf   : > { %6500 = vrot.lane.b32.xlu1 %v6499_v13, %s7399_s26 }
 0x1c0   : > { %6495 = vrot.lane.b32.xlu0 %v6494_v55, %s7399_s26  ;;  %v7156_v55 = vld [vmem:[#allocation2 + $0x60] sm:$0xff] }
 0x1c1   : > { %v8536_v13 = vpop.permute.xlu1 %1043  ;;  %v1042_v53 = vpop.permute.xlu0 %1041  ;;  %v6509_v63 = vpack.i.bf16 %v7156_v55, %v7155_v15  ;;  %v5592_v15 = vpack.c.bf16 %v1075_v3, %v1065_v50  ;;  %v6277_v55 = vunpack.i.l.bf16 %v8450_v40  ;;  %v11021_v3 = vunpack.i.h.bf16 %v8492_v21 }
 0x1c2   : > { %v1123_v47 = vsel %vm1061_vm8, %v1042_v53, %v8536_v13  ;;  %v1122_v54 = vsel %vm1061_vm8, %v1040_v17, %v1042_v53  ;;  %v5596_v53 = vpack.c.bf16 %v1095_v5, %v1085_v14  ;;  %v6172_v17 = vunpack.i.l.bf16 %v8302_v36 }
 0x1c3   : > { %6510 = vrot.lane.b32.xlu1 %v6509_v63, %s7399_s26  ;;  %1218 = vmatprep.subr.mxu1 %v1123_v47  ;;  %v6273_v63 = vunpack.i.h.bf16 %v8448_v33  ;;  %v1115_v25 = vsel %vm1061_vm8, %v6302_v46, %v11021_v3  ;;  %v6168_v50 = vunpack.i.h.bf16 %v8304_v12  ;;  %v6197_v5 = vunpack.i.l.bf16 %v8355_v43 }
 0x1c4   : > { %6505 = vrot.lane.b32.xlu0 %v6504_v0, %s7399_s26  ;;  %1219 = vmatpush1.msra.mxu1 %v1122_v54  ;;  %v11020_v0 = vpack.c.bf16 %v8347_v6, %v8331_v60  ;;  %v6198_v6 = vunpack.i.h.bf16 %v8355_v43  ;;  %v11022_v14 = vunpack.i.h.bf16 %v8469_v2 }
 0x1c5   : > { %v8558_v10 = vpop.permute.xlu1 %1047  ;;  %5593 = vmatprep.subr.bf16.mxu1 %v5592_v15  ;;  %5542 = vmatmul.mubr.msk.f32.vlgmr.msra.gmra.mrb[0].mxu1 %vm1202_vm7, %v8548_v23  ;;  %v1105_v60 = vsel %vm1061_vm8, %v6273_v63, %v6277_v55  ;;  %v1067_v33 = vsel %vm1061_vm8, %v6168_v50, %v6172_v17 }
 0x1c6   : > { %v1046_v47 = vpop.permute.xlu0 %1045  ;;  %5595 = vmatpush1.bf16.msra.mxu1 %v11020_v0  ;;  %1341 = vmatprep.mubr.f32.mxu1 %v10987_v30  ;;  %v5600_v15 = vpack.c.bf16 %v1115_v25, %v1105_v60  ;;  %v6252_v0 = vunpack.i.l.bf16 %v8434_v19  ;;  %v11026_v60 = vunpack.i.h.bf16 %v8333_v61 }
 0x1c7   : > { %6520 = vrot.lane.b32.xlu1 %v7716_v27, %s7399_s26  ;;  %5597 = vmatprep.subr.bf16.mxu1 %v5596_v53  ;;  %v1114_v27 = vsel %vm1061_vm8, %v11022_v14, %v6302_v46  ;;  %v1104_v53 = vsel %vm1061_vm8, %v11024_v58, %v6273_v63  ;;  %v6253_v46 = vunpack.i.h.bf16 %v8434_v19  ;;  %v11025_v63 = vunpack.i.l.bf16 %v8304_v12 }
 0x1c8   : > { %6515 = vrot.lane.b32.xlu0 %v7704_v22, %s7399_s26  ;;  %v11023_v22 = vpack.c.bf16 %v8412_v11, %v8407_v49  ;;  %v5602_v2 = vpack.c.bf16 %v1114_v27, %v1104_v53  ;;  %v1077_v49 = vsel %vm1061_vm8, %v6197_v5, %v6198_v6  ;;  %v6227_v11 = vunpack.i.l.bf16 %v8380_v59 }
 0x1c9   : > { %v8584_v54 = vpop.permute.xlu1 %1051  ;;  %v1066_v25 = vsel %vm1061_vm8, %v11025_v63, %v6168_v50  ;;  %v1076_v14 = vsel %vm1061_vm8, %v11026_v60, %v6197_v5  ;;  %v6223_v27 = vunpack.i.h.bf16 %v8370_v28  ;;  %v6307_v58 = vunpack.i.l.bf16 %v8504_v52 }
 0x1ca   : > { %v8586_v34 = vpop.permute.xlu0 %1049  ;;  %5599 = vmatpush1.bf16.msra.mxu1 %v11023_v22  ;;  %v6308_v22 = vunpack.i.h.bf16 %v8504_v52  ;;  %v1124_v12 = vsel %vm1061_vm8, %v8536_v13, %v1046_v47  ;;  %v1097_v61 = vsel %vm1061_vm8, %v6252_v0, %v6253_v46  ;;  %v6282_v5 = vunpack.i.l.bf16 %v8456_v16 }
 0x1cb   : > { %6530 = vrot.lane.b32.xlu1 %v7740_v38, %s7399_s26  ;;  %5601 = vmatprep.subr.bf16.mxu1 %v5600_v15  ;;  %v5604_v15 = vpack.c.bf16 %v1077_v49, %v1067_v33  ;;  %v1087_v53 = vsel %vm1061_vm8, %v6223_v27, %v6227_v11  ;;  %v11027_v13 = vunpack.i.h.bf16 %v8399_v42  ;;  %v6278_v33 = vunpack.i.h.bf16 %v8450_v40 }
 0x1cc   : > { %6525 = vrot.lane.b32.xlu0 %v7728_v32, %s7399_s26  ;;  %v1125_v32 = vsel %vm1061_vm8, %v1046_v47, %v8558_v10  ;;  %v1117_v49 = vsel %vm1061_vm8, %v6307_v58, %v6308_v22  ;;  %v11028_v42 = vunpack.i.l.bf16 %v8370_v28  ;;  %v6202_v60 = vunpack.i.l.bf16 %v8353_v4 }
 0x1cd   : > { %v8600_v3 = vpop.permute.xlu1 %1055  ;;  %v1096_v47 = vsel %vm1061_vm8, %v11027_v13, %v6252_v0  ;;  %v1107_v63 = vsel %vm1061_vm8, %v6278_v33, %v6282_v5  ;;  %v6228_v13 = vunpack.i.h.bf16 %v8380_v59 }
 0x1ce   : > { %v8608_v38 = vpop.permute.xlu0 %1053  ;;  %5603 = vmatpush1.bf16.msra.mxu1 %v5602_v2  ;;  %v5608_v2 = vpack.c.bf16 %v1097_v61, %v1087_v53  ;;  %v1086_v0 = vsel %vm1061_vm8, %v11028_v42, %v6223_v27  ;;  %v5612_v27 = vpack.c.bf16 %v1117_v49, %v1107_v63  ;;  %v1106_v61 = vsel %vm1061_vm8, %v6277_v55, %v6278_v33 }
 0x1cf   : > { %6540 = vrot.lane.b32.xlu1 %v7796_v62, %s7399_s26  ;;  %1289 = vmatprep.subr.mxu1 %v1125_v32  ;;  %v5610_v32 = vpack.c.bf16 %v1096_v47, %v1086_v0  ;;  %v1078_v40 = vsel %vm1061_vm8, %v6198_v6, %v6202_v60  ;;  %v6232_v55 = vunpack.i.l.bf16 %v8378_v48  ;;  %v6312_v6 = vunpack.i.l.bf16 %v8506_v26 }
 0x1d0   : > { %6535 = vrot.lane.b32.xlu0 %v7755_v45, %s7399_s26  ;;  %v5606_v45 = vpack.c.bf16 %v1076_v14, %v1066_v25  ;;  %v6173_v25 = vunpack.i.h.bf16 %v8302_v36  ;;  %v11029_v14 = vunpack.i.h.bf16 %v8492_v21  ;;  %v6258_v21 = vunpack.i.h.bf16 %v8436_v37 }
 0x1d1   : > { %v8626_v62 = vpop.permute.xlu1 %1059  ;;  %v6287_v49 = vunpack.i.l.bf16 %v8458_v9  ;;  %v1126_v42 = vsel %vm1061_vm8, %v8558_v10, %v8586_v34  ;;  %v1088_v10 = vsel %vm1061_vm8, %v6227_v11, %v6228_v13  ;;  %v6208_v11 = vunpack.i.h.bf16 %v8364_v51 }
 0x1d2   : > { %v8633_v50 = vpop.permute.xlu0 %1057  ;;  %1290 = vmatpush1.msra.mxu1 %v1124_v12  ;;  %v1116_v28 = vsel %vm1061_vm8, %v11029_v14, %v6307_v58  ;;  %v6257_v58 = vunpack.i.l.bf16 %v8436_v37  ;;  %v1068_v53 = vsel %vm1061_vm8, %v6172_v17, %v6173_v25 }
 0x1d3   : > { %6550 = vrot.lane.b32.xlu1 %v7838_v8, %s7399_s26  ;;  %5605 = vmatprep.subr.bf16.mxu1 %v5604_v15  ;;  %v6177_v15 = vunpack.i.l.bf16 %v8321_v18 }
 0x1d4   : > { %6545 = vrot.lane.b32.xlu0 %v7818_v7, %s7399_s26  ;;  %5543 = vmatmul.mubr.msk.f32.vlgmr.msra.gmra.mrb[2].mxu1 %vm1202_vm7, %v8548_v23  ;;  %v1099_v33 = vsel %vm1061_vm8, %v6257_v58, %v6258_v21 }
 0x1d5   : > { %5607 = vmatpush1.bf16.msra.mxu1 %v5606_v45  ;;  %v8649_v8 = vpop.permute.xlu1 %6325  ;;  %1412 = vmatprep.mubr.f32.mxu1 %v10987_v30  ;;  %v1069_v36 = vsel %vm1061_vm8, %v6173_v25, %v6177_v15 }
 0x1d6   : > { %v8658_v7 = vpop.permute.xlu0 %6320  ;;  %5609 = vmatprep.subr.bf16.mxu1 %v5608_v2  ;;  %v5618_v2 = vpack.c.bf16 %v1078_v40, %v1068_v53  ;;  %v10861_v63 = vunpack.i.l.bf16 %v8649_v8 }
 0x1d7   : > { %6560 = vrot.lane.b32.xlu1 %v7874_v31, %s7399_s26  ;;  %v6203_v31 = vunpack.i.h.bf16 %v8353_v4  ;;  %v6323_v25 = vunpack.i.h.bf16 %v8658_v7  ;;  %v11035_v4 = vld [vmem:[#allocation47_spill] sm:$0xff] }
 0x1d8   : > { %6555 = vrot.lane.b32.xlu0 %v7856_v20, %s7399_s26  ;;  %v5614_v20 = vpack.c.bf16 %v1116_v28, %v1106_v61 }
 0x1d9   : > { %5611 = vmatpush1.bf16.msra.mxu1 %v5610_v32  ;;  %v8674_v12 = vpop.permute.xlu1 %6335  ;;  %v1079_v43 = vsel %vm1061_vm8, %v6202_v60, %v6203_v31  ;;  %v1089_v32 = vsel %vm1061_vm8, %v6228_v13, %v6232_v55  ;;  %v6322_v60 = vunpack.i.l.bf16 %v8658_v7  ;;  %v2077_v40 = vsel %vm2075_vm9, %v6323_v25, %v10861_v63 }
 0x1da   : > { %v8679_v45 = vpop.permute.xlu0 %6330  ;;  %5613 = vmatprep.subr.bf16.mxu1 %v5612_v27  ;;  %v5616_v0 = vpack.c.bf16 %v1079_v43, %v1069_v36  ;;  %v5620_v19 = vpack.c.bf16 %v1099_v33, %v1089_v32  ;;  %v6207_v27 = vunpack.i.l.bf16 %v8364_v51  ;;  %v1118_v51 = vsel %vm1061_vm8, %v6308_v22, %v6312_v6 }
 0x1db   : > { %6570 = vrot.lane.b32.xlu1 %v7896_v56, %s7399_s26  ;;  %v1127_v56 = vsel %vm1061_vm8, %v8586_v34, %v8584_v54  ;;  %v6283_v34 = vunpack.i.h.bf16 %v8456_v16  ;;  %v6178_v33 = vunpack.i.h.bf16 %v8321_v18  ;;  %v11031_v16 = vld [vmem:[#allocation44_spill] sm:$0xff]  ;;  %v1128_v18 = vsel %vm1061_vm8, %v8584_v54, %v8608_v38 }
 0x1dc   : > { %6565 = vrot.lane.b32.xlu0 %v7881_v39, %s7399_s26  ;;  %v6313_v39 = vunpack.i.h.bf16 %v8506_v26  ;;  %v1081_v32 = vsel %vm1061_vm8, %v6207_v27, %v6208_v11 }
 0x1dd   : > { %5615 = vmatpush1.bf16.msra.mxu1 %v5614_v20  ;;  %v8695_v47 = vpop.permute.xlu1 %6345  ;;  %v2076_v20 = vsel %vm2075_vm9, %v6322_v60, %v6323_v25  ;;  %v11033_v25 = vld [vmem:[#allocation41_spill] sm:$0xff] }
 0x1de   : > { %v8706_v17 = vpop.permute.xlu0 %6340  ;;  %1360 = vmatprep.subr.mxu1 %v1127_v56  ;;  %v1119_v59 = vsel %vm1061_vm8, %v6312_v6, %v6313_v39  ;;  %v11030_v6 = vld [vmem:[#allocation82_spill] sm:$0xff] }
 0x1df   : > { %6580 = vrot.lane.b32.xlu1 %v7941_v41, %s7399_s26  ;;  %v1098_v41 = vsel %vm1061_vm8, %v6253_v46, %v6257_v58  ;;  %v6348_v46 = vunpack.i.h.bf16 %v8695_v47  ;;  %v1109_v58 = vsel %vm1061_vm8, %v6283_v34, %v6287_v49 }
 0x1e0   : > { %6575 = vrot.lane.b32.xlu0 %v7919_v57, %s7399_s26  ;;  %v5622_v61 = vpack.c.bf16 %v1098_v41, %v1088_v10  ;;  %v5624_v56 = vpack.c.bf16 %v1119_v59, %v1109_v58  ;;  %v1070_v10 = vsel %vm1061_vm8, %v6177_v15, %v6178_v33  ;;  %v11034_v59 = vld [vmem:[#allocation88_spill] sm:$0xff] }
 0x1e1   : > { %1361 = vmatpush1.msra.mxu1 %v1126_v42  ;;  %v8730_v57 = vpop.permute.xlu1 %6355  ;;  %v1108_v42 = vsel %vm1061_vm8, %v6282_v5, %v6283_v34  ;;  %v11032_v5 = vld [vmem:[#allocation81_spill] sm:$0xff]  ;;  %v1080_v34 = vsel %vm1061_vm8, %v6203_v31, %v6207_v27  ;;  %v6318_v11 = vunpack.i.h.bf16 %v11034_v59  ;;  %v11036_v31 = vld [vmem:[#allocation83_spill] sm:$0xff] }
 0x1e2   : > { %v8736_v14 = vpop.permute.xlu0 %6350  ;;  %5617 = vmatprep.subr.bf16.mxu1 %v5616_v0  ;;  %5544 = vmatmul.mubr.msk.f32.vlgmr.msra.gmra.mrb[4].mxu1 %vm1202_vm7, %v8548_v23  ;;  %v5626_v22 = vpack.c.bf16 %v1118_v51, %v1108_v42  ;;  %v6263_v0 = vunpack.i.h.bf16 %v11030_v6  ;;  %v6237_v41 = vunpack.i.l.bf16 %v11032_v5  ;;  %v6292_v27 = vunpack.i.l.bf16 %v11036_v31 }
 0x1e3   : > { %v10860_v7 = vunpack.i.h.bf16 %v8736_v14  ;;  %v6352_v28 = vunpack.i.l.bf16 %v8736_v14  ;;  %5619 = vmatpush1.bf16.msra.mxu1 %v5618_v2  ;;  %6590 = vrot.lane.b32.xlu1 %v7990_v24, %s7399_s26  ;;  %v6182_v2 = vunpack.i.l.bf16 %v8319_v44  ;;  %v6288_v51 = vunpack.i.h.bf16 %v8458_v9 }
 0x1e4   : > { %6585 = vrot.lane.b32.xlu0 %v7969_v29, %s7399_s26  ;;  %5621 = vmatprep.subr.bf16.mxu1 %v5620_v19  ;;  %v6233_v19 = vunpack.i.h.bf16 %v8378_v48 }
 0x1e5   : > { %v2086_v24 = vsel %vm2075_vm9, %v6348_v46, %v6352_v28  ;;  %v8757_v53 = vpop.permute.xlu1 %6365  ;;  %v2087_v29 = vsel %vm2075_vm9, %v6352_v28, %v10860_v7  ;;  %1483 = vmatprep.mubr.f32.mxu1 %v10987_v30  ;;  %v1071_v60 = vsel %vm1061_vm8, %v6178_v33, %v6182_v2  ;;  %v11039_v2 = vld [vmem:[#allocation50_spill] sm:$0xff]  ;;  %v1111_v42 = vsel %vm1061_vm8, %v6288_v51, %v6292_v27  ;;  %v7158_v27 = vld [vmem:[#allocation2 + $0x70] sm:$0xff] }
 0x1e6   : > { %v8769_v13 = vpop.permute.xlu0 %6360  ;;  %v5700_v36 = vpack.c.bf16 %v2087_v29, %v2077_v40  ;;  %v5702_v43 = vpack.c.bf16 %v2086_v24, %v2076_v20  ;;  %v5628_v28 = vpack.c.bf16 %v1081_v32, %v1071_v60  ;;  %v11037_v20 = vld [vmem:[#allocation46_spill] sm:$0xff]  ;;  %v5630_v24 = vpack.c.bf16 %v1080_v34, %v1070_v10 }
 0x1e7   : > { %5623 = vmatpush1.bf16.msra.mxu1 %v5622_v61  ;;  %6600 = vrot.lane.b32.xlu1 %v8033_v1, %s7399_s26  ;;  %v6262_v1 = vunpack.i.l.bf16 %v11030_v6  ;;  %v6317_v61 = vunpack.i.l.bf16 %v11034_v59  ;;  %v1091_v40 = vsel %vm1061_vm8, %v6233_v19, %v6237_v41  ;;  %v1090_v37 = vsel %vm1061_vm8, %v6232_v55, %v6233_v19  ;;  %v11043_v59 = vld [vmem:[#allocation66_spill] sm:$0xff] }
 0x1e8   : > { %6595 = vrot.lane.b32.xlu0 %v8015_v35, %s7399_s26  ;;  %5625 = vmatprep.subr.bf16.mxu1 %v5624_v56  ;;  %v1129_v35 = vsel %vm1061_vm8, %v8608_v38, %v8600_v3  ;;  %v1110_v26 = vsel %vm1061_vm8, %v6287_v49, %v6288_v51  ;;  %v1131_v19 = vsel %vm1061_vm8, %v8633_v50, %v8626_v62 }
 0x1e9   : > { %5701 = vmatprep.subr.bf16.mxu0 %v5700_v36  ;;  %v8780_v52 = vpop.permute.xlu1 %6375  ;;  %v1101_v15 = vsel %vm1061_vm8, %v6262_v1, %v6263_v0  ;;  %v1100_v29 = vsel %vm1061_vm8, %v6258_v21, %v6262_v1  ;;  %v1121_v36 = vsel %vm1061_vm8, %v6317_v61, %v6318_v11  ;;  %v11038_v21 = vld [vmem:[#allocation53_spill] sm:$0xff]  ;;  %v11044_v11 = vld [vmem:[#allocation64_spill] sm:$0xff] }
 0x1ea   : > { %5703 = vmatpush1.bf16.msra.mxu0 %v5702_v43  ;;  %v8784_v44 = vpop.permute.xlu0 %6370  ;;  %v5632_v38 = vpack.c.bf16 %v1101_v15, %v1091_v40  ;;  %v5634_v33 = vpack.c.bf16 %v1100_v29, %v1090_v37  ;;  %v6378_v48 = vunpack.i.h.bf16 %v8780_v52  ;;  %v6377_v55 = vunpack.i.l.bf16 %v8780_v52  ;;  %v11042_v52 = vld [vmem:[#allocation56_spill] sm:$0xff]  ;;  %v11047_v40 = vld [vmem:[#allocation70_spill] sm:$0xff] }
 0x1eb   : > { %5627 = vmatpush1.bf16.msra.mxu1 %v5626_v22  ;;  %6610 = vrot.lane.b32.xlu1 %v11031_v16, %s7399_s26  ;;  %v1120_v22 = vsel %vm1061_vm8, %v6313_v39, %v6317_v61  ;;  %v5636_v0 = vpack.c.bf16 %v1121_v36, %v1111_v42  ;;  %v1130_v61 = vsel %vm1061_vm8, %v8600_v3, %v8633_v50  ;;  %v7157_v15 = vld [vmem:[#allocation2 + $0x78] sm:$0xff]  ;;  %v11048_v3 = vld [vmem:[#allocation69_spill] sm:$0xff]  ;;  %v11052_v37 = vld [vmem:[#allocation22_spill] sm:$0xff] }
 0x1ec   : > { %6605 = vrot.lane.b32.xlu0 %v11033_v25, %s7399_s26  ;;  %1431 = vmatprep.subr.mxu1 %v1129_v35  ;;  %v11041_v35 = vld [vmem:[#allocation61_spill] sm:$0xff]  ;;  %v5638_v5 = vpack.c.bf16 %v1120_v22, %v1110_v26  ;;  %v2096_v49 = vsel %vm2075_vm9, %v6377_v55, %v6378_v48  ;;  %v11049_v50 = vld [vmem:[#allocation24_spill] sm:$0xff]  ;;  %v11058_v22 = vld [vmem:[#allocation39_spill] sm:$0xff] }
 0x1ed   : > { %v8803_v46 = vpop.permute.xlu1 %6385  ;;  %v11050_v29 = vld [vmem:[#allocation16_spill] sm:$0xff] }
 0x1ee   : > { %v8807_v58 = vpop.permute.xlu0 %6380  ;;  %v11057_v42 = vld [vmem:[#allocation52_spill] sm:$0xff] }
 0x1ef   : > { %1432 = vmatpush1.msra.mxu1 %v1128_v18  ;;  %6620 = vrot.lane.b32.xlu1 %v11035_v4, %s7399_s26  ;;  %v10858_v43 = vunpack.i.l.bf16 %v8807_v58  ;;  %v11045_v4 = vld [vmem:[#allocation85_spill] sm:$0xff]  ;;  %v11061_v26 = vld [vmem:[#allocation36_spill] sm:$0xff] }
 0x1f0   : > { %6615 = vrot.lane.b32.xlu0 %v11037_v20, %s7399_s26  ;;  %5629 = vmatprep.subr.bf16.mxu1 %v5628_v28  ;;  %v5652_v31 = vpack.c.bf16 %v7157_v15, %v11045_v4  ;;  %v11046_v20 = vld [vmem:[#allocation84_spill] sm:$0xff] }
 0x1f1   : > { %5545 = vmatmul.mubr.msk.f32.vlgmr.msra.gmra.mrb[6].mxu1 %vm1202_vm7, %v8548_v23  ;;  %v8824_v54 = vpop.permute.xlu1 %6395  ;;  %v2097_v41 = vsel %vm2075_vm9, %v6378_v48, %v10858_v43  ;;  %v11059_v48 = vpack.c.bf16 %v11057_v42, %v11058_v22  ;;  %v8937_v4 = vld [vmem:[#allocation2 + $0x18] sm:$0xff]  ;;  %v11072_v22 = vld [vmem:[#allocation77_spill] sm:$0xff]  ;;  %v6332_v43 = vunpack.i.l.bf16 %v8679_v45 }
 0x1f2   : > { %5631 = vmatpush1.bf16.msra.mxu1 %v5630_v24  ;;  %v8827_v56 = vpop.permute.xlu0 %6390  ;;  %1554 = vmatprep.mubr.f32.mxu1 %v10987_v30  ;;  %v5654_v24 = vpack.c.bf16 %v7158_v27, %v11046_v20  ;;  %11069 = vst [vmem:[#allocation41_spill] sm:$0xff] %v8937_v4  ;;  %v8943_v20 = vld [vmem:[#allocation2 + $0x80] sm:$0xff]  ;;  %v6333_v27 = vunpack.i.h.bf16 %v8679_v45 }
 0x1f3   : > { %5633 = vmatprep.subr.bf16.mxu1 %v5632_v38  ;;  %6630 = vrot.lane.b32.xlu1 %v11038_v21, %s7399_s26  ;;  %v11051_v38 = vpack.c.bf16 %v11049_v50, %v11050_v29  ;;  %v11053_v21 = vld [vmem:[#allocation14_spill] sm:$0xff]  ;;  %v8950_v50 = vld [vmem:[#allocation2 + $0x78] sm:$0xff]  ;;  %v8952_v29 = vld [vmem:[#allocation2 + $0x70] sm:$0xff] }
 0x1f4   : > { %6625 = vrot.lane.b32.xlu0 %v11039_v2, %s7399_s26  ;;  %v11055_v2 = vld [vmem:[#allocation74_spill] sm:$0xff] }
 0x1f5   : > { %v8845_v6 = vpop.permute.xlu1 %6405 }
 0x1f6   : > { %5635 = vmatpush1.bf16.msra.mxu1 %v5634_v33  ;;  %v10859_v1 = vunpack.i.h.bf16 %v8845_v6  ;;  %v6407_v32 = vunpack.i.l.bf16 %v8845_v6  ;;  %v8849_v16 = vpop.permute.xlu0 %6400  ;;  %v11056_v33 = vld [vmem:[#allocation73_spill] sm:$0xff] }
 0x1f7   : > { %11040 = vst [vmem:[#allocation82_spill] sm:$0xff] %v8849_v16  ;;  %v6403_v39 = vunpack.i.h.bf16 %v8849_v16  ;;  %5637 = vmatprep.subr.bf16.mxu1 %v5636_v0  ;;  %6640 = vrot.lane.b32.xlu1 %v11041_v35, %s7399_s26  ;;  %v11063_v35 = vld [vmem:[#allocation76_spill] sm:$0xff]  ;;  %v11098_v16 = vunpack.i.l.bf16 %v8649_v8 }
 0x1f8   : > { %6635 = vrot.lane.b32.xlu0 %v11042_v52, %s7399_s26  ;;  %v2107_v9 = vsel %vm2075_vm9, %v6407_v32, %v10859_v1  ;;  %v8920_v52 = vld [vmem:[#allocation2 + $0x58] sm:$0xff]  ;;  %v11079_v1 = vld [vmem:[#allocation18_spill] sm:$0xff] }
 0x1f9   : > { %v2106_v25 = vsel %vm2075_vm9, %v6403_v39, %v6407_v32  ;;  %v8867_v60 = vpop.permute.xlu1 %6415  ;;  %v5704_v10 = vpack.c.bf16 %v2107_v9, %v2097_v41  ;;  %v11060_v32 = vld [vmem:[#allocation49_spill] sm:$0xff]  ;;  %v11064_v41 = vld [vmem:[#allocation75_spill] sm:$0xff] }
 0x1fa   : > { %5639 = vmatpush1.bf16.msra.mxu1 %v5638_v5  ;;  %v8869_v34 = vpop.permute.xlu0 %6410  ;;  %v5706_v28 = vpack.c.bf16 %v2106_v25, %v2096_v49  ;;  %v11062_v39 = vpack.c.bf16 %v11060_v32, %v11061_v26  ;;  %v8922_v5 = vld [vmem:[#allocation2 + $0x68] sm:$0xff]  ;;  %v3254_v32 = vld [vmem:[#allocation2 + $0x20] sm:$0xff] }
 0x1fb   : > { %1502 = vmatprep.subr.mxu1 %v1131_v19  ;;  %2718 = vrot.lane.b32.xlu1 %v11043_v59, %s7399_s26  ;;  %v8929_v49 = vld [vmem:[#allocation2 + $0x88] sm:$0xff]  ;;  %v7159_v19 = vld [vmem:[#allocation2 + $0x98] sm:$0xff] }
 0x1fc   : > { %6645 = vrot.lane.b32.xlu0 %v11044_v11, %s7399_s26  ;;  %5705 = vmatprep.subr.bf16.mxu0 %v5704_v10  ;;  %v8933_v10 = vld [vmem:[#allocation2 + $0xa8] sm:$0xff]  ;;  %v7160_v11 = vld [vmem:[#allocation2 + $0x90] sm:$0xff] }
 0x1fd   : > { %5707 = vmatpush1.bf16.msra.mxu0 %v5706_v28  ;;  %v8881_v18 = vpop.permute.xlu1 %6425  ;;  %v11067_v28 = vld [vmem:[#allocation87_spill] sm:$0xff]  ;;  %v8971_v26 = vld [vmem:[#allocation2 + $0x8] sm:$0xff] }
 0x1fe   : > { %1503 = vmatpush1.msra.mxu1 %v1130_v61  ;;  %v8884_v62 = vpop.permute.xlu0 %6420  ;;  %v5676_v59 = vpack.c.bf16 %v7159_v19, %v11067_v28  ;;  %v11068_v61 = vld [vmem:[#allocation86_spill] sm:$0xff]  ;;  %11073 = vst [vmem:[#allocation47_spill] sm:$0xff] %v8971_v26  ;;  %v8984_v28 = vld [vmem:[#allocation2 + $0xd0] sm:$0xff] }
 0x1ff   : > { %5653 = vmatprep.subr.bf16.mxu1 %v5652_v31  ;;  %5546 = vmatmul.mubr.msk.f32.vlgmr.msra.gmra.mrb[8].mxu1 %vm1202_vm7, %v8548_v23  ;;  %v11054_v23 = vpack.c.bf16 %v11052_v37, %v11053_v21  ;;  %v5678_v15 = vpack.c.bf16 %v7160_v11, %v11068_v61  ;;  %v8939_v31 = vld [vmem:[#allocation2 + $0x10] sm:$0xff]  ;;  %v8956_v37 = vld [vmem:[#allocation2 + $0xa0] sm:$0xff]  ;;  %11074 = vst [vmem:[#allocation83_spill] sm:$0xff] %v8984_v28  ;;  %v8990_v61 = vld [vmem:[#allocation2 + $0xb8] sm:$0xff] }
 0x200   : > { %5655 = vmatpush1.bf16.msra.mxu1 %v5654_v24  ;;  %2722 = vrot.lane.b32.xlu1 %v11047_v40, %s7399_s26  ;;  %11070 = vst [vmem:[#allocation88_spill] sm:$0xff] %v8939_v31  ;;  %v11071_v24 = vld [vmem:[#allocation78_spill] sm:$0xff]  ;;  %v8958_v21 = vld [vmem:[#allocation2 + $0x90] sm:$0xff]  ;;  %v6649_v19 = vpack.i.bf16 %v8939_v31, %v8971_v26  ;;  %11076 = vst [vmem:[#allocation53_spill] sm:$0xff] %v8990_v61 }
 0x201   : > { %2720 = vrot.lane.b32.xlu0 %v11048_v3, %s7399_s26  ;;  %5657 = vmatprep.subr.bf16.mxu1 %v11051_v38  ;;  %v8896_v51 = vpop.permute.xlu1 %6435  ;;  %v6337_v3 = vunpack.i.l.bf16 %v8674_v12  ;;  %v9037_v61 = vld [vmem:[#allocation2 + $0x28] sm:$0xff] }
 0x202   : > { %v8898_v36 = vpop.permute.xlu0 %6430  ;;  %1699 = vmatprep.mubr.f32.mxu1 %v10987_v30  ;;  %v11083_v26 = vunpack.i.l.bf16 %v8896_v51  ;;  %11090 = vst [vmem:[#allocation66_spill] sm:$0xff] %v9037_v61 }
 0x203   : > { %v6432_v42 = vunpack.i.l.bf16 %v8898_v36 }
 0x204   : > { %5659 = vmatpush1.bf16.msra.mxu1 %v11054_v23  ;;  %2726 = vrot.lane.b32.xlu1 %v11055_v2, %s7399_s26  ;;  %v8960_v23 = vld [vmem:[#allocation2 + $0x98] sm:$0xff]  ;;  %v11082_v2 = vld [vmem:[#allocation79_spill] sm:$0xff] }
 0x205   : > { %2724 = vrot.lane.b32.xlu0 %v11056_v33, %s7399_s26  ;;  %5661 = vmatprep.subr.bf16.mxu1 %v11059_v48  ;;  %v8911_v55 = vpop.permute.xlu1 %6445 }
 0x206   : > { %v8913_v0 = vpop.permute.xlu0 %6440 }
 0x208   : > { %5663 = vmatpush1.bf16.msra.mxu1 %v11062_v39  ;;  %2730 = vrot.lane.b32.xlu1 %v11063_v35, %s7399_s26  ;;  %v8975_v35 = vld [vmem:[#allocation6] sm:$0xff] }
 0x209   : > { %2728 = vrot.lane.b32.xlu0 %v11064_v41, %s7399_s26  ;;  %1647 = vmatprep.subr.mxu1 %v11056_v33  ;;  %v8927_v9 = vpop.permute.xlu1 %6455  ;;  %v6433_v33 = vunpack.i.h.bf16 %v8898_v36  ;;  %v6654_v36 = vpack.i.bf16 %v3254_v32, %v8937_v4 }
 0x20a   : > { %11065 = vst [vmem:[#allocation44_spill] sm:$0xff] %v8927_v9  ;;  %v8931_v25 = vpop.permute.xlu0 %6450  ;;  %v6458_v32 = vunpack.i.h.bf16 %v8927_v9  ;;  %v9030_v9 = vld [vmem:[#allocation2 + $0x50] sm:$0xff] }
 0x20b   : > { %11066 = vst [vmem:[#allocation81_spill] sm:$0xff] %v8931_v25  ;;  %v2116_v63 = vsel %vm2075_vm9, %v6432_v42, %v6433_v33  ;;  %v2117_v45 = vsel %vm2075_vm9, %v6433_v33, %v11083_v26  ;;  %v6358_v42 = vunpack.i.h.bf16 %v8730_v57  ;;  %v6342_v26 = vunpack.i.l.bf16 %v8706_v17  ;;  %v11087_v25 = vld [vmem:[#allocation25_spill] sm:$0xff]  ;;  %v11096_v33 = vld [vmem:[#allocation42_spill] sm:$0xff] }
 0x20c   : > { %1648 = vmatpush1.msra.mxu1 %v11047_v40  ;;  %2734 = vrot.lane.b32.xlu1 %v11071_v24, %s7399_s26  ;;  %v8992_v24 = vld [vmem:[#allocation2 + $0xb0] sm:$0xff]  ;;  %v6328_v40 = vunpack.i.h.bf16 %v8649_v8  ;;  %v6412_v8 = vunpack.i.l.bf16 %v8869_v34 }
 0x20d   : > { %2732 = vrot.lane.b32.xlu0 %v11072_v22, %s7399_s26  ;;  %5677 = vmatprep.subr.bf16.mxu1 %v5676_v59  ;;  %v8969_v48 = vpop.permute.xlu1 %6465  ;;  %v8986_v59 = vld [vmem:[#allocation2 + $0xc8] sm:$0xff]  ;;  %11077 = vst [vmem:[#allocation50_spill] sm:$0xff] %v8992_v24  ;;  %v11078_v22 = vld [vmem:[#allocation28_spill] sm:$0xff]  ;;  %v3258_v24 = vld [vmem:[#allocation2 + $0x40] sm:$0xff] }
 0x20e   : > { %5548 = vmatmul.mubr.msk.f32.vlgmr.msra.gmra.mrb[2].mxu1 %vm1202_vm7, %v8975_v35  ;;  %v8979_v41 = vpop.permute.xlu0 %6460  ;;  %11075 = vst [vmem:[#allocation46_spill] sm:$0xff] %v8986_v59  ;;  %v11080_v7 = vpack.c.bf16 %v11078_v22, %v11079_v1  ;;  %v9022_v1 = vld [vmem:[#allocation2 + $0x38] sm:$0xff]  ;;  %v9024_v22 = vld [vmem:[#allocation2 + $0x30] sm:$0xff] }
 0x20f   : > { %5679 = vmatpush1.bf16.msra.mxu1 %v5678_v15  ;;  %v6462_v38 = vunpack.i.l.bf16 %v8979_v41  ;;  %1841 = vmatprep.mubr.f32.mxu1 %v10987_v30  ;;  %v11081_v15 = vld [vmem:[#allocation80_spill] sm:$0xff]  ;;  %v11084_v4 = vunpack.i.h.bf16 %v8979_v41  ;;  %11085 = vst [vmem:[#allocation61_spill] sm:$0xff] %v9022_v1  ;;  %11086 = vst [vmem:[#allocation56_spill] sm:$0xff] %v9024_v22  ;;  %v9039_v59 = vld [vmem:[#allocation2 + $0xf0] sm:$0xff] }
 0x210   : > { %5681 = vmatprep.subr.bf16.mxu1 %v11080_v7  ;;  %2738 = vrot.lane.b32.xlu1 %v11081_v15, %s7399_s26  ;;  %11091 = vst [vmem:[#allocation64_spill] sm:$0xff] %v9039_v59  ;;  %v3259_v59 = vld [vmem:[#allocation2 + $0x48] sm:$0xff] }
 0x211   : > { %v2126_v39 = vsel %vm2075_vm9, %v6458_v32, %v6462_v38  ;;  %2736 = vrot.lane.b32.xlu0 %v11082_v2, %s7399_s26  ;;  %v9014_v11 = vpop.permute.xlu1 %6475  ;;  %v2127_v7 = vsel %vm2075_vm9, %v6462_v38, %v11084_v4  ;;  %v6357_v32 = vunpack.i.l.bf16 %v8730_v57  ;;  %v11088_v4 = vld [vmem:[#allocation17_spill] sm:$0xff]  ;;  %v9041_v57 = vld [vmem:[#allocation2 + $0xe8] sm:$0xff]  ;;  %s7304_s26 = scalar_lea.vmem %s7303_s4, 2560 }
 0x212   : > { %v9028_v15 = vpop.permute.xlu0 %6470  ;;  %v5708_v2 = vpack.c.bf16 %v2127_v7, %v2117_v45  ;;  %v5710_v31 = vpack.c.bf16 %v2126_v39, %v2116_v63  ;;  %v11089_v38 = vpack.c.bf16 %v11087_v25, %v11088_v4  ;;  %11092 = vst [vmem:[#allocation85_spill] sm:$0xff] %v9041_v57  ;;  %v9045_v39 = vld [vmem:[#allocation2 + $0xd8] sm:$0xff]  ;;  %v9047_v45 = vld [vmem:[#allocation2 + $0xe0] sm:$0xff]  ;;  %v6362_v4 = vunpack.i.l.bf16 %v8769_v13  ;;  %p7306_p13 = scmp.lt.s32.totalorder %s7304_s26, %s7298_s10 }
 0x213   : > { %11093 = vst [vmem:[#allocation84_spill] sm:$0xff] %v9045_v39  ;;  %11094 = vst [vmem:[#allocation70_spill] sm:$0xff] %v9047_v45  ;;  %v6664_v63 = vpack.i.bf16 %v3258_v24, %v9022_v1  ;;  %v6659_v57 = vpack.i.bf16 %v9024_v22, %v9037_v61  ;;  %v2078_v7 = vsel %vm2075_vm9, %v11098_v16, %v6328_v40  ;;  %v11099_v25 = vunpack.i.h.bf16 %v8674_v12  ;;  %v11104_v61 = vld [vmem:[#allocation40_spill] sm:$0xff] }
 0x214   : > { %5683 = vmatpush1.bf16.msra.mxu1 %v11089_v38  ;;  %v11095_v38 = vld [vmem:[#allocation58_spill] sm:$0xff]  ;;  %6655 = vrot.lane.b32.xlu1 %v6654_v36, %s7400_s27  ;;  %v6669_v36 = vpack.i.bf16 %v9030_v9, %v3259_v59  ;;  %v9071_v24 = vsel %vm2075_vm9, %v6332_v43, %v6333_v27  ;;  %v2090_v22 = vsel %vm2075_vm9, %v6358_v42, %v6362_v4  ;;  %v6387_v45 = vunpack.i.l.bf16 %v8803_v46  ;;  %p7307_p0 = por %p7306_p13, %p7305_p12 }
 0x215   : > { %v11097_v28 = vpack.c.bf16 %v11095_v38, %v11096_v33  ;;  %v9066_v39 = vsel %vm2075_vm9, %v6337_v3, %v11099_v25  ;;  %6650 = vrot.lane.b32.xlu0 %v6649_v19, %s7400_s27  ;;  %5709 = vmatprep.subr.bf16.mxu0 %v5708_v2  ;;  %v6413_v33 = vunpack.i.h.bf16 %v8869_v34  ;;  %v2089_v38 = vsel %vm2075_vm9, %v6357_v32, %v6358_v42  ;;  %v11103_v59 = vld [vmem:[#allocation54_spill] sm:$0xff] }
 0x216   : > { %5711 = vmatpush1.bf16.msra.mxu0 %v5710_v31  ;;  %v9075_v16 = vpop.permute.xlu0 %6480  ;;  %v11101_v25 = vunpack.i.h.bf16 %v8706_v17  ;;  %v11102_v2 = vunpack.i.h.bf16 %v8736_v14  ;;  %v11105_v1 = vpack.c.bf16 %v11103_v59, %v11104_v61  ;;  %v2079_v34 = vsel %vm2075_vm9, %v6328_v40, %v6332_v43  ;;  %p7308_p5 = pnand %p7307_p0, %p7301_p8 }
 0x217   : > { %5685 = vmatprep.subr.bf16.mxu1 %v11097_v28  ;;  %v2054_v28 = vpop.permute.xlu1 %2053  ;;  %11100 = vst [vmem:[#allocation69_spill] sm:$0xff] %v9075_v16  ;;  %v2081_v31 = vsel %vm2075_vm9, %v6333_v27, %v6337_v3  ;;  %v6383_v16 = vunpack.i.h.bf16 %v8807_v58  ;;  %v11106_v14 = vunpack.i.h.bf16 %v8769_v13  ;;  %v6418_v61 = vunpack.i.h.bf16 %v8867_v60 }
 0x218   : > { %v9081_v19 = vsel %vm2075_vm9, %v6342_v26, %v11101_v25  ;;  %v2088_v9 = vsel %vm2075_vm9, %v11102_v2, %v6357_v32  ;;  %5687 = vmatpush1.bf16.msra.mxu1 %v11105_v1  ;;  %v7174_v25 = vld [vmem:[#allocation2 + $0x278] sm:$0xff]  ;;  %6665 = vrot.lane.b32.xlu1 %v6664_v63, %s7400_s27  ;;  %v6417_v43 = vunpack.i.l.bf16 %v8867_v60  ;;  %v5712_v3 = vpack.c.bf16 %v2089_v38, %v2079_v34 }
 0x219   : > { %1789 = vmatprep.subr.mxu1 %v7174_v25  ;;  %v2091_v32 = vsel %vm2075_vm9, %v6362_v4, %v11106_v14  ;;  %6660 = vrot.lane.b32.xlu0 %v6659_v57, %s7400_s27  ;;  %v11107_v40 = vunpack.i.h.bf16 %v8674_v12  ;;  %v6468_v42 = vunpack.i.h.bf16 %v8969_v48  ;;  %v6467_v63 = vunpack.i.l.bf16 %v8969_v48  ;;  %v7175_v14 = vld [vmem:[#allocation2 + $0x270] sm:$0xff] }
 0x21a   : > { %v2056_v2 = vpop.permute.xlu0 %2055  ;;  %v5714_v4 = vpack.c.bf16 %v2088_v9, %v2078_v7  ;;  %v2109_v59 = vsel %vm2075_vm9, %v6412_v8, %v6413_v33  ;;  %v6392_v25 = vunpack.i.l.bf16 %v8827_v56  ;;  %v5724_v38 = vpack.c.bf16 %v2091_v32, %v2081_v31  ;;  %v9135_v32 = vld [vmem:[#allocation6 + $0x10] sm:$0xff] }
 0x21b   : > { %v9101_v27 = vpop.permute.xlu1 %2057  ;;  %v9106_v1 = vsel %vm2075_vm9, %v11107_v40, %v6342_v26  ;;  %v5726_v12 = vpack.c.bf16 %v2090_v22, %v9071_v24  ;;  %v11108_v26 = vunpack.i.h.bf16 %v8845_v6  ;;  %v6442_v40 = vunpack.i.l.bf16 %v8913_v0 }
 0x21c   : > { %1790 = vmatpush1.msra.mxu1 %v7175_v14  ;;  %v2137_v57 = vsel %vm2075_vm9, %v2056_v2, %v9101_v27  ;;  %v2099_v7 = vsel %vm2075_vm9, %v6383_v16, %v6387_v45  ;;  %v2136_v9 = vsel %vm2075_vm9, %v2054_v28, %v2056_v2  ;;  %v6388_v31 = vunpack.i.h.bf16 %v8803_v46 }
 0x21d   : > { %v2108_v34 = vsel %vm2075_vm9, %v11108_v26, %v6412_v8  ;;  %5713 = vmatprep.subr.bf16.mxu1 %v5712_v3  ;;  %5550 = vmatmul.mubr.msk.f32.vlgmr.msra.gmra.mrb[6].mxu1 %vm1202_vm7, %v8975_v35  ;;  %v11109_v22 = vunpack.i.l.bf16 %v8807_v58  ;;  %v11110_v24 = vpack.i.bf16 %v8922_v5, %v8920_v52  ;;  %v5716_v8 = vpack.c.bf16 %v2109_v59, %v2099_v7 }
 0x21e   : > { %5715 = vmatpush1.bf16.msra.mxu1 %v5714_v4  ;;  %v2111_v28 = vsel %vm2075_vm9, %v6417_v43, %v6418_v61  ;;  %v6438_v3 = vunpack.i.h.bf16 %v8896_v51  ;;  %v6473_v58 = vunpack.i.h.bf16 %v9028_v15  ;;  %6670 = vrot.lane.b32.xlu0 %v6669_v36, %s7400_s27  ;;  %v2060_v52 = vpop.permute.xlu0 %2059  ;;  %v2129_v2 = vsel %vm2075_vm9, %v6467_v63, %v6468_v42 }
 0x21f   : > { %v2098_v6 = vsel %vm2075_vm9, %v11109_v22, %v6383_v16  ;;  %6675 = vrot.lane.b32.xlu1 %v11110_v24, %s7400_s27  ;;  %v9133_v35 = vpop.permute.xlu1 %2061  ;;  %v6472_v16 = vunpack.i.l.bf16 %v9028_v15  ;;  %2231 = vmatprep.subr.mxu0 %v2137_v57  ;;  %v6347_v4 = vunpack.i.l.bf16 %v8695_v47  ;;  %v2110_v59 = vsel %vm2075_vm9, %v6413_v33, %v6417_v43 }
 0x220   : > { %5717 = vmatprep.subr.bf16.mxu1 %v5716_v8  ;;  %2232 = vmatpush1.msra.mxu0 %v2136_v9  ;;  %v5718_v14 = vpack.c.bf16 %v2108_v34, %v2098_v6  ;;  %v2101_v26 = vsel %vm2075_vm9, %v6388_v31, %v6392_v25  ;;  %v6447_v7 = vunpack.i.l.bf16 %v8911_v55  ;;  %v6443_v36 = vunpack.i.h.bf16 %v8913_v0 }
 0x221   : > { %v11111_v57 = vunpack.i.h.bf16 %v8979_v41  ;;  %5725 = vmatprep.subr.bf16.mxu0 %v5724_v38  ;;  %5552 = vmatmul.mubr.msk.f32.vlgmr.msra.gmra.mrb[0].mxu0 %vm1202_vm7, %v9135_v32  ;;  %v2119_v47 = vsel %vm2075_vm9, %v6438_v3, %v6442_v40  ;;  %v6368_v33 = vunpack.i.h.bf16 %v8757_v53  ;;  %v6367_v43 = vunpack.i.l.bf16 %v8757_v53 }
 0x222   : > { %5719 = vmatpush1.bf16.msra.mxu1 %v5718_v14  ;;  %5727 = vmatpush1.bf16.msra.mxu0 %v5726_v12  ;;  %v5720_v34 = vpack.c.bf16 %v2129_v2, %v2119_v47  ;;  %v5728_v9 = vpack.c.bf16 %v2111_v28, %v2101_v26  ;;  %v2100_v41 = vsel %vm2075_vm9, %v6387_v45, %v6388_v31  ;;  %v2064_v12 = vpop.permute.xlu0 %2063  ;;  %v6373_v45 = vunpack.i.h.bf16 %v8784_v44 }
 0x223   : > { %v2128_v22 = vsel %vm2075_vm9, %v11111_v57, %v6467_v63  ;;  %v9164_v6 = vpop.permute.xlu1 %2065  ;;  %v11112_v63 = vunpack.i.l.bf16 %v8896_v51  ;;  %v11113_v24 = vpack.i.bf16 %v8929_v49, %v8943_v20  ;;  %v11114_v53 = vpack.i.bf16 %v8950_v50, %v8952_v29  ;;  %2354 = vmatprep.mubr.f32.mxu1 %v10987_v30  ;;  %2425 = vmatprep.mubr.f32.mxu0 %v10987_v30 }
 0x224   : > { %v2131_v46 = vsel %vm2075_vm9, %v6472_v16, %v6473_v58  ;;  %v6372_v51 = vunpack.i.l.bf16 %v8784_v44  ;;  %5721 = vmatprep.subr.bf16.mxu1 %v5720_v34  ;;  %5729 = vmatprep.subr.bf16.mxu0 %v5728_v9  ;;  %v5730_v8 = vpack.c.bf16 %v2110_v59, %v2100_v41  ;;  %v2130_v49 = vsel %vm2075_vm9, %v6468_v42, %v6472_v16  ;;  %v11120_v9 = vld [vmem:[#allocation83_spill] sm:$0xff] }
 0x225   : > { %v2118_v38 = vsel %vm2075_vm9, %v11112_v63, %v6438_v3  ;;  %6685 = vrot.lane.b32.xlu1 %v11113_v24, %s7400_s27  ;;  %6680 = vrot.lane.b32.xlu0 %v11114_v53, %s7400_s27  ;;  %v2121_v20 = vsel %vm2075_vm9, %v6443_v36, %v6447_v7  ;;  %v11115_v50 = vunpack.i.h.bf16 %v8706_v17  ;;  %v6423_v29 = vunpack.i.h.bf16 %v8884_v62 }
 0x226   : > { %v5722_v31 = vpack.c.bf16 %v2128_v22, %v2118_v38  ;;  %v6422_v28 = vunpack.i.l.bf16 %v8884_v62  ;;  %5731 = vmatpush1.bf16.msra.mxu0 %v5730_v8  ;;  %v5732_v48 = vpack.c.bf16 %v2131_v46, %v2121_v20  ;;  %v2093_v3 = vsel %vm2075_vm9, %v6367_v43, %v6368_v33 }
 0x227   : > { %v9196_v44 = vsel %vm2075_vm9, %v11115_v50, %v6347_v4  ;;  %v9200_v42 = vpop.permute.xlu1 %2069  ;;  %v11116_v16 = vunpack.i.h.bf16 %v8769_v13  ;;  %v2120_v17 = vsel %vm2075_vm9, %v6442_v40, %v6443_v36  ;;  %v11117_v4 = vpack.i.bf16 %v8933_v10, %v8956_v37  ;;  %v9219_v13 = vpop.permute.xlu0 %2067 }
 0x228   : > { %5723 = vmatpush1.bf16.msra.mxu1 %v5722_v31  ;;  %v11118_v62 = vpack.i.bf16 %v8960_v23, %v8958_v21  ;;  %v2139_v59 = vsel %vm2075_vm9, %v2060_v52, %v9133_v35  ;;  %v6397_v14 = vunpack.i.l.bf16 %v8824_v54  ;;  %v6393_v0 = vunpack.i.h.bf16 %v8827_v56  ;;  %5733 = vmatprep.subr.bf16.mxu0 %v5732_v48  ;;  %v11127_v48 = vld [vmem:[#allocation69_spill] sm:$0xff]  ;;  %v11132_v56 = vld [vmem:[#allocation70_spill] sm:$0xff] }
 0x229   : > { %v2092_v2 = vsel %vm2075_vm9, %v11116_v16, %v6367_v43  ;;  %6695 = vrot.lane.b32.xlu1 %v11117_v4, %s7400_s27  ;;  %2302 = vmatprep.subr.mxu1 %v2139_v59  ;;  %v5734_v40 = vpack.c.bf16 %v2130_v49, %v2120_v17  ;;  %v2095_v10 = vsel %vm2075_vm9, %v6372_v51, %v6373_v45  ;;  %v6428_v26 = vunpack.i.h.bf16 %v8881_v18  ;;  %v11126_v45 = vld [vmem:[#allocation81_spill] sm:$0xff] }
 0x22a   : > { %6690 = vrot.lane.b32.xlu0 %v11118_v62, %s7400_s27  ;;  %v2094_v37 = vsel %vm2075_vm9, %v6368_v33, %v6372_v51  ;;  %v6427_v21 = vunpack.i.l.bf16 %v8881_v18  ;;  %v2138_v23 = vsel %vm2075_vm9, %v9101_v27, %v2060_v52  ;;  %v6478_v36 = vunpack.i.h.bf16 %v9014_v11  ;;  %v11119_v33 = vld [vmem:[#allocation82_spill] sm:$0xff]  ;;  %v11123_v27 = vld [vmem:[#allocation53_spill] sm:$0xff]  ;;  %v11131_v62 = vld [vmem:[#allocation44_spill] sm:$0xff] }
 0x22b   : > { %v6477_v57 = vunpack.i.l.bf16 %v9014_v11  ;;  %5735 = vmatpush1.bf16.msra.mxu0 %v5734_v40  ;;  %v5736_v22 = vpack.c.bf16 %v2093_v3, %v9106_v1  ;;  %v9232_v47 = vpop.permute.xlu1 %2073  ;;  %v2113_v43 = vsel %vm2075_vm9, %v6422_v28, %v6423_v29  ;;  %v6402_v34 = vunpack.i.l.bf16 %v11119_v33  ;;  %v11121_v18 = vld [vmem:[#allocation46_spill] sm:$0xff]  ;;  %v9247_v24 = vpop.permute.xlu0 %2071  ;;  %v7178_v33 = vld [vmem:[#allocation2 + $0xf8] sm:$0xff]  ;;  %v9325_v11 = vld [vmem:[#allocation2 + $0x130] sm:$0xff] }
 0x22c   : > { %2303 = vmatpush1.msra.mxu1 %v2138_v23  ;;  %v11122_v41 = vpack.i.bf16 %v11120_v9, %v11121_v18  ;;  %v11124_v52 = vld [vmem:[#allocation50_spill] sm:$0xff]  ;;  %v2141_v38 = vsel %vm2075_vm9, %v2064_v12, %v9164_v6  ;;  %v5738_v1 = vpack.c.bf16 %v2092_v2, %v9066_v39  ;;  %v5748_v53 = vpack.c.bf16 %v2095_v10, %v9196_v44  ;;  %v11133_v10 = vld [vmem:[#allocation84_spill] sm:$0xff]  ;;  %v7176_v23 = vld [vmem:[#allocation2 + $0x110] sm:$0xff] }
 0x22d   : > { %v11125_v63 = vpack.i.bf16 %v11123_v27, %v11124_v52  ;;  %v6398_v46 = vunpack.i.h.bf16 %v8824_v54  ;;  %v6452_v51 = vunpack.i.l.bf16 %v11126_v45  ;;  %2373 = vmatprep.subr.mxu0 %v2141_v38  ;;  %5737 = vmatprep.subr.bf16.mxu1 %v5736_v22  ;;  %v2103_v31 = vsel %vm2075_vm9, %v6393_v0, %v6397_v14  ;;  %v7177_v22 = vld [vmem:[#allocation2 + $0x108] sm:$0xff] }
 0x22e   : > { %6705 = vrot.lane.b32.xlu1 %v11122_v41, %s7400_s27  ;;  %v5750_v8 = vpack.c.bf16 %v2094_v37, %v9081_v19  ;;  %v2112_v39 = vsel %vm2075_vm9, %v6418_v61, %v6422_v28  ;;  %5553 = vmatmul.mubr.msk.f32.vlgmr.msra.gmra.mrb[2].mxu1 %vm1202_vm7, %v9135_v32  ;;  %v5740_v49 = vpack.c.bf16 %v2113_v43, %v2103_v31  ;;  %v6448_v44 = vunpack.i.h.bf16 %v8911_v55  ;;  %v11129_v28 = vld [vmem:[#allocation85_spill] sm:$0xff]  ;;  %v7182_v31 = vld [vmem:[#allocation2 + $0x118] sm:$0xff] }
 0x22f   : > { %6700 = vrot.lane.b32.xlu0 %v11125_v63, %s7400_s27  ;;  %v2140_v20 = vsel %vm2075_vm9, %v9133_v35, %v2064_v12  ;;  %v2115_v50 = vsel %vm2075_vm9, %v6427_v21, %v6428_v26  ;;  %v6483_v3 = vunpack.i.h.bf16 %v11127_v48  ;;  %v6482_v16 = vunpack.i.l.bf16 %v11127_v48  ;;  %5739 = vmatpush1.bf16.msra.mxu1 %v5738_v1  ;;  %v9267_v60 = vpop.permute.xlu1 %6490  ;;  %v11128_v12 = vld [vmem:[#allocation64_spill] sm:$0xff]  ;;  %v9280_v17 = vpop.permute.xlu0 %6485 }
 0x230   : > { %2374 = vmatpush1.msra.mxu0 %v2140_v20  ;;  %v2133_v19 = vsel %vm2075_vm9, %v6477_v57, %v6478_v36  ;;  %v2102_v61 = vsel %vm2075_vm9, %v6392_v25, %v6393_v0  ;;  %v2114_v35 = vsel %vm2075_vm9, %v6423_v29, %v6427_v21  ;;  %5741 = vmatprep.subr.bf16.mxu1 %v5740_v49  ;;  %v6457_v59 = vunpack.i.l.bf16 %v11131_v62  ;;  %v7188_v62 = vld [vmem:[#allocation2 + $0x1e8] sm:$0xff] }
 0x231   : > { %v11130_v2 = vpack.i.bf16 %v11128_v12, %v11129_v28  ;;  %v2105_v4 = vsel %vm2075_vm9, %v6398_v46, %v6402_v34  ;;  %v6453_v40 = vunpack.i.h.bf16 %v11126_v45  ;;  %v11134_v25 = vpack.i.bf16 %v11132_v56, %v11133_v10  ;;  %5749 = vmatprep.subr.bf16.mxu0 %v5748_v53  ;;  %5554 = vmatmul.mubr.msk.f32.vlgmr.msra.gmra.mrb[2].mxu0 %vm1202_vm7, %v9135_v32  ;;  %v7179_v34 = vld [vmem:[#allocation2 + $0x100] sm:$0xff]  ;;  %v9321_v53 = vld [vmem:[#allocation2 + $0x138] sm:$0xff] }
 0x232   : > { %v5742_v29 = vpack.c.bf16 %v2112_v39, %v2102_v61  ;;  %v2123_v0 = vsel %vm2075_vm9, %v6448_v44, %v6452_v51  ;;  %v2132_v37 = vsel %vm2075_vm9, %v6473_v58, %v6477_v57  ;;  %v5752_v21 = vpack.c.bf16 %v2115_v50, %v2105_v4  ;;  %2496 = vmatprep.mubr.f32.mxu1 %v10987_v30 }
 0x233   : > { %6715 = vrot.lane.b32.xlu1 %v11130_v2, %s7400_s27  ;;  %6710 = vrot.lane.b32.xlu0 %v11134_v25, %s7400_s27  ;;  %v5744_v26 = vpack.c.bf16 %v2133_v19, %v2123_v0  ;;  %v6724_v43 = vpack.i.bf16 %v7176_v23, %v7177_v22  ;;  %v6719_v41 = vpack.i.bf16 %v7179_v34, %v7178_v33  ;;  %v9298_v27 = vpop.permute.xlu1 %6500  ;;  %v9307_v52 = vpop.permute.xlu0 %6495  ;;  %v6488_v48 = vunpack.i.h.bf16 %v9280_v17  ;;  %v7185_v19 = vld [vmem:[#allocation2 + $0x1f0] sm:$0xff] }
 0x234   : > { %5743 = vmatpush1.bf16.msra.mxu1 %v5742_v29  ;;  %5751 = vmatpush1.bf16.msra.mxu0 %v5750_v8  ;;  %v2135_v15 = vsel %vm2075_vm9, %v6482_v16, %v6483_v3  ;;  %v2104_v58 = vsel %vm2075_vm9, %v6397_v14, %v6398_v46  ;;  %v2122_v57 = vsel %vm2075_vm9, %v6447_v7, %v6448_v44  ;;  %v9319_v7 = vld [vmem:[#allocation2 + $0x128] sm:$0xff]  ;;  %v6492_v44 = vunpack.i.l.bf16 %v9267_v60  ;;  %v9383_v33 = vld [vmem:[#allocation2 + $0x250] sm:$0xff] }
 0x235   : > { %5745 = vmatprep.subr.bf16.mxu1 %v5744_v26  ;;  %5753 = vmatprep.subr.bf16.mxu0 %v5752_v21  ;;  %v5746_v63 = vpack.c.bf16 %v2132_v37, %v2122_v57  ;;  %v5754_v38 = vpack.c.bf16 %v2114_v35, %v2104_v58  ;;  %v2125_v1 = vsel %vm2075_vm9, %v6453_v40, %v6457_v59  ;;  %v6487_v45 = vunpack.i.l.bf16 %v9280_v17 }
 0x236   : > { %v2134_v54 = vsel %vm2075_vm9, %v6478_v36, %v6482_v16  ;;  %v5756_v14 = vpack.c.bf16 %v2135_v15, %v2125_v1  ;;  %2567 = vmatprep.mubr.f32.mxu0 %v10987_v30  ;;  %v2143_v55 = vsel %vm2075_vm9, %v9219_v13, %v9200_v42  ;;  %v6734_v46 = vpack.i.bf16 %v9319_v7, %v9321_v53  ;;  %v7184_v16 = vld [vmem:[#allocation2 + $0x1f8] sm:$0xff] }
 0x237   : > { %6725 = vrot.lane.b32.xlu1 %v6724_v43, %s7400_s27  ;;  %6720 = vrot.lane.b32.xlu0 %v6719_v41, %s7400_s27  ;;  %v6729_v36 = vpack.i.bf16 %v9325_v11, %v7182_v31  ;;  %v9328_v8 = vpop.permute.xlu1 %6510  ;;  %v2124_v39 = vsel %vm2075_vm9, %v6452_v51, %v6453_v40  ;;  %v9333_v49 = vpop.permute.xlu0 %6505  ;;  %v2142_v20 = vsel %vm2075_vm9, %v9164_v6, %v9219_v13  ;;  %v6497_v51 = vunpack.i.l.bf16 %v9307_v52  ;;  %v7186_v6 = vld [vmem:[#allocation2 + $0x198] sm:$0xff]  ;;  %v7187_v13 = vld [vmem:[#allocation2 + $0x190] sm:$0xff] }
 0x238   : > { %5747 = vmatpush1.bf16.msra.mxu1 %v5746_v63  ;;  %5755 = vmatpush1.bf16.msra.mxu0 %v5754_v38  ;;  %v5758_v50 = vpack.c.bf16 %v2134_v54, %v2124_v39  ;;  %v2145_v3 = vsel %vm2075_vm9, %v9247_v24, %v9232_v47  ;;  %v9347_v61 = vpack.i.bf16 %v7184_v16, %v7185_v19  ;;  %v6493_v28 = vunpack.i.h.bf16 %v9267_v60  ;;  %v7189_v47 = vld [vmem:[#allocation2 + $0x188] sm:$0xff]  ;;  %v9395_v38 = vld [vmem:[#allocation2 + $0x258] sm:$0xff]  ;;  %v7191_v54 = vld [vmem:[#allocation2 + $0x1b0] sm:$0xff] }
 0x239   : > { %2444 = vmatprep.subr.mxu1 %v2143_v55  ;;  %5757 = vmatprep.subr.bf16.mxu0 %v5756_v14  ;;  %v9349_v35 = vpack.i.bf16 %v7186_v6, %v7187_v13  ;;  %v9356_v59 = vpack.i.bf16 %v7188_v62, %v7189_v47  ;;  %v6513_v40 = vunpack.i.h.bf16 %v9328_v8  ;;  %v2144_v60 = vsel %vm2075_vm9, %v9200_v42, %v9247_v24  ;;  %v9393_v63 = vld [vmem:[#allocation2 + $0x248] sm:$0xff]  ;;  %v7192_v55 = vld [vmem:[#allocation2 + $0x150] sm:$0xff] }
 0x23a   : > { %v2741_v29 = vsel %vm2740_vm10, %v6487_v45, %v6488_v48  ;;  %v2742_v0 = vsel %vm2740_vm10, %v6488_v48, %v6492_v44  ;;  %v2744_v37 = vsel %vm2740_vm10, %v6493_v28, %v6497_v51  ;;  %v2743_v43 = vsel %vm2740_vm10, %v6492_v44, %v6493_v28  ;;  %v7196_v48 = vld [vmem:[#allocation2 + $0x1b8] sm:$0xff]  ;;  %v7197_v45 = vld [vmem:[#allocation2 + $0x210] sm:$0xff] }
 0x23b   : > { %6735 = vrot.lane.b32.xlu1 %v6734_v46, %s7400_s27  ;;  %6730 = vrot.lane.b32.xlu0 %v6729_v36, %s7400_s27  ;;  %v9351_v12 = vpop.permute.xlu1 %6520  ;;  %v6516_v4 = vpop.permute.xlu0 %6515  ;;  %v7193_v46 = vld [vmem:[#allocation2 + $0x158] sm:$0xff] }
 0x23c   : > { %2445 = vmatpush1.msra.mxu1 %v2142_v20  ;;  %5759 = vmatpush1.bf16.msra.mxu0 %v5758_v50  ;;  %v6523_v2 = vunpack.i.h.bf16 %v9351_v12  ;;  %v6522_v17 = vunpack.i.l.bf16 %v9351_v12  ;;  %v6518_v56 = vunpack.i.h.bf16 %v6516_v4  ;;  %v6517_v25 = vunpack.i.l.bf16 %v6516_v4  ;;  %v7194_v20 = vld [vmem:[#allocation2 + $0x1a8] sm:$0xff]  ;;  %v7195_v50 = vld [vmem:[#allocation2 + $0x218] sm:$0xff] }
 0x23d   : > { %2515 = vmatprep.subr.mxu0 %v2145_v3  ;;  %5555 = vmatmul.mubr.msk.f32.vlgmr.msra.gmra.mrb[6].mxu1 %vm1202_vm7, %v9135_v32  ;;  %v6754_v31 = vpack.i.bf16 %v7193_v46, %v7192_v55  ;;  %v6769_v44 = vpack.i.bf16 %v7194_v20, %v7195_v50  ;;  %v6764_v3 = vpack.i.bf16 %v7197_v45, %v7196_v48  ;;  %v7199_v4 = vld [vmem:[#allocation2 + $0x208] sm:$0xff]  ;;  %v7201_v55 = vld [vmem:[#allocation2 + $0x1d0] sm:$0xff] }
 0x23e   : > { %v2754_v26 = vsel %vm2740_vm10, %v6522_v17, %v6523_v2  ;;  %3019 = vmatprep.mubr.f32.mxu1 %v10987_v30  ;;  %v2753_v21 = vsel %vm2740_vm10, %v6518_v56, %v6522_v17  ;;  %v2751_v42 = vsel %vm2740_vm10, %v6513_v40, %v6517_v25  ;;  %v2752_v23 = vsel %vm2740_vm10, %v6517_v25, %v6518_v56  ;;  %v7198_v17 = vld [vmem:[#allocation2 + $0x170] sm:$0xff] }
 0x23f   : > { %6745 = vrot.lane.b32.xlu1 %v9347_v61, %s7400_s27  ;;  %6740 = vrot.lane.b32.xlu0 %v9349_v35, %s7400_s27  ;;  %v9379_v24 = vpop.permute.xlu1 %6530  ;;  %v5772_v22 = vpack.c.bf16 %v2754_v26, %v2744_v37  ;;  %v9385_v34 = vpop.permute.xlu0 %6525  ;;  %v5760_v41 = vpack.c.bf16 %v2752_v23, %v2742_v0  ;;  %v5762_v15 = vpack.c.bf16 %v2751_v42, %v2741_v29  ;;  %v9414_v40 = vld [vmem:[#allocation2 + $0x270] sm:$0xff] }
 0x240   : > { %2516 = vmatpush1.msra.mxu0 %v2144_v60  ;;  %v5774_v58 = vpack.c.bf16 %v2753_v21, %v2743_v43  ;;  %v6774_v62 = vpack.i.bf16 %v7198_v17, %v7199_v4  ;;  %v7205_v4 = vld [vmem:[#allocation2 + $0x1c8] sm:$0xff] }
 0x241   : > { %5556 = vmatmul.mubr.msk.f32.vlgmr.msra.gmra.mrb[4].mxu0 %vm1202_vm7, %v9135_v32  ;;  %5761 = vmatprep.subr.bf16.mxu0 %v5760_v41  ;;  %v7190_v32 = vld [vmem:[#allocation2 + $0x148] sm:$0xff] }
 0x242   : > { %5773 = vmatprep.subr.bf16.mxu1 %v5772_v22  ;;  %5763 = vmatpush1.bf16.msra.mxu0 %v5762_v15  ;;  %v6759_v14 = vpack.i.bf16 %v7191_v54, %v7190_v32  ;;  %v9429_v41 = vld [vmem:[#allocation2 + $0x268] sm:$0xff]  ;;  %v9431_v15 = vld [vmem:[#allocation2 + $0x278] sm:$0xff] }
 0x243   : > { %3539 = vrot.lane.b32.xlu1 %v9383_v33, %s7400_s27  ;;  %6750 = vrot.lane.b32.xlu0 %v9356_v59, %s7400_s27  ;;  %v6541_v57 = vpop.permute.xlu1 %6540  ;;  %v9397_v1 = vpop.permute.xlu0 %6535 }
 0x244   : > { %5775 = vmatpush1.bf16.msra.mxu1 %v5774_v58  ;;  %2948 = vmatprep.mubr.f32.mxu0 %v10987_v30  ;;  %v6543_v6 = vunpack.i.h.bf16 %v6541_v57  ;;  %v6542_v13 = vunpack.i.l.bf16 %v6541_v57 }
 0x246   : > { %v2761_v0 = vsel %vm2740_vm10, %v6542_v13, %v6543_v6 }
 0x247   : > { %3537 = vrot.lane.b32.xlu1 %v9393_v63, %s7400_s27  ;;  %3541 = vrot.lane.b32.xlu0 %v9395_v38, %s7400_s27  ;;  %v9404_v36 = vpop.permute.xlu1 %6550  ;;  %v6546_v39 = vpop.permute.xlu0 %6545 }
 0x248   : > { %v6547_v28 = vunpack.i.l.bf16 %v6546_v39  ;;  %v10885_v21 = vunpack.i.l.bf16 %v9404_v36  ;;  %v6548_v42 = vunpack.i.h.bf16 %v6546_v39  ;;  %v7203_v39 = vld [vmem:[#allocation2 + $0x168] sm:$0xff] }
 0x24a   : > { %v2762_v37 = vsel %vm2740_vm10, %v6543_v6, %v6547_v28  ;;  %v2763_v50 = vsel %vm2740_vm10, %v6547_v28, %v6548_v42  ;;  %v2764_v45 = vsel %vm2740_vm10, %v6548_v42, %v10885_v21  ;;  %v7204_v28 = vld [vmem:[#allocation2 + $0x228] sm:$0xff]  ;;  %v9461_v42 = vld [vmem:[#allocation2 + $0x290] sm:$0xff] }
 0x24b   : > { %6760 = vrot.lane.b32.xlu1 %v6759_v14, %s7400_s27  ;;  %6755 = vrot.lane.b32.xlu0 %v6754_v31, %s7400_s27  ;;  %v9408_v16 = vpop.permute.xlu1 %6560  ;;  %v9410_v19 = vpop.permute.xlu0 %6555  ;;  %v7200_v14 = vld [vmem:[#allocation2 + $0x1d8] sm:$0xff] }
 0x24c   : > { %v6784_v46 = vpack.i.bf16 %v7200_v14, %v7201_v55  ;;  %v7202_v31 = vld [vmem:[#allocation2 + $0x178] sm:$0xff] }
 0x24d   : > { %v6779_v20 = vpack.i.bf16 %v7203_v39, %v7202_v31 }
 0x24f   : > { %6770 = vrot.lane.b32.xlu1 %v6769_v44, %s7400_s27  ;;  %6765 = vrot.lane.b32.xlu0 %v6764_v3, %s7400_s27  ;;  %v6571_v47 = vpop.permute.xlu1 %6570  ;;  %v9416_v25 = vpop.permute.xlu0 %6565 }
 0x250   : > { %v6573_v60 = vunpack.i.h.bf16 %v6571_v47  ;;  %v6572_v56 = vunpack.i.l.bf16 %v6571_v47  ;;  %v6568_v29 = vunpack.i.h.bf16 %v9416_v25  ;;  %v7206_v47 = vld [vmem:[#allocation2 + $0x238] sm:$0xff] }
 0x252   : > { %v2772_v26 = vsel %vm2740_vm10, %v6572_v56, %v6573_v60  ;;  %v2771_v23 = vsel %vm2740_vm10, %v6568_v29, %v6572_v56 }
 0x253   : > { %3547 = vrot.lane.b32.xlu1 %v9414_v40, %s7400_s27  ;;  %6775 = vrot.lane.b32.xlu0 %v6774_v62, %s7400_s27  ;;  %v9427_v22 = vpop.permute.xlu1 %6580  ;;  %v5764_v43 = vpack.c.bf16 %v2772_v26, %v2762_v37  ;;  %v9433_v58 = vpop.permute.xlu0 %6575  ;;  %v5766_v57 = vpack.c.bf16 %v2771_v23, %v2761_v0  ;;  %v6794_v62 = vpack.i.bf16 %v7204_v28, %v7205_v4  ;;  %v9459_v26 = vld [vmem:[#allocation2 + $0x298] sm:$0xff] }
 0x254   : > { %v6578_v32 = vunpack.i.h.bf16 %v9433_v58  ;;  %v6577_v54 = vunpack.i.l.bf16 %v9433_v58 }
 0x255   : > { %5765 = vmatprep.subr.bf16.mxu0 %v5764_v43  ;;  %v11135_v43 = vld [vmem:[#allocation88_spill] sm:$0xff] }
 0x256   : > { %v2773_v44 = vsel %vm2740_vm10, %v6573_v60, %v6577_v54  ;;  %5767 = vmatpush1.bf16.msra.mxu0 %v5766_v57  ;;  %v2774_v3 = vsel %vm2740_vm10, %v6577_v54, %v6578_v32  ;;  %v7207_v60 = vld [vmem:[#allocation2 + $0x230] sm:$0xff]  ;;  %v11136_v57 = vld [vmem:[#allocation41_spill] sm:$0xff] }
 0x257   : > { %3545 = vrot.lane.b32.xlu1 %v9429_v41, %s7400_s27  ;;  %3549 = vrot.lane.b32.xlu0 %v9431_v15, %s7400_s27  ;;  %v9443_v48 = vpop.permute.xlu1 %6590  ;;  %v9451_v6 = vpop.permute.xlu0 %6585  ;;  %v5776_v13 = vpack.c.bf16 %v2774_v3, %v2764_v45  ;;  %v5778_v17 = vpack.c.bf16 %v2773_v44, %v2763_v50  ;;  %v6789_v56 = vpack.i.bf16 %v7206_v47, %v7207_v60  ;;  %v11138_v44 = vld [vmem:[#allocation47_spill] sm:$0xff] }
 0x258   : > { %v6799_v54 = vpack.i.bf16 %v11136_v57, %v11135_v43  ;;  %v6809_v45 = vpack.i.bf16 %v8922_v5, %v11138_v44  ;;  %v6814_v47 = vpack.i.bf16 %v11133_v10, %v11120_v9 }
 0x259   : > { %5777 = vmatprep.subr.bf16.mxu1 %v5776_v13 }
 0x25a   : > { %5779 = vmatpush1.bf16.msra.mxu1 %v5778_v17  ;;  %v9483_v17 = vld [vmem:[#allocation2 + $0x288] sm:$0xff] }
 0x25b   : > { %6785 = vrot.lane.b32.xlu1 %v6784_v46, %s7400_s27  ;;  %6780 = vrot.lane.b32.xlu0 %v6779_v20, %s7400_s27  ;;  %v6601_v29 = vpop.permute.xlu1 %6600  ;;  %v6596_v0 = vpop.permute.xlu0 %6595  ;;  %v11137_v46 = vld [vmem:[#allocation12_spill] sm:$0xff] }
 0x25c   : > { %v6602_v31 = vunpack.i.l.bf16 %v6601_v29  ;;  %v6598_v39 = vunpack.i.h.bf16 %v6596_v0  ;;  %v6597_v20 = vunpack.i.l.bf16 %v6596_v0  ;;  %v6603_v13 = vunpack.i.h.bf16 %v6601_v29 }
 0x25d   : > { %v6819_v29 = vpack.i.bf16 %v9321_v53, %v9325_v11 }
 0x25e   : > { %v2781_v0 = vsel %vm2740_vm10, %v6597_v20, %v6598_v39  ;;  %v2782_v43 = vsel %vm2740_vm10, %v6598_v39, %v6602_v31  ;;  %v2783_v20 = vsel %vm2740_vm10, %v6602_v31, %v6603_v13  ;;  %v9517_v31 = vld [vmem:[#allocation2 + $0x140] sm:$0xff] }
 0x25f   : > { %6795 = vrot.lane.b32.xlu1 %v6794_v62, %s7400_s27  ;;  %6790 = vrot.lane.b32.xlu0 %v6789_v56, %s7400_s27  ;;  %v9457_v37 = vpop.permute.xlu1 %6610  ;;  %v9463_v23 = vpop.permute.xlu0 %6605 }
 0x260   : > { %v10883_v50 = vunpack.i.l.bf16 %v9463_v23 }
 0x262   : > { %v2784_v9 = vsel %vm2740_vm10, %v6603_v13, %v10883_v50  ;;  %v9519_v13 = vld [vmem:[#allocation2 + $0x1a0] sm:$0xff] }
 0x263   : > { %3557 = vrot.lane.b32.xlu1 %v9459_v26, %s7400_s27  ;;  %3555 = vrot.lane.b32.xlu0 %v9461_v42, %s7400_s27  ;;  %v9471_v14 = vpop.permute.xlu1 %6620  ;;  %v9473_v55 = vpop.permute.xlu0 %6615 }
 0x264   : > { %v6623_v60 = vunpack.i.h.bf16 %v9471_v14 }
 0x267   : > { %6805 = vrot.lane.b32.xlu1 %v11137_v46, %s7401_s6  ;;  %6800 = vrot.lane.b32.xlu0 %v6799_v54, %s7401_s6  ;;  %v9481_v3 = vpop.permute.xlu1 %6630  ;;  %v6626_v62 = vpop.permute.xlu0 %6625 }
 0x268   : > { %v10884_v28 = vunpack.i.h.bf16 %v9481_v3  ;;  %v6632_v4 = vunpack.i.l.bf16 %v9481_v3  ;;  %v6628_v5 = vunpack.i.h.bf16 %v6626_v62  ;;  %v6627_v56 = vunpack.i.l.bf16 %v6626_v62 }
 0x26a   : > { %v2794_v10 = vsel %vm2740_vm10, %v6632_v4, %v10884_v28  ;;  %v2793_v57 = vsel %vm2740_vm10, %v6628_v5, %v6632_v4  ;;  %v2791_v54 = vsel %vm2740_vm10, %v6623_v60, %v6627_v56  ;;  %v2792_v53 = vsel %vm2740_vm10, %v6627_v56, %v6628_v5 }
 0x26b   : > { %6810 = vrot.lane.b32.xlu1 %v6809_v45, %s7401_s6  ;;  %3553 = vrot.lane.b32.xlu0 %v9483_v17, %s7400_s27  ;;  %v9505_v44 = vpop.permute.xlu1 %6640  ;;  %v5780_v11 = vpack.c.bf16 %v2794_v10, %v2784_v9  ;;  %v9509_v39 = vpop.permute.xlu0 %6635  ;;  %v5768_v45 = vpack.c.bf16 %v2792_v53, %v2782_v43  ;;  %v5770_v62 = vpack.c.bf16 %v2791_v54, %v2781_v0  ;;  %v6528_v4 = vunpack.i.h.bf16 %v9385_v34  ;;  %v7210_v54 = vld [vmem:[#allocation2 + $0x160] sm:$0xff] }
 0x26c   : > { %v5782_v50 = vpack.c.bf16 %v2793_v57, %v2783_v20  ;;  %v6527_v60 = vunpack.i.l.bf16 %v9385_v34  ;;  %v6503_v5 = vunpack.i.h.bf16 %v9298_v27  ;;  %v6502_v56 = vunpack.i.l.bf16 %v9298_v27  ;;  %v9539_v53 = vld [vmem:[#allocation2 + $0x200] sm:$0xff]  ;;  %v11139_v20 = vld [vmem:[#allocation56_spill] sm:$0xff] }
 0x26d   : > { %5769 = vmatprep.subr.bf16.mxu0 %v5768_v45  ;;  %5781 = vmatprep.subr.bf16.mxu1 %v5780_v11  ;;  %v6498_v34 = vunpack.i.h.bf16 %v9307_v52  ;;  %v10886_v43 = vunpack.i.l.bf16 %v9333_v49  ;;  %v10887_v9 = vunpack.i.h.bf16 %v9379_v24  ;;  %v6532_v27 = vunpack.i.l.bf16 %v9379_v24  ;;  %v11140_v45 = vld [vmem:[#allocation61_spill] sm:$0xff] }
 0x26e   : > { %5771 = vmatpush1.bf16.msra.mxu0 %v5770_v62  ;;  %5783 = vmatpush1.bf16.msra.mxu1 %v5782_v50  ;;  %v6583_v57 = vunpack.i.h.bf16 %v9427_v22  ;;  %v9537_v50 = vsel %vm2740_vm10, %v6502_v56, %v6503_v5  ;;  %v6849_v11 = vpack.i.bf16 %v7210_v54, %v9539_v53  ;;  %v6854_v62 = vpack.i.bf16 %v11140_v45, %v11139_v20 }
 0x26f   : > { %6820 = vrot.lane.b32.xlu1 %v6819_v29, %s7401_s6  ;;  %6815 = vrot.lane.b32.xlu0 %v6814_v47, %s7401_s6  ;;  %v6829_v29 = vpack.i.bf16 %v9519_v13, %v9517_v31  ;;  %v6824_v47 = vpack.i.bf16 %v9319_v7, %v11121_v18  ;;  %v2719_v0 = vpop.permute.xlu1 %2718  ;;  %v9529_v10 = vpop.permute.xlu0 %6645  ;;  %v6582_v18 = vunpack.i.l.bf16 %v9427_v22  ;;  %v2756_v7 = vsel %vm2740_vm10, %v6527_v60, %v6528_v4 }
 0x270   : > { %v2746_v22 = vsel %vm2740_vm10, %v6498_v34, %v6502_v56  ;;  %v2748_v28 = vsel %vm2740_vm10, %v6503_v5, %v10886_v43  ;;  %v2758_v21 = vsel %vm2740_vm10, %v6532_v27, %v10887_v9  ;;  %v9555_v54 = vsel %vm2740_vm10, %v6528_v4, %v6532_v27 }
 0x271   : > { %v2755_v52 = vsel %vm2740_vm10, %v6523_v2, %v6527_v60  ;;  %v5784_v56 = vpack.c.bf16 %v2756_v7, %v2746_v22  ;;  %v2776_v12 = vsel %vm2740_vm10, %v6582_v18, %v6583_v57  ;;  %v6587_v60 = vunpack.i.l.bf16 %v9451_v6 }
 0x272   : > { %v6638_v27 = vunpack.i.h.bf16 %v9509_v39  ;;  %v6562_v7 = vunpack.i.l.bf16 %v9408_v16  ;;  %v6558_v45 = vunpack.i.h.bf16 %v9410_v19  ;;  %v2775_v43 = vsel %vm2740_vm10, %v6578_v32, %v6582_v18 }
 0x273   : > { %6830 = vrot.lane.b32.xlu1 %v6829_v29, %s7400_s27  ;;  %6825 = vrot.lane.b32.xlu0 %v6824_v47, %s7401_s6  ;;  %v2745_v29 = vsel %vm2740_vm10, %v6497_v51, %v6498_v34  ;;  %v2723_v47 = vpop.permute.xlu1 %2722  ;;  %v6557_v51 = vunpack.i.l.bf16 %v9410_v19  ;;  %v2721_v5 = vpop.permute.xlu0 %2720  ;;  %v6553_v34 = vunpack.i.h.bf16 %v9404_v36  ;;  %v6612_v9 = vunpack.i.l.bf16 %v9457_v37 }
 0x274   : > { %v2802_v20 = vsel %vm2740_vm10, %v2721_v5, %v2723_v47  ;;  %v2801_v4 = vsel %vm2740_vm10, %v2719_v0, %v2721_v5  ;;  %v5786_v0 = vpack.c.bf16 %v2755_v52, %v2745_v29  ;;  %v5796_v5 = vpack.c.bf16 %v2758_v21, %v2748_v28 }
 0x275   : > { %2896 = vmatprep.subr.mxu0 %v2802_v20  ;;  %v6608_v2 = vunpack.i.h.bf16 %v9463_v23  ;;  %v6643_v28 = vunpack.i.h.bf16 %v9505_v44  ;;  %v6642_v18 = vunpack.i.l.bf16 %v9505_v44  ;;  %v11142_v52 = vunpack.i.l.bf16 %v9404_v36 }
 0x276   : > { %2897 = vmatpush1.msra.mxu0 %v2801_v4  ;;  %v2766_v4 = vsel %vm2740_vm10, %v6553_v34, %v6557_v51 }
 0x277   : > { %6840 = vrot.lane.b32.xlu1 %v9347_v61, %s7401_s6  ;;  %6835 = vrot.lane.b32.xlu0 %v9349_v35, %s7401_s6  ;;  %v6637_v61 = vunpack.i.l.bf16 %v9509_v39  ;;  %v9573_v35 = vld [vmem:[#allocation6 + $0x18] sm:$0xff]  ;;  %v9577_v22 = vpop.permute.xlu1 %2726  ;;  %v2725_v20 = vpop.permute.xlu0 %2724  ;;  %v5788_v58 = vpack.c.bf16 %v2776_v12, %v2766_v4  ;;  %v5798_v12 = vpack.c.bf16 %v9555_v54, %v9537_v50  ;;  %v6617_v4 = vunpack.i.l.bf16 %v9473_v55 }
 0x278   : > { %5785 = vmatprep.subr.bf16.mxu0 %v5784_v56  ;;  %5557 = vmatmul.mubr.msk.f32.vlgmr.msra.gmra.mrb[0].mxu0 %vm1202_vm7, %v9573_v35  ;;  %v2804_v21 = vsel %vm2740_vm10, %v2725_v20, %v9577_v22  ;;  %v2803_v32 = vsel %vm2740_vm10, %v2723_v47, %v2725_v20  ;;  %v2765_v56 = vsel %vm2740_vm10, %v11142_v52, %v6553_v34  ;;  %v11144_v50 = vunpack.i.h.bf16 %v9481_v3 }
 0x279   : > { %5787 = vmatpush1.bf16.msra.mxu0 %v5786_v0  ;;  %2967 = vmatprep.subr.mxu1 %v2804_v21  ;;  %v2768_v0 = vsel %vm2740_vm10, %v6558_v45, %v6562_v7  ;;  %v2777_v20 = vsel %vm2740_vm10, %v6583_v57, %v6587_v60  ;;  %v11143_v21 = vld [vmem:[#allocation13_spill] sm:$0xff]  ;;  %v5790_v34 = vpack.c.bf16 %v2775_v43, %v2765_v56  ;;  %v6613_v43 = vunpack.i.h.bf16 %v9457_v37 }
 0x27a   : > { %5789 = vmatprep.subr.bf16.mxu0 %v5788_v58  ;;  %2968 = vmatpush1.msra.mxu1 %v2803_v32  ;;  %v2786_v58 = vsel %vm2740_vm10, %v6608_v2, %v6612_v9  ;;  %v2795_v54 = vsel %vm2740_vm10, %v11144_v50, %v6637_v61  ;;  %v6538_v32 = vunpack.i.h.bf16 %v9397_v1  ;;  %v2798_v3 = vsel %vm2740_vm10, %v6642_v18, %v6643_v28 }
 0x27b   : > { %6850 = vrot.lane.b32.xlu1 %v6849_v11, %s7400_s27  ;;  %6845 = vrot.lane.b32.xlu0 %v9356_v59, %s7401_s6  ;;  %v2796_v59 = vsel %vm2740_vm10, %v6637_v61, %v6638_v27  ;;  %v11141_v11 = vunpack.i.h.bf16 %v9451_v6  ;;  %v9606_v47 = vpop.permute.xlu1 %2730  ;;  %v2729_v36 = vpop.permute.xlu0 %2728  ;;  %v6512_v61 = vunpack.i.l.bf16 %v9328_v8  ;;  %v11147_v50 = vunpack.i.h.bf16 %v9379_v24 }
 0x27c   : > { %5797 = vmatprep.subr.bf16.mxu1 %v5796_v5  ;;  %5558 = vmatmul.mubr.msk.f32.vlgmr.msra.gmra.mrb[2].mxu1 %vm1202_vm7, %v9573_v35  ;;  %v5792_v57 = vpack.c.bf16 %v2796_v59, %v2786_v58  ;;  %v2767_v5 = vsel %vm2740_vm10, %v6557_v51, %v6558_v45  ;;  %v11145_v59 = vunpack.i.l.bf16 %v9463_v23  ;;  %v2788_v23 = vsel %vm2740_vm10, %v6613_v43, %v6617_v4  ;;  %v11146_v45 = vld [vmem:[#allocation66_spill] sm:$0xff] }
 0x27d   : > { %v2778_v29 = vsel %vm2740_vm10, %v6587_v60, %v11141_v11  ;;  %5791 = vmatpush1.bf16.msra.mxu0 %v5790_v34  ;;  %5799 = vmatpush1.bf16.msra.mxu1 %v5798_v12  ;;  %v5802_v52 = vpack.c.bf16 %v2777_v20, %v2767_v5  ;;  %v2797_v51 = vsel %vm2740_vm10, %v6638_v27, %v6642_v18  ;;  %v6592_v12 = vunpack.i.l.bf16 %v9443_v48 }
 0x27e   : > { %v5800_v60 = vpack.c.bf16 %v2778_v29, %v2768_v0  ;;  %v2785_v11 = vsel %vm2740_vm10, %v11145_v59, %v6608_v2  ;;  %5793 = vmatprep.subr.bf16.mxu0 %v5792_v57  ;;  %v6508_v29 = vunpack.i.h.bf16 %v9333_v49  ;;  %v9652_v2 = vld [vmem:[#allocation2 + $0x88] sm:$0xff]  ;;  %3090 = vmatprep.mubr.f32.mxu0 %v10987_v30  ;;  %v2806_v39 = vsel %vm2740_vm10, %v2729_v36, %v9606_v47 }
 0x27f   : > { %6860 = vrot.lane.b32.xlu1 %v11143_v21, %s7401_s6  ;;  %6855 = vrot.lane.b32.xlu0 %v6854_v62, %s7401_s6  ;;  %v6537_v62 = vunpack.i.l.bf16 %v9397_v1  ;;  %v9639_v1 = vpop.permute.xlu1 %2734  ;;  %v2733_v8 = vpop.permute.xlu0 %2732  ;;  %v5794_v19 = vpack.c.bf16 %v2795_v54, %v2785_v11  ;;  %v6864_v56 = vpack.i.bf16 %v9652_v2, %v11146_v45  ;;  %v2787_v18 = vsel %vm2740_vm10, %v6612_v9, %v6613_v43  ;;  %v9687_v43 = vld [vmem:[#allocation2 + $0x260] sm:$0xff] }
 0x280   : > { %5801 = vmatprep.subr.bf16.mxu1 %v5800_v60  ;;  %3161 = vmatprep.mubr.f32.mxu1 %v10987_v30  ;;  %v6567_v20 = vunpack.i.l.bf16 %v9416_v25  ;;  %v5806_v34 = vpack.c.bf16 %v2797_v51, %v2787_v18  ;;  %v2750_v58 = vsel %vm2740_vm10, %v6508_v29, %v6512_v61  ;;  %v6563_v9 = vunpack.i.h.bf16 %v9408_v16  ;;  %v11152_v51 = vld [vmem:[#allocation34_spill] sm:$0xff] }
 0x281   : > { %5795 = vmatpush1.bf16.msra.mxu0 %v5794_v19  ;;  %5803 = vmatpush1.bf16.msra.mxu1 %v5802_v52  ;;  %v2760_v27 = vsel %vm2740_vm10, %v6537_v62, %v6538_v32  ;;  %v2759_v37 = vsel %vm2740_vm10, %v11147_v50, %v6537_v62  ;;  %v2805_v54 = vsel %vm2740_vm10, %v9577_v22, %v2729_v36  ;;  %v6648_v57 = vunpack.i.h.bf16 %v9529_v10  ;;  %v11155_v50 = vld [vmem:[#allocation65_spill] sm:$0xff] }
 0x282   : > { %3038 = vmatprep.subr.mxu0 %v2806_v39  ;;  %v5808_v25 = vpack.c.bf16 %v2760_v27, %v2750_v58  ;;  %v2808_v60 = vsel %vm2740_vm10, %v2733_v8, %v9639_v1  ;;  %v11148_v24 = vunpack.i.l.bf16 %v9333_v49  ;;  %v6622_v36 = vunpack.i.l.bf16 %v9471_v14  ;;  %v7213_v27 = vld [vmem:[#allocation2 + $0x1c0] sm:$0xff] }
 0x283   : > { %4206 = vrot.lane.b32.xlu1 %v9395_v38, %s7401_s6  ;;  %4204 = vrot.lane.b32.xlu0 %v9383_v33, %s7401_s6  ;;  %v5804_v38 = vpack.c.bf16 %v2798_v3, %v2788_v23  ;;  %v6593_v33 = vunpack.i.h.bf16 %v9443_v48  ;;  %v2739_v0 = vpop.permute.xlu1 %2738  ;;  %v9670_v48 = vpop.permute.xlu0 %2736  ;;  %v11149_v3 = vld [vmem:[#allocation21_spill] sm:$0xff]  ;;  %v2770_v5 = vsel %vm2740_vm10, %v6563_v9, %v6567_v20  ;;  %v11150_v59 = vunpack.i.h.bf16 %v9451_v6 }
 0x284   : > { %v2749_v62 = vsel %vm2740_vm10, %v11148_v24, %v6508_v29  ;;  %v2807_v29 = vsel %vm2740_vm10, %v9606_v47, %v2733_v8  ;;  %v2769_v52 = vsel %vm2740_vm10, %v6562_v7, %v6563_v9  ;;  %v11151_v6 = vld [vmem:[#allocation33_spill] sm:$0xff]  ;;  %v2810_v39 = vsel %vm2740_vm10, %v9670_v48, %v2739_v0  ;;  %v7216_v9 = vld [vmem:[#allocation2 + $0x50] sm:$0xff] }
 0x285   : > { %5805 = vmatprep.subr.bf16.mxu1 %v5804_v38  ;;  %3039 = vmatpush1.msra.mxu0 %v2805_v54  ;;  %v2780_v32 = vsel %vm2740_vm10, %v6592_v12, %v6593_v33  ;;  %v5810_v61 = vpack.c.bf16 %v2759_v37, %v2749_v62  ;;  %v2779_v11 = vsel %vm2740_vm10, %v11150_v59, %v6592_v12  ;;  %v11153_v38 = vld [vmem:[#allocation67_spill] sm:$0xff]  ;;  %v11154_v33 = vld [vmem:[#allocation48_spill] sm:$0xff] }
 0x286   : > { %5807 = vmatpush1.bf16.msra.mxu1 %v5806_v34  ;;  %5809 = vmatprep.subr.bf16.mxu0 %v5808_v25  ;;  %v5812_v14 = vpack.c.bf16 %v2780_v32, %v2770_v5  ;;  %v5814_v47 = vpack.c.bf16 %v2779_v11, %v2769_v52  ;;  %v7215_v37 = vld [vmem:[#allocation2 + $0x58] sm:$0xff]  ;;  %v11156_v5 = vld [vmem:[#allocation15_spill] sm:$0xff] }
 0x287   : > { %4202 = vrot.lane.b32.xlu1 %v9393_v63, %s7401_s6  ;;  %6865 = vrot.lane.b32.xlu0 %v6864_v56, %s7401_s6  ;;  %v6647_v63 = vunpack.i.l.bf16 %v9529_v10  ;;  %v9689_v22 = vpop.permute.xlu1 %6655  ;;  %v6618_v10 = vunpack.i.h.bf16 %v9473_v55  ;;  %v6651_v49 = vpop.permute.xlu0 %6650  ;;  %v7214_v55 = vld [vmem:[#allocation2 + $0x220] sm:$0xff]  ;;  %v9743_v54 = vpack.i.bf16 %v7215_v37, %v7216_v9 }
 0x288   : > { %3109 = vmatprep.subr.mxu1 %v2808_v60  ;;  %5559 = vmatmul.mubr.msk.f32.vlgmr.msra.gmra.mrb[2].mxu0 %vm1202_vm7, %v9573_v35  ;;  %v6899_v18 = vpack.i.bf16 %v7214_v55, %v7213_v27  ;;  %v6657_v20 = vunpack.i.l.bf16 %v9689_v22  ;;  %v6653_v34 = vunpack.i.h.bf16 %v6651_v49  ;;  %v6652_v58 = vunpack.i.l.bf16 %v6651_v49  ;;  %v7220_v37 = vld [vmem:[#allocation2 + $0x20] sm:$0xff] }
 0x289   : > { %5811 = vmatpush1.bf16.msra.mxu0 %v5810_v61  ;;  %v2800_v19 = vsel %vm2740_vm10, %v6647_v63, %v6648_v57  ;;  %3232 = vmatprep.mubr.f32.mxu0 %v10987_v30  ;;  %v2790_v45 = vsel %vm2740_vm10, %v6618_v10, %v6622_v36  ;;  %v2799_v16 = vsel %vm2740_vm10, %v6643_v28, %v6647_v63 }
 0x28a   : > { %3110 = vmatpush1.msra.mxu1 %v2807_v29  ;;  %5813 = vmatprep.subr.bf16.mxu0 %v5812_v14  ;;  %v5816_v7 = vpack.c.bf16 %v2800_v19, %v2790_v45  ;;  %v2789_v56 = vsel %vm2740_vm10, %v6617_v4, %v6618_v10  ;;  %v6658_v4 = vunpack.i.h.bf16 %v9689_v22  ;;  %v2809_v57 = vsel %vm2740_vm10, %v9639_v1, %v9670_v48 }
 0x28b   : > { %6870 = vrot.lane.b32.xlu1 %v11149_v3, %s7401_s6  ;;  %3543 = vrot.lane.b32.xlu0 %v9687_v43, %s7400_s27  ;;  %v9709_v23 = vpop.permute.xlu1 %6665  ;;  %v9716_v8 = vpop.permute.xlu0 %6660  ;;  %v5818_v44 = vpack.c.bf16 %v2799_v16, %v2789_v56  ;;  %v3560_v10 = vsel %vm3559_vm11, %v6652_v58, %v6653_v34  ;;  %v3561_v61 = vsel %vm3559_vm11, %v6653_v34, %v6657_v20  ;;  %v7219_v58 = vld [vmem:[#allocation2 + $0x80] sm:$0xff] }
 0x28c   : > { %5560 = vmatmul.mubr.msk.f32.vlgmr.msra.gmra.mrb[6].mxu1 %vm1202_vm7, %v9573_v35  ;;  %v10894_v0 = vunpack.i.l.bf16 %v9716_v8  ;;  %v3562_v36 = vsel %vm3559_vm11, %v6657_v20, %v6658_v4  ;;  %v10888_v1 = vunpack.i.h.bf16 %v9709_v23  ;;  %v6667_v11 = vunpack.i.l.bf16 %v9709_v23 }
 0x28d   : > { %5815 = vmatpush1.bf16.msra.mxu0 %v5814_v47  ;;  %3838 = vmatprep.mubr.f32.mxu1 %v10987_v30  ;;  %v9813_v9 = vpack.i.bf16 %v7219_v58, %v7220_v37 }
 0x28e   : > { %5817 = vmatprep.subr.bf16.mxu0 %v5816_v7  ;;  %v3563_v16 = vsel %vm3559_vm11, %v6658_v4, %v10894_v0  ;;  %v9799_v55 = vsel %vm3559_vm11, %v6667_v11, %v10888_v1  ;;  %v7218_v4 = vld [vmem:[#allocation2 + $0x48] sm:$0xff] }
 0x28f   : > { %6880 = vrot.lane.b32.xlu1 %v11151_v6, %s7401_s6  ;;  %6875 = vrot.lane.b32.xlu0 %v11152_v51, %s7401_s6 }
 0x290   : > { %v9734_v12 = vpop.permute.xlu0 %6670 }
 0x291   : > { %v9732_v28 = vpop.permute.xlu1 %6675  ;;  %5819 = vmatpush1.bf16.msra.mxu0 %v5818_v44 }
 0x292   : > { %3180 = vmatprep.subr.mxu0 %v2810_v39  ;;  %v6678_v25 = vunpack.i.h.bf16 %v9732_v28 }
 0x293   : > { %6890 = vrot.lane.b32.xlu1 %v11153_v38, %s7401_s6  ;;  %6885 = vrot.lane.b32.xlu0 %v11154_v33, %s7401_s6 }
 0x295   : > { %3181 = vmatpush1.msra.mxu0 %v2809_v57 }
 0x296   : > { %5561 = vmatmul.mubr.msk.f32.vlgmr.msra.gmra.mrb[4].mxu0 %vm1202_vm7, %v9573_v35 }
 0x297   : > { %6900 = vrot.lane.b32.xlu1 %v6899_v18, %s7400_s27  ;;  %6895 = vrot.lane.b32.xlu0 %v11155_v50, %s7401_s6  ;;  %v9750_v63 = vpop.permute.xlu1 %6685  ;;  %v6681_v60 = vpop.permute.xlu0 %6680  ;;  %v7217_v18 = vld [vmem:[#allocation2 + $0xa8] sm:$0xff] }
 0x298   : > { %v6688_v32 = vunpack.i.h.bf16 %v9750_v63  ;;  %v6687_v24 = vunpack.i.l.bf16 %v9750_v63  ;;  %v6683_v62 = vunpack.i.h.bf16 %v6681_v60  ;;  %v6682_v22 = vunpack.i.l.bf16 %v6681_v60  ;;  %3767 = vmatprep.mubr.f32.mxu0 %v10987_v30  ;;  %v11157_v60 = vld [vmem:[#allocation37_spill] sm:$0xff] }
 0x299   : > { %v9801_v20 = vpack.i.bf16 %v7217_v18, %v7218_v4  ;;  %v9902_v63 = vld [vmem:[#allocation6 + $0x20] sm:$0xff] }
 0x29a   : > { %v3572_v48 = vsel %vm3559_vm11, %v6683_v62, %v6687_v24  ;;  %v3570_v49 = vsel %vm3559_vm11, %v6678_v25, %v6682_v22  ;;  %v3571_v59 = vsel %vm3559_vm11, %v6682_v22, %v6683_v62  ;;  %v3573_v19 = vsel %vm3559_vm11, %v6687_v24, %v6688_v32  ;;  %v9815_v25 = vld [vmem:[#allocation2 + $0x280] sm:$0xff]  ;;  %v11158_v24 = vld [vmem:[#allocation23_spill] sm:$0xff] }
 0x29b   : > { %6910 = vrot.lane.b32.xlu1 %v11156_v5, %s7401_s6  ;;  %6905 = vrot.lane.b32.xlu0 %v9743_v54, %s7401_s6  ;;  %v9768_v14 = vpop.permute.xlu1 %6695  ;;  %v5820_v35 = vpack.c.bf16 %v3571_v59, %v3561_v61  ;;  %v5822_v52 = vpack.c.bf16 %v3570_v49, %v3560_v10  ;;  %v5834_v7 = vpack.c.bf16 %v3572_v48, %v3562_v36  ;;  %v7221_v48 = vld [vmem:[#allocation2 + $0xe0] sm:$0xff] }
 0x29c   : > { %v9770_v29 = vpop.permute.xlu0 %6690  ;;  %v10889_v47 = vunpack.i.l.bf16 %v9768_v14  ;;  %v5832_v56 = vpack.c.bf16 %v3573_v19, %v3563_v16  ;;  %v6939_v49 = vpack.i.bf16 %v9517_v31, %v7221_v48 }
 0x29d   : > { %v6693_v45 = vunpack.i.h.bf16 %v9770_v29  ;;  %5821 = vmatprep.subr.bf16.mxu0 %v5820_v35 }
 0x29e   : > { %5833 = vmatprep.subr.bf16.mxu1 %v5832_v56  ;;  %5823 = vmatpush1.bf16.msra.mxu0 %v5822_v52  ;;  %v11159_v52 = vld [vmem:[#allocation38_spill] sm:$0xff] }
 0x29f   : > { %v9786_v44 = vsel %vm3559_vm11, %v6693_v45, %v10889_v47  ;;  %4214 = vrot.lane.b32.xlu1 %v9431_v15, %s7401_s6  ;;  %4212 = vrot.lane.b32.xlu0 %v9414_v40, %s7401_s6 }
 0x2a0   : > { %v6706_v39 = vpop.permute.xlu1 %6705  ;;  %5835 = vmatpush1.bf16.msra.mxu1 %v5834_v7 }
 0x2a1   : > { %v9792_v27 = vpop.permute.xlu0 %6700  ;;  %v6708_v62 = vunpack.i.h.bf16 %v6706_v39  ;;  %v6707_v22 = vunpack.i.l.bf16 %v6706_v39 }
 0x2a3   : > { %4210 = vrot.lane.b32.xlu1 %v9429_v41, %s7401_s6  ;;  %6915 = vrot.lane.b32.xlu0 %v9801_v20, %s7401_s6  ;;  %v3580_v16 = vsel %vm3559_vm11, %v6707_v22, %v6708_v62 }
 0x2a5   : > { %v9809_v15 = vpop.permute.xlu1 %6715  ;;  %v9811_v34 = vpop.permute.xlu0 %6710 }
 0x2a6   : > { %v10893_v36 = vunpack.i.l.bf16 %v9811_v34 }
 0x2a7   : > { %6920 = vrot.lane.b32.xlu1 %v9813_v9, %s7401_s6  ;;  %3551 = vrot.lane.b32.xlu0 %v9815_v25, %s7400_s27 }
 0x2a8   : > { %v3581_v56 = vsel %vm3559_vm11, %v6708_v62, %v10893_v36  ;;  %v11160_v62 = vld [vmem:[#allocation71_spill] sm:$0xff] }
 0x2a9   : > { %v9821_v41 = vpop.permute.xlu1 %6725  ;;  %v9823_v57 = vpop.permute.xlu0 %6720 }
 0x2ab   : > { %6930 = vrot.lane.b32.xlu1 %v11157_v60, %s7401_s6  ;;  %6925 = vrot.lane.b32.xlu0 %v11158_v24, %s7401_s6 }
 0x2ad   : > { %v9830_v10 = vpop.permute.xlu1 %6735  ;;  %v9832_v61 = vpop.permute.xlu0 %6730 }
 0x2ae   : > { %v6738_v59 = vunpack.i.h.bf16 %v9830_v10  ;;  %v10891_v35 = vunpack.i.l.bf16 %v9830_v10  ;;  %v6733_v19 = vunpack.i.h.bf16 %v9832_v61 }
 0x2af   : > { %6940 = vrot.lane.b32.xlu1 %v6939_v49, %s7401_s6  ;;  %6935 = vrot.lane.b32.xlu0 %v11159_v52, %s7401_s6 }
 0x2b0   : > { %v3590_v7 = vsel %vm3559_vm11, %v6738_v59, %v6733_v19  ;;  %v3591_v31 = vsel %vm3559_vm11, %v6733_v19, %v10891_v35  ;;  %v11161_v59 = vld [vmem:[#allocation51_spill] sm:$0xff] }
 0x2b1   : > { %v9849_v39 = vpop.permute.xlu1 %6745  ;;  %v9851_v18 = vpop.permute.xlu0 %6740  ;;  %v5824_v4 = vpack.c.bf16 %v3591_v31, %v3581_v56  ;;  %v5826_v58 = vpack.c.bf16 %v3590_v7, %v3580_v16  ;;  %v6959_v31 = vpack.i.bf16 %v9539_v53, %v9519_v13 }
 0x2b2   : > { %v10892_v37 = vunpack.i.h.bf16 %v9849_v39  ;;  %v6747_v22 = vunpack.i.l.bf16 %v9849_v39  ;;  %v10890_v48 = vunpack.i.h.bf16 %v9851_v18  ;;  %v6742_v49 = vunpack.i.l.bf16 %v9851_v18 }
 0x2b3   : > { %6950 = vrot.lane.b32.xlu1 %v11160_v62, %s7401_s6  ;;  %6945 = vrot.lane.b32.xlu0 %v11161_v59, %s7401_s6 }
 0x2b4   : > { %5825 = vmatprep.subr.bf16.mxu0 %v5824_v4  ;;  %v3601_v19 = vsel %vm3559_vm11, %v6742_v49, %v10890_v48  ;;  %v3611_v16 = vsel %vm3559_vm11, %v6747_v22, %v10892_v37  ;;  %v11162_v4 = vld [vmem:[#allocation72_spill] sm:$0xff]  ;;  %v6692_v48 = vunpack.i.l.bf16 %v9770_v29 }
 0x2b5   : > { %5827 = vmatpush1.bf16.msra.mxu0 %v5826_v58  ;;  %v3540_v7 = vpop.permute.xlu1 %3539  ;;  %v6751_v56 = vpop.permute.xlu0 %6750  ;;  %v5828_v40 = vpack.c.bf16 %v3611_v16, %v3601_v19  ;;  %v6663_v58 = vunpack.i.h.bf16 %v9716_v8  ;;  %v7222_v19 = vld [vmem:[#allocation2 + $0x18] sm:$0xff] }
 0x2b6   : > { %v6753_v1 = vunpack.i.h.bf16 %v6751_v56  ;;  %v6752_v47 = vunpack.i.l.bf16 %v6751_v56  ;;  %v10904_v56 = vunpack.i.l.bf16 %v9809_v15 }
 0x2b7   : > { %6960 = vrot.lane.b32.xlu1 %v6959_v31, %s7401_s6  ;;  %6955 = vrot.lane.b32.xlu0 %v11162_v4, %s7401_s6 }
 0x2b8   : > { %v3610_v35 = vsel %vm3559_vm11, %v6753_v1, %v6747_v22  ;;  %v3600_v37 = vsel %vm3559_vm11, %v6752_v47, %v6742_v49  ;;  %5829 = vmatprep.subr.bf16.mxu0 %v5828_v40  ;;  %v7223_v1 = vld [vmem:[#allocation2 + $0x10] sm:$0xff]  ;;  %v10900_v47 = vunpack.i.l.bf16 %v9823_v57  ;;  %v3575_v40 = vsel %vm3559_vm11, %v6692_v48, %v6693_v45 }
 0x2b9   : > { %v3538_v36 = vpop.permute.xlu1 %3537  ;;  %v9876_v0 = vpop.permute.xlu0 %3541  ;;  %v5830_v13 = vpack.c.bf16 %v3610_v35, %v3600_v37  ;;  %v6964_v22 = vpack.i.bf16 %v7222_v19, %v7223_v1  ;;  %v3574_v35 = vsel %vm3559_vm11, %v6688_v32, %v6692_v48  ;;  %v6718_v49 = vunpack.i.h.bf16 %v9809_v15  ;;  %v7225_v19 = vld [vmem:[#allocation2 + $0x8] sm:$0xff] }
 0x2ba   : > { %v3621_v53 = vsel %vm3559_vm11, %v3540_v7, %v9876_v0  ;;  %v11163_v32 = vunpack.i.l.bf16 %v9716_v8  ;;  %v3620_v31 = vsel %vm3559_vm11, %v3538_v36, %v3540_v7 }
 0x2bb   : > { %4222 = vrot.lane.b32.xlu1 %v9459_v26, %s7401_s6  ;;  %4220 = vrot.lane.b32.xlu0 %v9461_v42, %s7401_s6  ;;  %v3565_v42 = vsel %vm3559_vm11, %v6663_v58, %v6667_v11 }
 0x2bc   : > { %5831 = vmatpush1.bf16.msra.mxu0 %v5830_v13  ;;  %v3564_v48 = vsel %vm3559_vm11, %v11163_v32, %v6663_v58  ;;  %v5844_v11 = vpack.c.bf16 %v3575_v40, %v3565_v42  ;;  %v7224_v58 = vld [vmem:[#allocation2 + $0x68] sm:$0xff]  ;;  %v3584_v32 = vsel %vm3559_vm11, %v10904_v56, %v6718_v49 }
 0x2bd   : > { %3715 = vmatprep.subr.mxu0 %v3621_v53  ;;  %v9891_v37 = vpop.permute.xlu1 %6760  ;;  %v9893_v26 = vpop.permute.xlu0 %6755  ;;  %v5846_v13 = vpack.c.bf16 %v3574_v35, %v3564_v48  ;;  %v3585_v53 = vsel %vm3559_vm11, %v6718_v49, %v10900_v47  ;;  %v6974_v1 = vpack.i.bf16 %v7224_v58, %v7225_v19  ;;  %v7226_v49 = vld [vmem:[#allocation2 + $0xa0] sm:$0xff] }
 0x2be   : > { %v10901_v16 = vunpack.i.l.bf16 %v9891_v37  ;;  %v10899_v29 = vunpack.i.h.bf16 %v9893_v26  ;;  %v6757_v45 = vunpack.i.l.bf16 %v9893_v26  ;;  %v6763_v40 = vunpack.i.h.bf16 %v9891_v37  ;;  %v7227_v58 = vld [vmem:[#allocation2 + $0x40] sm:$0xff] }
 0x2bf   : > { %6970 = vrot.lane.b32.xlu1 %v11137_v46, %s7402_s9  ;;  %6965 = vrot.lane.b32.xlu0 %v6964_v22, %s7402_s9  ;;  %v9947_v19 = vpack.i.bf16 %v7226_v49, %v7227_v58  ;;  %v10902_v49 = vunpack.i.l.bf16 %v9734_v12 }
 0x2c0   : > { %3716 = vmatpush1.msra.mxu0 %v3620_v31  ;;  %v3595_v8 = vsel %vm3559_vm11, %v6757_v45, %v10899_v29  ;;  %v3594_v36 = vsel %vm3559_vm11, %v10901_v16, %v6757_v45 }
 0x2c1   : > { %5845 = vmatprep.subr.bf16.mxu0 %v5844_v11  ;;  %v9921_v7 = vpop.permute.xlu1 %6770  ;;  %v9923_v46 = vpop.permute.xlu0 %6765  ;;  %5562 = vmatmul.mubr.msk.f32.vlgmr.msra.gmra.mrb[0].mxu0 %vm1202_vm7, %v9902_v63  ;;  %v5848_v22 = vpack.c.bf16 %v3595_v8, %v3585_v53  ;;  %v5850_v31 = vpack.c.bf16 %v3594_v36, %v3584_v32  ;;  %v6703_v36 = vunpack.i.h.bf16 %v9792_v27 }
 0x2c2   : > { %v10896_v35 = vunpack.i.l.bf16 %v9921_v7  ;;  %v6768_v42 = vunpack.i.h.bf16 %v9923_v46  ;;  %v10895_v45 = vunpack.i.l.bf16 %v9923_v46  ;;  %5847 = vmatpush1.bf16.msra.mxu0 %v5846_v13  ;;  %3909 = vmatprep.mubr.f32.mxu0 %v10987_v30  ;;  %v10897_v48 = vunpack.i.h.bf16 %v9921_v7 }
 0x2c3   : > { %6975 = vrot.lane.b32.xlu1 %v6974_v1, %s7402_s9  ;;  %4218 = vrot.lane.b32.xlu0 %v9483_v17, %s7401_s6 }
 0x2c4   : > { %5849 = vmatprep.subr.bf16.mxu0 %v5848_v22  ;;  %v3605_v11 = vsel %vm3559_vm11, %v6763_v40, %v10895_v45  ;;  %v3615_v13 = vsel %vm3559_vm11, %v6768_v42, %v10896_v35  ;;  %v6702_v22 = vunpack.i.l.bf16 %v9792_v27  ;;  %v3604_v32 = vsel %vm3559_vm11, %v10897_v48, %v6763_v40  ;;  %v11165_v48 = vld [vmem:[#allocation29_spill] sm:$0xff] }
 0x2c5   : > { %v3548_v53 = vpop.permute.xlu1 %3547  ;;  %v9945_v8 = vpop.permute.xlu0 %6775  ;;  %v5852_v17 = vpack.c.bf16 %v3615_v13, %v3605_v11  ;;  %v6673_v13 = vunpack.i.h.bf16 %v9734_v12  ;;  %v10903_v35 = vunpack.i.h.bf16 %v9768_v14 }
 0x2c6   : > { %v10898_v1 = vunpack.i.l.bf16 %v9945_v8  ;;  %5851 = vmatpush1.bf16.msra.mxu0 %v5850_v31  ;;  %v6677_v31 = vunpack.i.l.bf16 %v9732_v28  ;;  %v11168_v28 = vld [vmem:[#allocation19_spill] sm:$0xff] }
 0x2c7   : > { %4208 = vrot.lane.b32.xlu1 %v9687_v43, %s7401_s6  ;;  %6980 = vrot.lane.b32.xlu0 %v9947_v19, %s7401_s6  ;;  %v3578_v47 = vsel %vm3559_vm11, %v10903_v35, %v6702_v22  ;;  %v3568_v16 = vsel %vm3559_vm11, %v10902_v49, %v6673_v13 }
 0x2c8   : > { %v3614_v11 = vsel %vm3559_vm11, %v10898_v1, %v6768_v42  ;;  %5853 = vmatprep.subr.bf16.mxu0 %v5852_v17  ;;  %v11166_v42 = vld [vmem:[#allocation32_spill] sm:$0xff]  ;;  %v5870_v35 = vpack.c.bf16 %v3578_v47, %v3568_v16 }
 0x2c9   : > { %v9965_v58 = vpop.permute.xlu1 %3545  ;;  %v9967_v45 = vpop.permute.xlu0 %3549  ;;  %v5854_v27 = vpack.c.bf16 %v3614_v11, %v3604_v32  ;;  %v11167_v17 = vpack.i.bf16 %v11165_v48, %v11166_v42  ;;  %v11169_v1 = vld [vmem:[#allocation20_spill] sm:$0xff]  ;;  %v6732_v32 = vunpack.i.l.bf16 %v9832_v61  ;;  %v3579_v11 = vsel %vm3559_vm11, %v6702_v22, %v6703_v36  ;;  %v11171_v22 = vld [vmem:[#allocation35_spill] sm:$0xff] }
 0x2ca   : > { %11164 = vst [vmem:[#allocation24_spill] sm:$0xff] %v9967_v45  ;;  %v3625_v40 = vsel %vm3559_vm11, %v3548_v53, %v9967_v45  ;;  %v11170_v29 = vpack.i.bf16 %v11168_v28, %v11169_v1  ;;  %v3569_v1 = vsel %vm3559_vm11, %v6673_v13, %v6677_v31  ;;  %v3624_v31 = vsel %vm3559_vm11, %v9965_v58, %v3548_v53 }
 0x2cb   : > { %6990 = vrot.lane.b32.xlu1 %v11167_v17, %s7402_s9  ;;  %5855 = vmatpush1.bf16.msra.mxu0 %v5854_v27  ;;  %v6778_v17 = vunpack.i.h.bf16 %v9945_v8  ;;  %v11172_v27 = vld [vmem:[#allocation26_spill] sm:$0xff]  ;;  %v5868_v13 = vpack.c.bf16 %v3579_v11, %v3569_v1  ;;  %v11177_v1 = vld [vmem:[#allocation59_spill] sm:$0xff] }
 0x2cc   : > { %6985 = vrot.lane.b32.xlu0 %v11170_v29, %s7402_s9  ;;  %3857 = vmatprep.subr.mxu0 %v3625_v40  ;;  %v6728_v29 = vunpack.i.h.bf16 %v9821_v41  ;;  %v11173_v40 = vld [vmem:[#allocation27_spill] sm:$0xff] }
 0x2cd   : > { %v6786_v48 = vpop.permute.xlu1 %6785  ;;  %v9988_v42 = vpop.permute.xlu0 %6780  ;;  %v11174_v49 = vpack.i.bf16 %v11172_v27, %v11173_v40 }
 0x2ce   : > { %v6782_v61 = vunpack.i.l.bf16 %v9988_v42  ;;  %v6788_v56 = vunpack.i.h.bf16 %v6786_v48  ;;  %v6787_v45 = vunpack.i.l.bf16 %v6786_v48  ;;  %v3589_v28 = vsel %vm3559_vm11, %v6728_v29, %v6732_v32 }
 0x2cf   : > { %7000 = vrot.lane.b32.xlu1 %v11171_v22, %s7401_s6  ;;  %3858 = vmatpush1.msra.mxu0 %v3624_v31  ;;  %v11175_v4 = vunpack.i.h.bf16 %v9988_v42  ;;  %v11176_v48 = vunpack.i.l.bf16 %v9821_v41 }
 0x2d0   : > { %6995 = vrot.lane.b32.xlu0 %v11174_v49, %s7402_s9  ;;  %v3599_v36 = vsel %vm3559_vm11, %v6778_v17, %v6782_v61  ;;  %5869 = vmatprep.subr.bf16.mxu0 %v5868_v13 }
 0x2d1   : > { %v3598_v59 = vsel %vm3559_vm11, %v11175_v4, %v6778_v17  ;;  %v10009_v62 = vpop.permute.xlu1 %6795  ;;  %v6791_v49 = vpop.permute.xlu0 %6790  ;;  %5564 = vmatmul.mubr.msk.f32.vlgmr.msra.gmra.mrb[2].mxu0 %vm1202_vm7, %v9902_v63  ;;  %v5872_v53 = vpack.c.bf16 %v3599_v36, %v3589_v28  ;;  %v3588_v4 = vsel %vm3559_vm11, %v11176_v48, %v6728_v29  ;;  %v11178_v17 = vld [vmem:[#allocation62_spill] sm:$0xff]  ;;  %v11180_v28 = vld [vmem:[#allocation43_spill] sm:$0xff]  ;;  %v11181_v36 = vld [vmem:[#allocation45_spill] sm:$0xff] }
 0x2d2   : > { %v10910_v47 = vunpack.i.h.bf16 %v10009_v62  ;;  %v6797_v16 = vunpack.i.l.bf16 %v10009_v62  ;;  %v6793_v11 = vunpack.i.h.bf16 %v6791_v49  ;;  %v6792_v32 = vunpack.i.l.bf16 %v6791_v49  ;;  %5871 = vmatpush1.bf16.msra.mxu0 %v5870_v35  ;;  %4051 = vmatprep.mubr.f32.mxu0 %v10987_v30 }
 0x2d3   : > { %v11179_v61 = vpack.i.bf16 %v11177_v1, %v11178_v17  ;;  %v11182_v27 = vpack.i.bf16 %v11180_v28, %v11181_v36  ;;  %5873 = vmatprep.subr.bf16.mxu0 %v5872_v53  ;;  %v5874_v40 = vpack.c.bf16 %v3598_v59, %v3588_v4  ;;  %v3609_v35 = vsel %vm3559_vm11, %v6787_v45, %v6788_v56  ;;  %v11183_v17 = vld [vmem:[#allocation68_spill] sm:$0xff]  ;;  %v11184_v59 = vld [vmem:[#allocation55_spill] sm:$0xff]  ;;  %v11185_v56 = vld [vmem:[#allocation57_spill] sm:$0xff] }
 0x2d4   : > { %v3619_v31 = vsel %vm3559_vm11, %v6792_v32, %v6793_v11  ;;  %v3608_v29 = vsel %vm3559_vm11, %v6797_v16, %v6787_v45  ;;  %v3618_v13 = vsel %vm3559_vm11, %v10910_v47, %v6792_v32  ;;  %v11186_v53 = vpack.i.bf16 %v11184_v59, %v11185_v56  ;;  %v7228_v4 = vld [vmem:[#allocation2 + $0x38] sm:$0xff]  ;;  %v7229_v45 = vld [vmem:[#allocation2 + $0x30] sm:$0xff] }
 0x2d5   : > { %7010 = vrot.lane.b32.xlu1 %v11179_v61, %s7402_s9  ;;  %7005 = vrot.lane.b32.xlu0 %v11182_v27, %s7402_s9  ;;  %v3558_v49 = vpop.permute.xlu1 %3557  ;;  %v3556_v48 = vpop.permute.xlu0 %3555  ;;  %v5876_v1 = vpack.c.bf16 %v3619_v31, %v3609_v35  ;;  %v5878_v11 = vpack.c.bf16 %v3618_v13, %v3608_v29  ;;  %v7024_v61 = vpack.i.bf16 %v7228_v4, %v7229_v45 }
 0x2d6   : > { %5875 = vmatpush1.bf16.msra.mxu0 %v5874_v40  ;;  %v3629_v36 = vsel %vm3559_vm11, %v3556_v48, %v3558_v49 }
 0x2d7   : > { %5877 = vmatprep.subr.bf16.mxu0 %v5876_v1 }
 0x2d9   : > { %7020 = vrot.lane.b32.xlu1 %v11183_v17, %s7401_s6  ;;  %7015 = vrot.lane.b32.xlu0 %v11186_v53, %s7402_s9  ;;  %v10041_v28 = vpop.permute.xlu1 %6805  ;;  %v10043_v32 = vpop.permute.xlu0 %6800 }
 0x2da   : > { %v10907_v27 = vunpack.i.h.bf16 %v10041_v28  ;;  %v6807_v40 = vunpack.i.l.bf16 %v10041_v28  ;;  %v10906_v35 = vunpack.i.h.bf16 %v10043_v32  ;;  %v6802_v31 = vunpack.i.l.bf16 %v10043_v32  ;;  %5879 = vmatpush1.bf16.msra.mxu0 %v5878_v11 }
 0x2db   : > { %3999 = vmatprep.subr.mxu0 %v3629_v36 }
 0x2dc   : > { %v4225_v29 = vsel %vm1202_vm7, %v6802_v31, %v10906_v35  ;;  %v4235_v13 = vsel %vm1202_vm7, %v6807_v40, %v10907_v27 }
 0x2dd   : > { %7030 = vrot.lane.b32.xlu1 %v11143_v21, %s7402_s9  ;;  %7025 = vrot.lane.b32.xlu0 %v7024_v61, %s7402_s9  ;;  %v6811_v49 = vpop.permute.xlu1 %6810  ;;  %v10059_v1 = vpop.permute.xlu0 %3553  ;;  %v5880_v59 = vpack.c.bf16 %v4235_v13, %v4225_v29  ;;  %v7230_v21 = vld [vmem:[#allocation2 + $0x258] sm:$0xff]  ;;  %v7231_v61 = vld [vmem:[#allocation2 + $0x250] sm:$0xff]  ;;  %v7232_v13 = vld [vmem:[#allocation2 + $0x28] sm:$0xff] }
 0x2de   : > { %v6813_v56 = vunpack.i.h.bf16 %v6811_v49  ;;  %v6812_v53 = vunpack.i.l.bf16 %v6811_v49  ;;  %v3628_v11 = vsel %vm3559_vm11, %v10059_v1, %v3556_v48  ;;  %v7034_v48 = vpack.i.bf16 %v9652_v2, %v7232_v13 }
 0x2df   : > { %4000 = vmatpush1.msra.mxu0 %v3628_v11 }
 0x2e0   : > { %v4234_v4 = vsel %vm1202_vm7, %v6813_v56, %v6807_v40  ;;  %v4224_v45 = vsel %vm1202_vm7, %v6812_v53, %v6802_v31  ;;  %5881 = vmatprep.subr.bf16.mxu0 %v5880_v59  ;;  %5566 = vmatmul.mubr.msk.f32.vlgmr.msra.gmra.mrb[4].mxu0 %vm1202_vm7, %v9902_v63  ;;  %v7233_v59 = vld [vmem:[#allocation2 + $0x248] sm:$0xff]  ;;  %v6713_v53 = vunpack.i.h.bf16 %v9811_v34 }
 0x2e1   : > { %4870 = vrot.lane.b32.xlu1 %v7230_v21, %s7402_s9  ;;  %4868 = vrot.lane.b32.xlu0 %v7231_v61, %s7402_s9  ;;  %v5882_v36 = vpack.c.bf16 %v4234_v4, %v4224_v45  ;;  %v10067_v35 = vpop.permute.xlu1 %6820  ;;  %v10069_v29 = vpop.permute.xlu0 %6815 }
 0x2e2   : > { %v10909_v49 = vunpack.i.h.bf16 %v10067_v35  ;;  %v6822_v40 = vunpack.i.l.bf16 %v10067_v35  ;;  %v10908_v31 = vunpack.i.h.bf16 %v10069_v29  ;;  %v6817_v56 = vunpack.i.l.bf16 %v10069_v29  ;;  %4431 = vmatprep.mubr.f32.mxu0 %v10987_v30 }
 0x2e3   : > { %5883 = vmatpush1.bf16.msra.mxu0 %v5882_v36  ;;  %v11187_v36 = vunpack.i.l.bf16 %v9811_v34  ;;  %v11189_v34 = vunpack.i.l.bf16 %v9809_v15 }
 0x2e4   : > { %v4245_v2 = vsel %vm1202_vm7, %v6817_v56, %v10908_v31  ;;  %v4255_v11 = vsel %vm1202_vm7, %v6822_v40, %v10909_v49 }
 0x2e5   : > { %4866 = vrot.lane.b32.xlu1 %v7233_v59, %s7402_s9  ;;  %7035 = vrot.lane.b32.xlu0 %v7034_v48, %s7402_s9  ;;  %v6831_v21 = vpop.permute.xlu1 %6830  ;;  %v6826_v4 = vpop.permute.xlu0 %6825  ;;  %v5884_v45 = vpack.c.bf16 %v4255_v11, %v4245_v2  ;;  %v3582_v48 = vsel %vm3559_vm11, %v11187_v36, %v6713_v53  ;;  %v11188_v59 = vunpack.i.l.bf16 %v9830_v10  ;;  %v11190_v10 = vunpack.i.l.bf16 %v9891_v37 }
 0x2e6   : > { %v6832_v61 = vunpack.i.l.bf16 %v6831_v21  ;;  %v6828_v13 = vunpack.i.h.bf16 %v6826_v4  ;;  %v6827_v27 = vunpack.i.l.bf16 %v6826_v4 }
 0x2e7   : > { %5885 = vmatprep.subr.bf16.mxu0 %v5884_v45  ;;  %v3583_v45 = vsel %vm3559_vm11, %v6713_v53, %v11189_v34  ;;  %v6833_v53 = vunpack.i.h.bf16 %v6831_v21  ;;  %v11191_v34 = vunpack.i.l.bf16 %v9823_v57  ;;  %v11192_v21 = vld [vmem:[#allocation30_spill] sm:$0xff] }
 0x2e8   : > { %v3592_v31 = vsel %vm3559_vm11, %v11188_v59, %v6832_v61  ;;  %v4254_v49 = vsel %vm1202_vm7, %v6828_v13, %v6822_v40  ;;  %v4244_v47 = vsel %vm1202_vm7, %v6827_v27, %v6817_v56  ;;  %v3593_v36 = vsel %vm3559_vm11, %v6832_v61, %v11190_v10  ;;  %v11193_v10 = vld [vmem:[#allocation31_spill] sm:$0xff] }
 0x2e9   : > { %7040 = vrot.lane.b32.xlu1 %v9813_v9, %s7402_s9  ;;  %4216 = vrot.lane.b32.xlu0 %v9815_v25, %s7401_s6  ;;  %v5838_v2 = vpack.c.bf16 %v3592_v31, %v3582_v48  ;;  %v5886_v11 = vpack.c.bf16 %v4254_v49, %v4244_v47  ;;  %v10100_v4 = vpop.permute.xlu1 %6840  ;;  %v10102_v9 = vpop.permute.xlu0 %6835  ;;  %v6723_v49 = vunpack.i.h.bf16 %v9823_v57  ;;  %v5836_v15 = vpack.c.bf16 %v3593_v36, %v3583_v45  ;;  %v7236_v57 = vld [vmem:[#allocation2 + $0x268] sm:$0xff] }
 0x2ea   : > { %v6843_v40 = vunpack.i.h.bf16 %v10100_v4  ;;  %v6842_v27 = vunpack.i.l.bf16 %v10100_v4  ;;  %v6838_v56 = vunpack.i.h.bf16 %v10102_v9  ;;  %v6837_v47 = vunpack.i.l.bf16 %v10102_v9 }
 0x2eb   : > { %5887 = vmatpush1.bf16.msra.mxu0 %v5886_v11  ;;  %5837 = vmatprep.subr.bf16.mxu1 %v5836_v15  ;;  %v10134_v45 = vsel %vm3559_vm11, %v11191_v34, %v6723_v49  ;;  %v11194_v36 = vpack.i.bf16 %v11192_v21, %v11193_v10  ;;  %v11197_v34 = vunpack.i.h.bf16 %v9851_v18 }
 0x2ec   : > { %v4265_v37 = vsel %vm1202_vm7, %v6837_v47, %v6838_v56  ;;  %v4275_v31 = vsel %vm1202_vm7, %v6842_v27, %v6843_v40  ;;  %5839 = vmatpush1.bf16.msra.mxu1 %v5838_v2  ;;  %v11195_v2 = vunpack.i.h.bf16 %v9893_v26 }
 0x2ed   : > { %7050 = vrot.lane.b32.xlu1 %v11152_v51, %s7402_s9  ;;  %7045 = vrot.lane.b32.xlu0 %v11149_v3, %s7402_s9  ;;  %v10125_v61 = vpop.permute.xlu1 %6850  ;;  %v6846_v13 = vpop.permute.xlu0 %6845  ;;  %v5888_v48 = vpack.c.bf16 %v4275_v31, %v4265_v37  ;;  %v11196_v37 = vunpack.i.h.bf16 %v9849_v39 }
 0x2ee   : > { %v6853_v51 = vunpack.i.h.bf16 %v10125_v61  ;;  %v6852_v59 = vunpack.i.l.bf16 %v10125_v61  ;;  %v6848_v3 = vunpack.i.h.bf16 %v6846_v13  ;;  %v6847_v11 = vunpack.i.l.bf16 %v6846_v13 }
 0x2ef   : > { %5889 = vmatprep.subr.bf16.mxu0 %v5888_v48  ;;  %v3602_v48 = vsel %vm3559_vm11, %v11197_v34, %v6833_v53 }
 0x2f0   : > { %v10143_v15 = vsel %vm3559_vm11, %v11195_v2, %v6853_v51  ;;  %v3612_v31 = vsel %vm3559_vm11, %v11196_v37, %v6852_v59  ;;  %v4274_v61 = vsel %vm1202_vm7, %v6848_v3, %v6842_v27  ;;  %v4264_v13 = vsel %vm1202_vm7, %v6847_v11, %v6837_v47 }
 0x2f1   : > { %7060 = vrot.lane.b32.xlu1 %v11194_v36, %s7402_s9  ;;  %7055 = vrot.lane.b32.xlu0 %v11151_v6, %s7402_s9  ;;  %v5862_v26 = vpack.c.bf16 %v10143_v15, %v10134_v45  ;;  %v5890_v21 = vpack.c.bf16 %v4274_v61, %v4264_v13  ;;  %v10157_v10 = vpop.permute.xlu1 %6860  ;;  %v10159_v39 = vpop.permute.xlu0 %6855  ;;  %v11198_v36 = vunpack.i.l.bf16 %v9945_v8  ;;  %v5842_v47 = vpack.c.bf16 %v3612_v31, %v3602_v48  ;;  %v11200_v31 = vld [vmem:[#allocation60_spill] sm:$0xff]  ;;  %v11201_v13 = vld [vmem:[#allocation63_spill] sm:$0xff] }
 0x2f2   : > { %v6863_v3 = vunpack.i.h.bf16 %v10157_v10  ;;  %v11199_v6 = vunpack.i.h.bf16 %v9921_v7  ;;  %v6862_v11 = vunpack.i.l.bf16 %v10157_v10  ;;  %v6858_v2 = vunpack.i.h.bf16 %v10159_v39 }
 0x2f3   : > { %v3613_v27 = vsel %vm3559_vm11, %v6852_v59, %v11198_v36  ;;  %v6857_v37 = vunpack.i.l.bf16 %v10159_v39  ;;  %5891 = vmatpush1.bf16.msra.mxu0 %v5890_v21  ;;  %v11202_v34 = vpack.i.bf16 %v11200_v31, %v11201_v13  ;;  %v11204_v13 = vunpack.i.l.bf16 %v9768_v14 }
 0x2f4   : > { %v3603_v18 = vsel %vm3559_vm11, %v6833_v53, %v11199_v6 }
 0x2f5   : > { %7070 = vrot.lane.b32.xlu1 %v11153_v38, %s7402_s9  ;;  %v5840_v61 = vpack.c.bf16 %v3613_v27, %v3603_v18  ;;  %7065 = vrot.lane.b32.xlu0 %v11154_v33, %s7402_s9  ;;  %v10175_v8 = vpop.permute.xlu1 %4206  ;;  %v4205_v59 = vpop.permute.xlu0 %4204  ;;  %v4229_v38 = vsel %vm1202_vm7, %v6857_v37, %v6858_v2  ;;  %v4239_v33 = vsel %vm1202_vm7, %v6862_v11, %v6863_v3  ;;  %v10196_v18 = vld [vmem:[#allocation6 + $0x28] sm:$0xff] }
 0x2f6   : > { %v4285_v53 = vsel %vm1202_vm7, %v4205_v59, %v10175_v8  ;;  %v5904_v6 = vpack.c.bf16 %v4239_v33, %v4229_v38 }
 0x2f7   : > { %5841 = vmatprep.subr.bf16.mxu1 %v5840_v61  ;;  %4379 = vmatprep.subr.mxu0 %v4285_v53 }
 0x2f8   : > { %5843 = vmatpush1.bf16.msra.mxu1 %v5842_v47 }
 0x2f9   : > { %7080 = vrot.lane.b32.xlu1 %v11202_v34, %s7402_s9  ;;  %7075 = vrot.lane.b32.xlu0 %v11155_v50, %s7402_s9  ;;  %v4203_v48 = vpop.permute.xlu1 %4202  ;;  %v10191_v21 = vpop.permute.xlu0 %6865  ;;  %v11205_v34 = vunpack.i.h.bf16 %v9988_v42 }
 0x2fa   : > { %v4284_v36 = vsel %vm1202_vm7, %v4203_v48, %v4205_v59  ;;  %v6868_v27 = vunpack.i.h.bf16 %v10191_v21  ;;  %v6867_v47 = vunpack.i.l.bf16 %v10191_v21 }
 0x2fb   : > { %4380 = vmatpush1.msra.mxu0 %v4284_v36  ;;  %v3597_v38 = vsel %vm3559_vm11, %v6853_v51, %v11205_v34  ;;  %v7234_v36 = vld [vmem:[#allocation2 + $0x278] sm:$0xff]  ;;  %v11208_v51 = vunpack.i.l.bf16 %v9821_v41  ;;  %v11209_v41 = vpack.c.bf16 %v9786_v44, %v9799_v55 }
 0x2fc   : > { %v4238_v50 = vsel %vm1202_vm7, %v6868_v27, %v6862_v11  ;;  %v4228_v61 = vsel %vm1202_vm7, %v6867_v47, %v6857_v37  ;;  %5905 = vmatprep.subr.bf16.mxu0 %v5904_v6  ;;  %5567 = vmatmul.mubr.msk.f32.vlgmr.msra.gmra.mrb[0].mxu0 %vm1202_vm7, %v10196_v18  ;;  %v7235_v6 = vld [vmem:[#allocation2 + $0x270] sm:$0xff] }
 0x2fd   : > { %7090 = vrot.lane.b32.xlu1 %v11156_v5, %s7402_s9  ;;  %7085 = vrot.lane.b32.xlu0 %v9743_v54, %s7402_s9  ;;  %v5906_v59 = vpack.c.bf16 %v4238_v50, %v4228_v61  ;;  %v10208_v53 = vpop.permute.xlu1 %6870  ;;  %v3544_v31 = vpop.permute.xlu0 %3543  ;;  %v11203_v5 = vunpack.i.h.bf16 %v9768_v14  ;;  %v11206_v14 = vunpack.i.l.bf16 %v9734_v12  ;;  %v3587_v50 = vsel %vm3559_vm11, %v6723_v49, %v11208_v51 }
 0x2fe   : > { %v3622_v37 = vsel %vm3559_vm11, %v9876_v0, %v3544_v31  ;;  %v3623_v54 = vsel %vm3559_vm11, %v3544_v31, %v9965_v58  ;;  %4573 = vmatprep.mubr.f32.mxu0 %v10987_v30  ;;  %v6873_v33 = vunpack.i.h.bf16 %v10208_v53  ;;  %v6872_v48 = vunpack.i.l.bf16 %v10208_v53 }
 0x2ff   : > { %v3577_v11 = vsel %vm3559_vm11, %v11204_v13, %v11203_v5  ;;  %3786 = vmatprep.subr.mxu1 %v3623_v54  ;;  %v11207_v0 = vunpack.i.h.bf16 %v9709_v23  ;;  %5907 = vmatpush1.bf16.msra.mxu0 %v5906_v59  ;;  %v5860_v12 = vpack.c.bf16 %v3597_v38, %v3587_v50  ;;  %v11210_v51 = vunpack.i.l.bf16 %v9921_v7 }
 0x300   : > { %3787 = vmatpush1.msra.mxu1 %v3622_v37  ;;  %v4249_v49 = vsel %vm1202_vm7, %v6872_v48, %v6873_v33 }
 0x301   : > { %4878 = vrot.lane.b32.xlu1 %v7234_v36, %s7402_s9  ;;  %v3567_v58 = vsel %vm3559_vm11, %v11207_v0, %v11206_v14  ;;  %4876 = vrot.lane.b32.xlu0 %v7235_v6, %s7402_s9  ;;  %v10239_v61 = vpop.permute.xlu1 %6880  ;;  %v10241_v31 = vpop.permute.xlu0 %6875 }
 0x302   : > { %v5856_v42 = vpack.c.bf16 %v3577_v11, %v3567_v58  ;;  %v6883_v23 = vunpack.i.h.bf16 %v10239_v61  ;;  %v6882_v5 = vunpack.i.l.bf16 %v10239_v61  ;;  %v6878_v13 = vunpack.i.h.bf16 %v10241_v31  ;;  %5563 = vmatmul.mubr.msk.f32.vlgmr.msra.gmra.mrb[2].mxu1 %vm1202_vm7, %v9902_v63 }
 0x303   : > { %v6877_v59 = vunpack.i.l.bf16 %v10241_v31  ;;  %3980 = vmatprep.mubr.f32.mxu1 %v10987_v30 }
 0x304   : > { %5857 = vmatprep.subr.bf16.mxu1 %v5856_v42  ;;  %v4248_v11 = vsel %vm1202_vm7, %v6882_v5, %v6872_v48 }
 0x305   : > { %5859 = vmatpush1.bf16.msra.mxu1 %v11209_v41  ;;  %4874 = vrot.lane.b32.xlu1 %v7236_v57, %s7402_s9  ;;  %v4258_v37 = vsel %vm1202_vm7, %v6883_v23, %v6877_v59  ;;  %v4259_v44 = vsel %vm1202_vm7, %v6877_v59, %v6878_v13  ;;  %v10267_v54 = vpop.permute.xlu1 %6890  ;;  %v10269_v34 = vpop.permute.xlu0 %6885 }
 0x306   : > { %7095 = vrot.lane.b32.xlu0 %v9801_v20, %s7402_s9  ;;  %5861 = vmatprep.subr.bf16.mxu1 %v5860_v12  ;;  %v5910_v55 = vpack.c.bf16 %v4258_v37, %v4248_v11  ;;  %v5908_v38 = vpack.c.bf16 %v4259_v44, %v4249_v49  ;;  %v6893_v48 = vunpack.i.h.bf16 %v10267_v54  ;;  %v6892_v36 = vunpack.i.l.bf16 %v10267_v54 }
 0x307   : > { %v6888_v14 = vunpack.i.h.bf16 %v10269_v34  ;;  %v6887_v20 = vunpack.i.l.bf16 %v10269_v34  ;;  %v11211_v12 = vunpack.i.l.bf16 %v9923_v46  ;;  %v11212_v37 = vunpack.i.h.bf16 %v10009_v62 }
 0x308   : > { %5909 = vmatprep.subr.bf16.mxu0 %v5908_v38  ;;  %v4279_v58 = vsel %vm1202_vm7, %v6892_v36, %v6893_v48 }
 0x309   : > { %5863 = vmatpush1.bf16.msra.mxu1 %v5862_v26  ;;  %4872 = vrot.lane.b32.xlu1 %v9687_v43, %s7402_s9  ;;  %v4269_v0 = vsel %vm1202_vm7, %v6887_v20, %v6888_v14  ;;  %v6901_v6 = vpop.permute.xlu1 %6900  ;;  %v10289_v42 = vpop.permute.xlu0 %6895 }
 0x30a   : > { %7100 = vrot.lane.b32.xlu0 %v9947_v19, %s7402_s9  ;;  %5911 = vmatpush1.bf16.msra.mxu0 %v5910_v55  ;;  %v5912_v45 = vpack.c.bf16 %v4279_v58, %v4269_v0  ;;  %v6903_v15 = vunpack.i.h.bf16 %v6901_v6  ;;  %v6902_v26 = vunpack.i.l.bf16 %v6901_v6  ;;  %v6898_v43 = vunpack.i.h.bf16 %v10289_v42 }
 0x30b   : > { %v6897_v19 = vunpack.i.l.bf16 %v10289_v42 }
 0x30c   : > { %5913 = vmatprep.subr.bf16.mxu0 %v5912_v45  ;;  %v3616_v50 = vsel %vm3559_vm11, %v11210_v51, %v6903_v15  ;;  %v3606_v59 = vsel %vm3559_vm11, %v11211_v12, %v6902_v26  ;;  %v4278_v41 = vsel %vm1202_vm7, %v6898_v43, %v6892_v36  ;;  %v3607_v46 = vsel %vm3559_vm11, %v6902_v26, %v6797_v16  ;;  %v11213_v45 = vld [vmem:[#allocation71_spill] sm:$0xff] }
 0x30d   : > { %7110 = vrot.lane.b32.xlu1 %v11157_v60, %s7402_s9  ;;  %v4268_v57 = vsel %vm1202_vm7, %v6897_v19, %v6887_v20  ;;  %v10309_v60 = vpop.f32.mrb[0].mxu1  ;;  %v6911_v49 = vpop.permute.xlu1 %6910  ;;  %v3617_v44 = vsel %vm3559_vm11, %v6903_v15, %v11212_v37  ;;  %v5866_v55 = vpack.c.bf16 %v3616_v50, %v3606_v59  ;;  %v11214_v26 = vld [vmem:[#allocation51_spill] sm:$0xff] }
 0x30e   : > { %7105 = vrot.lane.b32.xlu0 %v11158_v24, %s7402_s9  ;;  %v5914_v7 = vpack.c.bf16 %v4278_v41, %v4268_v57  ;;  %v6906_v11 = vpop.permute.xlu0 %6905  ;;  %v6913_v38 = vunpack.i.h.bf16 %v6911_v49  ;;  %v10317_v36 = vpop.f32.mrb[1].mxu1  ;;  %v6912_v20 = vunpack.i.l.bf16 %v6911_v49  ;;  %v5864_v58 = vpack.c.bf16 %v3617_v44, %v3607_v46 }
 0x30f   : > { %v6908_v0 = vunpack.i.h.bf16 %v6906_v11  ;;  %v6907_v24 = vunpack.i.l.bf16 %v6906_v11  ;;  %v10343_v57 = vpop.f32.mrb[4].mxu1  ;;  %v11215_v11 = vld [vmem:[#allocation72_spill] sm:$0xff] }
 0x310   : > { %5915 = vmatpush1.bf16.msra.mxu0 %v5914_v7  ;;  %5865 = vmatprep.subr.bf16.mxu1 %v5864_v58  ;;  %v10353_v46 = vpop.f32.mrb[5].mxu1 }
 0x311   : > { %7120 = vrot.lane.b32.xlu1 %v11171_v22, %s7402_s9  ;;  %v10323_v16 = vpop.permute.xlu1 %4214  ;;  %5867 = vmatpush1.bf16.msra.mxu1 %v5866_v55  ;;  %v4233_v15 = vsel %vm1202_vm7, %v6907_v24, %v6908_v0  ;;  %v4243_v22 = vsel %vm1202_vm7, %v6912_v20, %v6913_v38  ;;  %v7403_v55 = vmov 0   ;;  %v11216_v0 = vld [vmem:[#allocation24_spill] sm:$0xff] }
 0x312   : > { %7115 = vrot.lane.b32.xlu0 %v11159_v52, %s7402_s9  ;;  %v4213_v62 = vpop.permute.xlu0 %4212  ;;  %v5928_v41 = vpack.c.bf16 %v4243_v22, %v4233_v15  ;;  %v11217_v15 = vunpack.i.h.bf16 %v10041_v28 }
 0x313   : > { %v4289_v6 = vsel %vm1202_vm7, %v4213_v62, %v10323_v16  ;;  %7144 = vset.pattern.permute.xlu0 %v7403_v55 }
 0x314   : > { %4521 = vmatprep.subr.mxu0 %v4289_v6  ;;  %v7237_v6 = vld [vmem:[#allocation2 + $0x298] sm:$0xff] }
 0x315   : > { %7130 = vrot.lane.b32.xlu1 %v11213_v45, %s7402_s9  ;;  %v10333_v52 = vpop.permute.xlu1 %4210 }
 0x316   : > { %7125 = vrot.lane.b32.xlu0 %v11214_v26, %s7402_s9  ;;  %v10335_v51 = vpop.permute.xlu0 %6915  ;;  %v4288_v50 = vsel %vm1202_vm7, %v10333_v52, %v4213_v62  ;;  %v10362_v62 = vpop.f32.mrb[8].mxu1  ;;  %v11218_v26 = vunpack.i.h.bf16 %v10043_v32 }
 0x317   : > { %v6918_v12 = vunpack.i.h.bf16 %v10335_v51  ;;  %v6917_v59 = vunpack.i.l.bf16 %v10335_v51  ;;  %4522 = vmatpush1.msra.mxu0 %v4288_v50  ;;  %v10365_v45 = vpop.f32.mrb[9].mxu1 }
 0x318   : > { %5929 = vmatprep.subr.bf16.mxu0 %v5928_v41  ;;  %5569 = vmatmul.mubr.msk.f32.vlgmr.msra.gmra.mrb[2].mxu0 %vm1202_vm7, %v10196_v18  ;;  %v7238_v41 = vld [vmem:[#allocation2 + $0x290] sm:$0xff] }
 0x319   : > { %7140 = vrot.lane.b32.xlu1 %v11183_v17, %s7402_s9  ;;  %v4242_v7 = vsel %vm1202_vm7, %v6918_v12, %v6912_v20  ;;  %v4232_v49 = vsel %vm1202_vm7, %v6917_v59, %v6907_v24  ;;  %v6921_v44 = vpop.permute.xlu1 %6920  ;;  %4715 = vmatprep.mubr.f32.mxu0 %v10987_v30 }
 0x31a   : > { %7135 = vrot.lane.b32.xlu0 %v11215_v11, %s7402_s9  ;;  %v5930_v37 = vpack.c.bf16 %v4242_v7, %v4232_v49  ;;  %v3552_v17 = vpop.permute.xlu0 %3551  ;;  %v6923_v38 = vunpack.i.h.bf16 %v6921_v44  ;;  %v6922_v20 = vunpack.i.l.bf16 %v6921_v44 }
 0x31b   : > { %v3626_v58 = vsel %vm3559_vm11, %v11216_v0, %v3552_v17  ;;  %v3627_v24 = vsel %vm3559_vm11, %v3552_v17, %v10059_v1 }
 0x31c   : > { %3928 = vmatprep.subr.mxu1 %v3627_v24  ;;  %v4236_v22 = vsel %vm1202_vm7, %v11217_v15, %v6923_v38  ;;  %v4226_v50 = vsel %vm1202_vm7, %v11218_v26, %v6922_v20  ;;  %5931 = vmatpush1.bf16.msra.mxu0 %v5930_v37  ;;  %v4227_v1 = vsel %vm1202_vm7, %v6922_v20, %v6867_v47  ;;  %v7239_v47 = vld [vmem:[#allocation2 + $0x288] sm:$0xff]  ;;  %v11219_v15 = vunpack.i.h.bf16 %v10069_v29 }
 0x31d   : > { %4886 = vrot.lane.b32.xlu1 %v7237_v6, %s7402_s9  ;;  %v5894_v7 = vpack.c.bf16 %v4236_v22, %v4226_v50  ;;  %3929 = vmatpush1.msra.mxu1 %v3626_v58  ;;  %v6931_v49 = vpop.permute.xlu1 %6930  ;;  %v4237_v28 = vsel %vm1202_vm7, %v6923_v38, %v6868_v27  ;;  %v11220_v26 = vunpack.i.h.bf16 %v10067_v35 }
 0x31e   : > { %4884 = vrot.lane.b32.xlu0 %v7238_v41, %s7402_s9  ;;  %v6926_v11 = vpop.permute.xlu0 %6925  ;;  %v6933_v44 = vunpack.i.h.bf16 %v6931_v49  ;;  %v6932_v32 = vunpack.i.l.bf16 %v6931_v49  ;;  %5565 = vmatmul.mubr.msk.f32.vlgmr.msra.gmra.mrb[6].mxu1 %vm1202_vm7, %v9902_v63  ;;  %v5892_v37 = vpack.c.bf16 %v4237_v28, %v4227_v1  ;;  %v5397_v63 = vld [vmem:[%s10759_s2] sm:$0xff] }
 0x31f   : > { %v6928_v17 = vunpack.i.h.bf16 %v6926_v11  ;;  %v6927_v55 = vunpack.i.l.bf16 %v6926_v11  ;;  %4502 = vmatprep.mubr.f32.mxu1 %v10987_v30 }
 0x320   : > { %v4263_v27 = vsel %vm1202_vm7, %v6932_v32, %v6933_v44  ;;  %5893 = vmatprep.subr.bf16.mxu1 %v5892_v37 }
 0x321   : > { %4880 = vrot.lane.b32.xlu1 %v9815_v25, %s7402_s9  ;;  %v4253_v21 = vsel %vm1202_vm7, %v6927_v55, %v6928_v17  ;;  %v6941_v38 = vpop.permute.xlu1 %6940  ;;  %5895 = vmatpush1.bf16.msra.mxu1 %v5894_v7 }
 0x322   : > { %4882 = vrot.lane.b32.xlu0 %v7239_v47, %s7402_s9  ;;  %v10388_v20 = vpop.permute.xlu0 %6935  ;;  %v5932_v0 = vpack.c.bf16 %v4263_v27, %v4253_v21  ;;  %v6943_v25 = vunpack.i.h.bf16 %v6941_v38  ;;  %v6942_v58 = vunpack.i.l.bf16 %v6941_v38 }
 0x323   : > { %v6938_v24 = vunpack.i.h.bf16 %v10388_v20  ;;  %v6937_v6 = vunpack.i.l.bf16 %v10388_v20 }
 0x324   : > { %5933 = vmatprep.subr.bf16.mxu0 %v5932_v0  ;;  %v4246_v22 = vsel %vm1202_vm7, %v11219_v15, %v6942_v58  ;;  %v4256_v50 = vsel %vm1202_vm7, %v11220_v26, %v6943_v25  ;;  %v4247_v29 = vsel %vm1202_vm7, %v6942_v58, %v6882_v5  ;;  %v4257_v35 = vsel %vm1202_vm7, %v6943_v25, %v6883_v23 }
 0x325   : > { %v4262_v41 = vsel %vm1202_vm7, %v6938_v24, %v6932_v32  ;;  %v4252_v1 = vsel %vm1202_vm7, %v6937_v6, %v6927_v55  ;;  %v5898_v7 = vpack.c.bf16 %v4256_v50, %v4246_v22  ;;  %v6951_v11 = vpop.permute.xlu1 %6950  ;;  %v5896_v47 = vpack.c.bf16 %v4257_v35, %v4247_v29 }
 0x326   : > { %5400 = vperm.xlu0 %7144, %v5397_v63   ;;  %v5934_v49 = vpack.c.bf16 %v4262_v41, %v4252_v1  ;;  %v6946_v28 = vpop.permute.xlu0 %6945  ;;  %v6953_v44 = vunpack.i.h.bf16 %v6951_v11  ;;  %v6952_v17 = vunpack.i.l.bf16 %v6951_v11 }
 0x327   : > { %v6948_v32 = vunpack.i.h.bf16 %v6946_v28  ;;  %v6947_v37 = vunpack.i.l.bf16 %v6946_v28  ;;  %5897 = vmatprep.subr.bf16.mxu1 %v5896_v47 }
 0x328   : > { %5935 = vmatpush1.bf16.msra.mxu0 %v5934_v49  ;;  %v4283_v21 = vsel %vm1202_vm7, %v6952_v17, %v6953_v44  ;;  %5899 = vmatpush1.bf16.msra.mxu1 %v5898_v7 }
 0x329   : > { %v4273_v55 = vsel %vm1202_vm7, %v6947_v37, %v6948_v32  ;;  %v6961_v27 = vpop.permute.xlu1 %6960 }
 0x32a   : > { %v10415_v38 = vpop.permute.xlu0 %6955  ;;  %v5936_v0 = vpack.c.bf16 %v4283_v21, %v4273_v55  ;;  %v6963_v5 = vunpack.i.h.bf16 %v6961_v27  ;;  %v6962_v61 = vunpack.i.l.bf16 %v6961_v27 }
 0x32b   : > { %v6958_v23 = vunpack.i.h.bf16 %v10415_v38  ;;  %v6957_v63 = vunpack.i.l.bf16 %v10415_v38 }
 0x32c   : > { %5937 = vmatprep.subr.bf16.mxu0 %v5936_v0  ;;  %v4266_v25 = vsel %vm1202_vm7, %v6838_v56, %v6962_v61  ;;  %v4276_v58 = vsel %vm1202_vm7, %v6843_v40, %v6963_v5  ;;  %v4267_v9 = vsel %vm1202_vm7, %v6962_v61, %v6897_v19  ;;  %v4277_v4 = vsel %vm1202_vm7, %v6963_v5, %v6898_v43 }
 0x32d   : > { %v4282_v15 = vsel %vm1202_vm7, %v6958_v23, %v6952_v17  ;;  %v4272_v22 = vsel %vm1202_vm7, %v6957_v63, %v6947_v37  ;;  %v5902_v26 = vpack.c.bf16 %v4276_v58, %v4266_v25  ;;  %v4223_v41 = vpop.permute.xlu1 %4222  ;;  %v5900_v40 = vpack.c.bf16 %v4277_v4, %v4267_v9 }
 0x32e   : > { %v5938_v50 = vpack.c.bf16 %v4282_v15, %v4272_v22  ;;  %v4221_v1 = vpop.permute.xlu0 %4220 }
 0x32f   : > { %v4293_v56 = vsel %vm1202_vm7, %v4221_v1, %v4223_v41  ;;  %5901 = vmatprep.subr.bf16.mxu1 %v5900_v40 }
 0x330   : > { %5939 = vmatpush1.bf16.msra.mxu0 %v5938_v50  ;;  %5903 = vmatpush1.bf16.msra.mxu1 %v5902_v26 }
 0x331   : > { %4663 = vmatprep.subr.mxu0 %v4293_v56  ;;  %v10438_v7 = vpop.permute.xlu1 %6970 }
 0x332   : > { %v10440_v49 = vpop.permute.xlu0 %6965  ;;  %v6973_v11 = vunpack.i.h.bf16 %v10438_v7  ;;  %v6972_v19 = vunpack.i.l.bf16 %v10438_v7 }
 0x333   : > { %v6968_v42 = vunpack.i.h.bf16 %v10440_v49  ;;  %v6967_v43 = vunpack.i.l.bf16 %v10440_v49 }
 0x334   : > { %v4900_v29 = vsel %vm4888_vm12, %v6972_v19, %v6973_v11 }
 0x335   : > { %v4890_v28 = vsel %vm4888_vm12, %v6967_v43, %v6968_v42  ;;  %v6976_v35 = vpop.permute.xlu1 %6975 }
 0x336   : > { %v10452_v44 = vpop.permute.xlu0 %4218  ;;  %v5940_v17 = vpack.c.bf16 %v4900_v29, %v4890_v28  ;;  %v6978_v32 = vunpack.i.h.bf16 %v6976_v35  ;;  %v6977_v37 = vunpack.i.l.bf16 %v6976_v35 }
 0x337   : > { %v4292_v47 = vsel %vm1202_vm7, %v10452_v44, %v4221_v1 }
 0x338   : > { %4664 = vmatpush1.msra.mxu0 %v4292_v47  ;;  %v4889_v55 = vsel %vm4888_vm12, %v6977_v37, %v6967_v43  ;;  %v4899_v21 = vsel %vm4888_vm12, %v6978_v32, %v6972_v19 }
 0x339   : > { %5941 = vmatprep.subr.bf16.mxu0 %v5940_v17  ;;  %5571 = vmatmul.mubr.msk.f32.vlgmr.msra.gmra.mrb[4].mxu0 %vm1202_vm7, %v10196_v18  ;;  %v5942_v27 = vpack.c.bf16 %v4899_v21, %v4889_v55  ;;  %v4209_v0 = vpop.permute.xlu1 %4208 }
 0x33a   : > { %v6981_v5 = vpop.permute.xlu0 %6980  ;;  %5096 = vmatprep.mubr.f32.mxu0 %v10987_v30  ;;  %v4286_v61 = vsel %vm1202_vm7, %v10175_v8, %v4209_v0  ;;  %v4287_v15 = vsel %vm1202_vm7, %v4209_v0, %v10333_v52 }
 0x33b   : > { %v6983_v25 = vunpack.i.h.bf16 %v6981_v5  ;;  %v6982_v58 = vunpack.i.l.bf16 %v6981_v5  ;;  %4450 = vmatprep.subr.mxu1 %v4287_v15  ;;  %5943 = vmatpush1.bf16.msra.mxu0 %v5942_v27 }
 0x33c   : > { %4451 = vmatpush1.msra.mxu1 %v4286_v61 }
 0x33d   : > { %v4240_v22 = vsel %vm1202_vm7, %v6863_v3, %v6983_v25  ;;  %v4230_v26 = vsel %vm1202_vm7, %v6858_v2, %v6982_v58  ;;  %v4231_v8 = vsel %vm1202_vm7, %v6982_v58, %v6917_v59  ;;  %v4241_v50 = vsel %vm1202_vm7, %v6983_v25, %v6918_v12  ;;  %v10477_v41 = vpop.permute.xlu1 %6990  ;;  %5568 = vmatmul.mubr.msk.f32.vlgmr.msra.gmra.mrb[2].mxu1 %vm1202_vm7, %v10196_v18 }
 0x33e   : > { %v5918_v52 = vpack.c.bf16 %v4240_v22, %v4230_v26  ;;  %v10479_v1 = vpop.permute.xlu0 %6985  ;;  %v5916_v10 = vpack.c.bf16 %v4241_v50, %v4231_v8  ;;  %v6993_v39 = vunpack.i.h.bf16 %v10477_v41  ;;  %v6992_v3 = vunpack.i.l.bf16 %v10477_v41  ;;  %4644 = vmatprep.mubr.f32.mxu1 %v10987_v30 }
 0x33f   : > { %v6988_v2 = vunpack.i.h.bf16 %v10479_v1  ;;  %v6987_v59 = vunpack.i.l.bf16 %v10479_v1 }
 0x340   : > { %5917 = vmatprep.subr.bf16.mxu1 %v5916_v10  ;;  %v4920_v12 = vsel %vm4888_vm12, %v6992_v3, %v6993_v39 }
 0x341   : > { %5919 = vmatpush1.bf16.msra.mxu1 %v5918_v52  ;;  %v4910_v51 = vsel %vm4888_vm12, %v6987_v59, %v6988_v2  ;;  %v7001_v9 = vpop.permute.xlu1 %7000 }
 0x342   : > { %v6996_v4 = vpop.permute.xlu0 %6995  ;;  %v5944_v40 = vpack.c.bf16 %v4920_v12, %v4910_v51  ;;  %v7003_v56 = vunpack.i.h.bf16 %v7001_v9  ;;  %v7002_v19 = vunpack.i.l.bf16 %v7001_v9 }
 0x343   : > { %v6998_v43 = vunpack.i.h.bf16 %v6996_v4  ;;  %v6997_v28 = vunpack.i.l.bf16 %v6996_v4 }
 0x344   : > { %5945 = vmatprep.subr.bf16.mxu0 %v5944_v40  ;;  %v4250_v29 = vsel %vm1202_vm7, %v6873_v33, %v7002_v19  ;;  %v4260_v35 = vsel %vm1202_vm7, %v6878_v13, %v7003_v56  ;;  %v4251_v53 = vsel %vm1202_vm7, %v7002_v19, %v6937_v6  ;;  %v4261_v33 = vsel %vm1202_vm7, %v7003_v56, %v6938_v24 }
 0x345   : > { %v4919_v17 = vsel %vm4888_vm12, %v6998_v43, %v6992_v3  ;;  %v4909_v32 = vsel %vm4888_vm12, %v6997_v28, %v6987_v59  ;;  %v5922_v37 = vpack.c.bf16 %v4260_v35, %v4250_v29  ;;  %v5920_v5 = vpack.c.bf16 %v4261_v33, %v4251_v53  ;;  %v10554_v28 = vld [vmem:[#allocation6 + $0x30] sm:$0xff] }
 0x346   : > { %v5946_v47 = vpack.c.bf16 %v4919_v17, %v4909_v32 }
 0x347   : > { %v10502_v55 = vpop.permute.xlu1 %7010  ;;  %v10504_v21 = vpop.permute.xlu0 %7005  ;;  %5921 = vmatprep.subr.bf16.mxu1 %v5920_v5 }
 0x348   : > { %v7013_v31 = vunpack.i.h.bf16 %v10502_v55  ;;  %v7012_v13 = vunpack.i.l.bf16 %v10502_v55  ;;  %v7008_v27 = vunpack.i.h.bf16 %v10504_v21  ;;  %v7007_v0 = vunpack.i.l.bf16 %v10504_v21  ;;  %5947 = vmatpush1.bf16.msra.mxu0 %v5946_v47  ;;  %5923 = vmatpush1.bf16.msra.mxu1 %v5922_v37 }
 0x34a   : > { %v4930_v61 = vsel %vm4888_vm12, %v7007_v0, %v7008_v27  ;;  %v4940_v20 = vsel %vm4888_vm12, %v7012_v13, %v7013_v31 }
 0x34b   : > { %v7021_v24 = vpop.permute.xlu1 %7020  ;;  %v7016_v6 = vpop.permute.xlu0 %7015  ;;  %v5948_v25 = vpack.c.bf16 %v4940_v20, %v4930_v61 }
 0x34c   : > { %v7023_v58 = vunpack.i.h.bf16 %v7021_v24  ;;  %v7022_v15 = vunpack.i.l.bf16 %v7021_v24  ;;  %v7018_v22 = vunpack.i.h.bf16 %v7016_v6  ;;  %v7017_v26 = vunpack.i.l.bf16 %v7016_v6 }
 0x34d   : > { %5949 = vmatprep.subr.bf16.mxu0 %v5948_v25 }
 0x34e   : > { %v4270_v8 = vsel %vm1202_vm7, %v6888_v14, %v7022_v15  ;;  %v4280_v50 = vsel %vm1202_vm7, %v6893_v48, %v7023_v58  ;;  %v4939_v52 = vsel %vm4888_vm12, %v7018_v22, %v7012_v13  ;;  %v4929_v10 = vsel %vm4888_vm12, %v7017_v26, %v7007_v0 }
 0x34f   : > { %v5926_v3 = vpack.c.bf16 %v4280_v50, %v4270_v8  ;;  %v5950_v59 = vpack.c.bf16 %v4939_v52, %v4929_v10  ;;  %v10530_v51 = vpop.permute.xlu1 %7030  ;;  %v4271_v12 = vsel %vm1202_vm7, %v7022_v15, %v6957_v63  ;;  %v4281_v34 = vsel %vm1202_vm7, %v7023_v58, %v6958_v23  ;;  %v10538_v14 = vpop.permute.xlu0 %7025 }
 0x350   : > { %v5924_v54 = vpack.c.bf16 %v4281_v34, %v4271_v12  ;;  %v7033_v48 = vunpack.i.h.bf16 %v10530_v51  ;;  %v7032_v9 = vunpack.i.l.bf16 %v10530_v51  ;;  %v7028_v4 = vunpack.i.h.bf16 %v10538_v14 }
 0x351   : > { %v7027_v40 = vunpack.i.l.bf16 %v10538_v14  ;;  %5951 = vmatpush1.bf16.msra.mxu0 %v5950_v59 }
 0x352   : > { %5925 = vmatprep.subr.bf16.mxu1 %v5924_v54  ;;  %v4904_v19 = vsel %vm4888_vm12, %v7032_v9, %v7033_v48 }
 0x353   : > { %5927 = vmatpush1.bf16.msra.mxu1 %v5926_v3  ;;  %v10544_v56 = vpop.permute.xlu1 %4870  ;;  %v4869_v63 = vpop.permute.xlu0 %4868  ;;  %v4894_v23 = vsel %vm4888_vm12, %v7027_v40, %v7028_v4 }
 0x354   : > { %v4950_v38 = vsel %vm4888_vm12, %v4869_v63, %v10544_v56  ;;  %v5964_v17 = vpack.c.bf16 %v4904_v19, %v4894_v23 }
 0x355   : > { %5044 = vmatprep.subr.mxu0 %v4950_v38 }
 0x357   : > { %v4867_v43 = vpop.permute.xlu1 %4866  ;;  %v7036_v35 = vpop.permute.xlu0 %7035 }
 0x358   : > { %v4949_v29 = vsel %vm4888_vm12, %v4867_v43, %v4869_v63  ;;  %v7038_v32 = vunpack.i.h.bf16 %v7036_v35  ;;  %v7037_v37 = vunpack.i.l.bf16 %v7036_v35 }
 0x359   : > { %5045 = vmatpush1.msra.mxu0 %v4949_v29 }
 0x35a   : > { %5572 = vmatmul.mubr.msk.f32.vlgmr.msra.gmra.mrb[0].mxu0 %vm1202_vm7, %v10554_v28  ;;  %5965 = vmatprep.subr.bf16.mxu0 %v5964_v17  ;;  %v4903_v47 = vsel %vm4888_vm12, %v7038_v32, %v7032_v9  ;;  %v4893_v53 = vsel %vm4888_vm12, %v7037_v37, %v7027_v40 }
 0x35b   : > { %v7041_v33 = vpop.permute.xlu1 %7040  ;;  %5238 = vmatprep.mubr.f32.mxu0 %v10987_v30  ;;  %v5966_v13 = vpack.c.bf16 %v4903_v47, %v4893_v53  ;;  %v4217_v61 = vpop.permute.xlu0 %4216 }
 0x35c   : > { %v7043_v0 = vunpack.i.h.bf16 %v7041_v33  ;;  %v7042_v5 = vunpack.i.l.bf16 %v7041_v33  ;;  %v4290_v20 = vsel %vm1202_vm7, %v10323_v16, %v4217_v61  ;;  %v4291_v24 = vsel %vm1202_vm7, %v4217_v61, %v10452_v44 }
 0x35d   : > { %4592 = vmatprep.subr.mxu1 %v4291_v24  ;;  %5967 = vmatpush1.bf16.msra.mxu0 %v5966_v13 }
 0x35e   : > { %v4891_v6 = vsel %vm4888_vm12, %v6968_v42, %v7042_v5  ;;  %v4901_v25 = vsel %vm4888_vm12, %v6973_v11, %v7043_v0  ;;  %v4892_v58 = vsel %vm4888_vm12, %v7042_v5, %v7037_v37  ;;  %4593 = vmatpush1.msra.mxu1 %v4290_v20  ;;  %v4902_v16 = vsel %vm4888_vm12, %v7043_v0, %v7038_v32 }
 0x35f   : > { %v5954_v15 = vpack.c.bf16 %v4901_v25, %v4891_v6  ;;  %v10573_v22 = vpop.permute.xlu1 %7050  ;;  %v10578_v26 = vpop.permute.xlu0 %7045  ;;  %v5952_v42 = vpack.c.bf16 %v4902_v16, %v4892_v58  ;;  %5570 = vmatmul.mubr.msk.f32.vlgmr.msra.gmra.mrb[6].mxu1 %vm1202_vm7, %v10196_v18 }
 0x360   : > { %v7053_v44 = vunpack.i.h.bf16 %v10573_v22  ;;  %v7052_v49 = vunpack.i.l.bf16 %v10573_v22  ;;  %v7048_v7 = vunpack.i.h.bf16 %v10578_v26  ;;  %v7047_v11 = vunpack.i.l.bf16 %v10578_v26  ;;  %5167 = vmatprep.mubr.f32.mxu1 %v10987_v30 }
 0x361   : > { %5953 = vmatprep.subr.bf16.mxu1 %v5952_v42 }
 0x362   : > { %v4924_v8 = vsel %vm4888_vm12, %v7052_v49, %v7053_v44  ;;  %5955 = vmatpush1.bf16.msra.mxu1 %v5954_v15  ;;  %v4914_v52 = vsel %vm4888_vm12, %v7047_v11, %v7048_v7 }
 0x363   : > { %v7061_v50 = vpop.permute.xlu1 %7060  ;;  %v7056_v18 = vpop.permute.xlu0 %7055  ;;  %v5968_v59 = vpack.c.bf16 %v4924_v8, %v4914_v52 }
 0x364   : > { %v7063_v10 = vunpack.i.h.bf16 %v7061_v50  ;;  %v7062_v3 = vunpack.i.l.bf16 %v7061_v50  ;;  %v7058_v12 = vunpack.i.h.bf16 %v7056_v18  ;;  %v7057_v34 = vunpack.i.l.bf16 %v7056_v18 }
 0x365   : > { %5969 = vmatprep.subr.bf16.mxu0 %v5968_v59 }
 0x366   : > { %v4911_v54 = vsel %vm4888_vm12, %v6988_v2, %v7062_v3  ;;  %v4921_v9 = vsel %vm4888_vm12, %v6993_v39, %v7063_v10  ;;  %v4923_v63 = vsel %vm4888_vm12, %v7058_v12, %v7052_v49  ;;  %v4913_v38 = vsel %vm4888_vm12, %v7057_v34, %v7047_v11 }
 0x367   : > { %v5958_v40 = vpack.c.bf16 %v4921_v9, %v4911_v54  ;;  %v10599_v23 = vpop.permute.xlu1 %7070  ;;  %v4912_v19 = vsel %vm4888_vm12, %v7062_v3, %v7057_v34  ;;  %v5970_v43 = vpack.c.bf16 %v4923_v63, %v4913_v38  ;;  %v10604_v2 = vpop.permute.xlu0 %7065  ;;  %v4922_v41 = vsel %vm4888_vm12, %v7063_v10, %v7058_v12 }
 0x368   : > { %v7073_v29 = vunpack.i.h.bf16 %v10599_v23  ;;  %v7072_v1 = vunpack.i.l.bf16 %v10599_v23  ;;  %v7068_v39 = vunpack.i.h.bf16 %v10604_v2  ;;  %v7067_v35 = vunpack.i.l.bf16 %v10604_v2 }
 0x369   : > { %v5956_v17 = vpack.c.bf16 %v4922_v41, %v4912_v19  ;;  %5971 = vmatpush1.bf16.msra.mxu0 %v5970_v43 }
 0x36a   : > { %v4944_v32 = vsel %vm4888_vm12, %v7072_v1, %v7073_v29  ;;  %v4934_v47 = vsel %vm4888_vm12, %v7067_v35, %v7068_v39 }
 0x36b   : > { %5957 = vmatprep.subr.bf16.mxu1 %v5956_v17  ;;  %v7081_v37 = vpop.permute.xlu1 %7080  ;;  %v7076_v13 = vpop.permute.xlu0 %7075  ;;  %v5972_v0 = vpack.c.bf16 %v4944_v32, %v4934_v47 }
 0x36c   : > { %5959 = vmatpush1.bf16.msra.mxu1 %v5958_v40  ;;  %v7083_v53 = vunpack.i.h.bf16 %v7081_v37  ;;  %v7082_v33 = vunpack.i.l.bf16 %v7081_v37  ;;  %v7078_v5 = vunpack.i.h.bf16 %v7076_v13  ;;  %v7077_v61 = vunpack.i.l.bf16 %v7076_v13 }
 0x36d   : > { %5973 = vmatprep.subr.bf16.mxu0 %v5972_v0 }
 0x36e   : > { %v4931_v20 = vsel %vm4888_vm12, %v7008_v27, %v7082_v33  ;;  %v4941_v24 = vsel %vm4888_vm12, %v7013_v31, %v7083_v53  ;;  %v4943_v6 = vsel %vm4888_vm12, %v7078_v5, %v7072_v1  ;;  %v4933_v25 = vsel %vm4888_vm12, %v7077_v61, %v7067_v35 }
 0x36f   : > { %v7091_v58 = vpop.permute.xlu1 %7090  ;;  %v4932_v15 = vsel %vm4888_vm12, %v7082_v33, %v7077_v61  ;;  %v5962_v16 = vpack.c.bf16 %v4941_v24, %v4931_v20  ;;  %v5974_v49 = vpack.c.bf16 %v4943_v6, %v4933_v25  ;;  %v7086_v11 = vpop.permute.xlu0 %7085  ;;  %v4942_v21 = vsel %vm4888_vm12, %v7083_v53, %v7078_v5 }
 0x370   : > { %v7093_v42 = vunpack.i.h.bf16 %v7091_v58  ;;  %v7092_v8 = vunpack.i.l.bf16 %v7091_v58  ;;  %v7088_v27 = vunpack.i.h.bf16 %v7086_v11  ;;  %v7087_v50 = vunpack.i.l.bf16 %v7086_v11 }
 0x371   : > { %v5960_v55 = vpack.c.bf16 %v4942_v21, %v4932_v15  ;;  %5975 = vmatpush1.bf16.msra.mxu0 %v5974_v49 }
 0x372   : > { %v4898_v3 = vsel %vm4888_vm12, %v7087_v50, %v7088_v27  ;;  %v4908_v18 = vsel %vm4888_vm12, %v7092_v8, %v7093_v42 }
 0x373   : > { %5961 = vmatprep.subr.bf16.mxu1 %v5960_v55  ;;  %v10625_v31 = vpop.permute.xlu1 %4878  ;;  %v4877_v52 = vpop.permute.xlu0 %4876  ;;  %v5988_v54 = vpack.c.bf16 %v4908_v18, %v4898_v3 }
 0x374   : > { %5963 = vmatpush1.bf16.msra.mxu1 %v5962_v16  ;;  %v4954_v10 = vsel %vm4888_vm12, %v4877_v52, %v10625_v31 }
 0x375   : > { %5186 = vmatprep.subr.mxu0 %v4954_v10 }
 0x377   : > { %v4875_v59 = vpop.permute.xlu1 %4874 }
 0x378   : > { %v4953_v12 = vsel %vm4888_vm12, %v4875_v59, %v4877_v52  ;;  %v7096_v34 = vpop.permute.xlu0 %7095 }
 0x379   : > { %v7098_v9 = vunpack.i.h.bf16 %v7096_v34  ;;  %v7097_v40 = vunpack.i.l.bf16 %v7096_v34  ;;  %5187 = vmatpush1.msra.mxu0 %v4953_v12 }
 0x37a   : > { %5574 = vmatmul.mubr.msk.f32.vlgmr.msra.gmra.mrb[2].mxu0 %vm1202_vm7, %v10554_v28  ;;  %5989 = vmatprep.subr.bf16.mxu0 %v5988_v54 }
 0x37b   : > { %v4907_v63 = vsel %vm4888_vm12, %v7098_v9, %v7092_v8  ;;  %v4897_v38 = vsel %vm4888_vm12, %v7097_v40, %v7087_v50  ;;  %v4873_v19 = vpop.permute.xlu1 %4872  ;;  %5380 = vmatprep.mubr.f32.mxu0 %v10987_v30 }
 0x37c   : > { %v5990_v43 = vpack.c.bf16 %v4907_v63, %v4897_v38  ;;  %v4951_v1 = vsel %vm4888_vm12, %v10544_v56, %v4873_v19  ;;  %v7101_v41 = vpop.permute.xlu0 %7100  ;;  %v4952_v35 = vsel %vm4888_vm12, %v4873_v19, %v4875_v59 }
 0x37d   : > { %v7103_v17 = vunpack.i.h.bf16 %v7101_v41  ;;  %v7102_v32 = vunpack.i.l.bf16 %v7101_v41  ;;  %5115 = vmatprep.subr.mxu1 %v4952_v35 }
 0x37e   : > { %5991 = vmatpush1.bf16.msra.mxu0 %v5990_v43  ;;  %5116 = vmatpush1.msra.mxu1 %v4951_v1 }
 0x37f   : > { %v4905_v37 = vsel %vm4888_vm12, %v7033_v48, %v7103_v17  ;;  %v4895_v47 = vsel %vm4888_vm12, %v7028_v4, %v7102_v32  ;;  %v7111_v53 = vpop.permute.xlu1 %7110  ;;  %5573 = vmatmul.mubr.msk.f32.vlgmr.msra.gmra.mrb[2].mxu1 %vm1202_vm7, %v10554_v28  ;;  %v4896_v56 = vsel %vm4888_vm12, %v7102_v32, %v7097_v40  ;;  %v4906_v33 = vsel %vm4888_vm12, %v7103_v17, %v7098_v9 }
 0x380   : > { %v5978_v13 = vpack.c.bf16 %v4905_v37, %v4895_v47  ;;  %v7113_v0 = vunpack.i.h.bf16 %v7111_v53  ;;  %v7112_v5 = vunpack.i.l.bf16 %v7111_v53  ;;  %v7106_v61 = vpop.permute.xlu0 %7105  ;;  %v5976_v20 = vpack.c.bf16 %v4906_v33, %v4896_v56  ;;  %5309 = vmatprep.mubr.f32.mxu1 %v10987_v30 }
 0x381   : > { %v7108_v51 = vunpack.i.h.bf16 %v7106_v61  ;;  %v7107_v48 = vunpack.i.l.bf16 %v7106_v61 }
 0x382   : > { %5977 = vmatprep.subr.bf16.mxu1 %v5976_v20  ;;  %v4928_v14 = vsel %vm4888_vm12, %v7112_v5, %v7113_v0 }
 0x383   : > { %5979 = vmatpush1.bf16.msra.mxu1 %v5978_v13  ;;  %v7121_v4 = vpop.permute.xlu1 %7120  ;;  %v4918_v24 = vsel %vm4888_vm12, %v7107_v48, %v7108_v51 }
 0x384   : > { %v7123_v6 = vunpack.i.h.bf16 %v7121_v4  ;;  %v7122_v25 = vunpack.i.l.bf16 %v7121_v4  ;;  %v7116_v58 = vpop.permute.xlu0 %7115  ;;  %v5992_v15 = vpack.c.bf16 %v4928_v14, %v4918_v24 }
 0x385   : > { %v7118_v16 = vunpack.i.h.bf16 %v7116_v58  ;;  %v7117_v49 = vunpack.i.l.bf16 %v7116_v58 }
 0x386   : > { %v4915_v42 = vsel %vm4888_vm12, %v7048_v7, %v7122_v25  ;;  %v4925_v30 = vsel %vm4888_vm12, %v7053_v44, %v7123_v6  ;;  %5993 = vmatprep.subr.bf16.mxu0 %v5992_v15 }
 0x387   : > { %v5982_v11 = vpack.c.bf16 %v4925_v30, %v4915_v42  ;;  %v4927_v21 = vsel %vm4888_vm12, %v7118_v16, %v7112_v5  ;;  %v4917_v8 = vsel %vm4888_vm12, %v7117_v49, %v7107_v48  ;;  %v7131_v27 = vpop.permute.xlu1 %7130  ;;  %v4916_v50 = vsel %vm4888_vm12, %v7122_v25, %v7117_v49 }
 0x388   : > { %v5994_v55 = vpack.c.bf16 %v4927_v21, %v4917_v8  ;;  %v7133_v52 = vunpack.i.h.bf16 %v7131_v27  ;;  %v7132_v10 = vunpack.i.l.bf16 %v7131_v27  ;;  %v7126_v3 = vpop.permute.xlu0 %7125  ;;  %v4926_v26 = vsel %vm4888_vm12, %v7123_v6, %v7118_v16 }
 0x389   : > { %v7128_v7 = vunpack.i.h.bf16 %v7126_v3  ;;  %v7127_v18 = vunpack.i.l.bf16 %v7126_v3  ;;  %v5980_v22 = vpack.c.bf16 %v4926_v26, %v4916_v50 }
 0x38a   : > { %5995 = vmatpush1.bf16.msra.mxu0 %v5994_v55  ;;  %v4948_v44 = vsel %vm4888_vm12, %v7132_v10, %v7133_v52 }
 0x38b   : > { %5981 = vmatprep.subr.bf16.mxu1 %v5980_v22  ;;  %v7141_v59 = vpop.permute.xlu1 %7140  ;;  %v4938_v12 = vsel %vm4888_vm12, %v7127_v18, %v7128_v7 }
 0x38c   : > { %5983 = vmatpush1.bf16.msra.mxu1 %v5982_v11  ;;  %v7143_v34 = vunpack.i.h.bf16 %v7141_v59  ;;  %v7142_v54 = vunpack.i.l.bf16 %v7141_v59  ;;  %v7136_v9 = vpop.permute.xlu0 %7135  ;;  %v5996_v40 = vpack.c.bf16 %v4948_v44, %v4938_v12 }
 0x38d   : > { %v7138_v63 = vunpack.i.h.bf16 %v7136_v9  ;;  %v7137_v38 = vunpack.i.l.bf16 %v7136_v9 }
 0x38e   : > { %v4935_v19 = vsel %vm4888_vm12, %v7068_v39, %v7142_v54  ;;  %v4945_v43 = vsel %vm4888_vm12, %v7073_v29, %v7143_v34  ;;  %5997 = vmatprep.subr.bf16.mxu0 %v5996_v40 }
 0x38f   : > { %v4947_v1 = vsel %vm4888_vm12, %v7138_v63, %v7132_v10  ;;  %v4937_v41 = vsel %vm4888_vm12, %v7137_v38, %v7127_v18  ;;  %v4887_v35 = vpop.permute.xlu1 %4886  ;;  %v4936_v17 = vsel %vm4888_vm12, %v7142_v54, %v7137_v38  ;;  %v5986_v32 = vpack.c.bf16 %v4945_v43, %v4935_v19 }
 0x390   : > { %v5998_v37 = vpack.c.bf16 %v4947_v1, %v4937_v41  ;;  %v4885_v47 = vpop.permute.xlu0 %4884  ;;  %v4946_v53 = vsel %vm4888_vm12, %v7143_v34, %v7138_v63 }
 0x391   : > { %v5984_v2 = vpack.c.bf16 %v4946_v53, %v4936_v17  ;;  %v4958_v39 = vsel %vm4888_vm12, %v4885_v47, %v4887_v35 }
 0x392   : > { %5999 = vmatpush1.bf16.msra.mxu0 %v5998_v37 }
 0x393   : > { %5985 = vmatprep.subr.bf16.mxu1 %v5984_v2  ;;  %5328 = vmatprep.subr.mxu0 %v4958_v39  ;;  %v4881_v23 = vpop.permute.xlu1 %4880 }
 0x394   : > { %5987 = vmatpush1.bf16.msra.mxu1 %v5986_v32  ;;  %v4883_v29 = vpop.permute.xlu0 %4882  ;;  %v4955_v56 = vsel %vm4888_vm12, %v10625_v31, %v4881_v23 }
 0x395   : > { %v4957_v33 = vsel %vm4888_vm12, %v4883_v29, %v4885_v47  ;;  %v4956_v13 = vsel %vm4888_vm12, %v4881_v23, %v4883_v29 }
 0x396   : > { %5257 = vmatprep.subr.mxu1 %v4956_v13  ;;  %5329 = vmatpush1.msra.mxu0 %v4957_v33 }
 0x397   : > { %5576 = vmatmul.mubr.msk.f32.vlgmr.msra.gmra.mrb[4].mxu0 %vm1202_vm7, %v10554_v28 }
 0x398   : > { %5258 = vmatpush1.msra.mxu1 %v4955_v56 }
 0x399   : > { %5575 = vmatmul.mubr.msk.f32.vlgmr.msra.gmra.mrb[6].mxu1 %vm1202_vm7, %v10554_v28 }
 0x3a5   : > { %v5401_v5 = vpop.permute.xlu0 %5400 }
 0x42d   : > { %v5098_v0 = vpop.f32.mrb[0].mxu0 }
 0x42e   : > { %v6000_v61 = vadd.f32 %v5098_v0, %v10309_v60  ;;  %v5100_v20 = vpop.f32.mrb[1].mxu0 }
 0x42f   : > { %v6001_v31 = vadd.f32 %v5100_v20, %v10317_v36 }
 0x430   : > { %v5403_v51 = vadd.f32 %v6000_v61, %v5401_v5 }
 0x431   : > { %v5404_v48 = vadd.f32 %v6001_v31, %v5401_v5 }
 0x432   : > { %5413 = vst [vmem:[%s10687_s30] sm:$0xff] %v5403_v51 }
 0x433   : > { %5414 = vst [vmem:[%s10687_s30 + $0x8] sm:$0xff] %v5404_v48 }
 0x44d   : > { %v5240_v28 = vpop.f32.mrb[2].mxu0 }
 0x44e   : > { %v6002_v14 = vadd.f32 %v5240_v28, %v10343_v57  ;;  %v5242_v60 = vpop.f32.mrb[3].mxu0 }
 0x44f   : > { %v6003_v36 = vadd.f32 %v5242_v60, %v10353_v46 }
 0x450   : > { %v5407_v4 = vadd.f32 %v6002_v14, %v5401_v5 }
 0x451   : > { %v5408_v24 = vadd.f32 %v6003_v36, %v5401_v5 }
 0x452   : > { %5417 = vst [vmem:[%s10687_s30 + $0x20] sm:$0xff] %v5407_v4  ;;  %v5169_v6 = vpop.f32.mrb[2].mxu1 }
 0x453   : > { %5418 = vst [vmem:[%s10687_s30 + $0x28] sm:$0xff] %v5408_v24  ;;  %v5405_v25 = vadd.f32 %v5401_v5, %v5169_v6  ;;  %v5171_v58 = vpop.f32.mrb[3].mxu1 }
 0x454   : > { %v5406_v15 = vadd.f32 %v5401_v5, %v5171_v58 }
 0x455   : > { %5415 = vst [vmem:[%s10687_s30 + $0x10] sm:$0xff] %v5405_v25 }
 0x456   : > { %5416 = vst [vmem:[%s10687_s30 + $0x18] sm:$0xff] %v5406_v15 }
 0x46a   : > { %v5382_v16 = vpop.f32.mrb[4].mxu0 }
 0x46b   : > { %v6004_v57 = vadd.f32 %v5382_v16, %v10362_v62  ;;  %v5384_v46 = vpop.f32.mrb[5].mxu0 }
 0x46c   : > { %v5311_v49 = vpop.f32.mrb[6].mxu1  ;;  %v6005_v42 = vadd.f32 %v5384_v46, %v10365_v45 }
 0x46d   : > { %v5411_v30 = vadd.f32 %v6004_v57, %v5401_v5  ;;  %v5409_v11 = vadd.f32 %v5401_v5, %v5311_v49  ;;  %v5313_v21 = vpop.f32.mrb[7].mxu1 }
 0x46e   : > { %v5412_v8 = vadd.f32 %v6005_v42, %v5401_v5  ;;  %v5410_v27 = vadd.f32 %v5401_v5, %v5313_v21 }
 0x46f   : > { %5421 = vst [vmem:[%s10687_s30 + $0x40] sm:$0xff] %v5411_v30  ;;  %5419 = vst [vmem:[%s10687_s30 + $0x30] sm:$0xff] %v5409_v11 }
 0x470   : > { %5422 = vst [vmem:[%s10687_s30 + $0x48] sm:$0xff] %v5412_v8  ;;  %5420 = vst [vmem:[%s10687_s30 + $0x38] sm:$0xff] %v5410_v27 }
 0x471   : > { %7311 = shalt.err (!%p7308_p5)
}
 0x472   : > { %s7312_s18 = scalar_lea.hbm %s10704_s8, 1280  ;;  %s7316_s9 = scalar_lea.hbm %s10760_s3, 2560 }
 0x473   : > { %p7313_p9 = scmp.ne.s32.totalorder %s10704_s8, %s7312_s18  ;;  %p7317_p7 = scmp.lt.u32.totalorder %s10704_s8, %s10760_s3 }
 0x474   : > { %p7318_p3 = scmp.lt.u32.totalorder %s7316_s9, %s7312_s18  ;;  %p7320_p11 = scmp.lt.u32.totalorder %s7312_s18, %s10704_s8 }
 0x475   : > { %p7314_p1 = pnand %p7313_p9, %p7517_p10 }
 0x476   : > { %p7319_p4 = por %p7318_p3, %p7317_p7 }
 0x477   : > { %p7315_p2 = pneg %p7314_p1 }
 0x478   : > { %p7321_p6 = por %p7320_p11, %p7319_p4 }
 0x47a   : > { %p7322_p8 = pnand %p7321_p6, %p7315_p2 }
 0x47c   : > { %7325 = shalt.err (!%p7322_p8)
}
 0x47d   : > { %6071 = dma.vmem_to_hbm [thread:$0]  (%p7517_p10), %s10706_s20, 1280, %s10704_s8, %s5424_s15  }
 0x47e PF: > { %s5452_s25 = sand.u32 1, %s7364_s12   ;;  %p11221_p12 = scmp.ne.s32.totalorder %s10914_s23, 0 }
 0x47f   : > { %p11222_p13 = scmp.ge.s32.totalorder %s7384_s17, 2  ;;  %s5453_s30 = scalar_lea.sflag [#allocation5], %s5452_s25 }
 0x481   : > { %p6082_p0 = pnand %p11222_p13, %p11221_p12 }
 0x483   : > { %7359 = dma.done.wait (!%p6082_p0), %s5453_s30, 1280  }
 0x484   : > { %7361 = vsyncadd (!%p6082_p0), %s5453_s30, 4294966016  ;;  %s20_s17 = sadd.s32 1, %s7384_s17   ;;  %s11223_s12 = smov %s7368_s13 }
 0x485   : > { %p17_p5 = scmp.ge.s32.totalorder %s20_s17, 4   ;;  %s11224_s13 = smov %s7372_s14 }
 0x486   : > { %s11225_s14 = smov %s7526_s5  ;;  %s11226_s15 = smov %s7380_s16 }
 0x487   : > { %s11227_s16 = smov %s11229_s28  ;;  %19 = sbr.rel (!%p17_p5) target bundleno = 7 (0x7), region = 87 }
 0x48e   :  { %5458 = vsyncpa [#allocation4], 1 }
 0x48f   :  { %5460 = vsyncpa [#allocation4 + $0x1], 1 }
 0x490   :  { %5461 = vsyncpa [#allocation7], 1 }
 0x491   :  { %5462 = vsyncpa [#allocation5], 1 }
 0x492   :  { %5464 = vsyncpa [#allocation5 + $0x1], 1 }

</bundles_post_ra>
